<compile_context>
chip_gen: v7x
topology: tpu7x:2x2x1
jax: 0.10.0
libtpu: 0.0.40
codegen_flags: <defaults>
</compile_context>

<pallas_src>
import functools

import jax
import jax.numpy as jnp
import numpy as np
from jax.experimental import pallas as pl
from jax.experimental.pallas import tpu as pltpu


def _round_up(n, m):
    return ((n + m - 1) // m) * m


def _num_batch_blocks(Bp):
    """2-way batch split only when it feeds two TensorCores (v7x-class) and each
    block keeps >= 8 sublanes; 1 otherwise (v5e/v6e: grid is a serial loop)."""
    if Bp % 16 != 0:
        return 1
    try:
        kind = jax.devices()[0].device_kind.lower()
    except Exception:
        return 1
    return 2 if ("v7" in kind or "7x" in kind) else 1


def _pick_time_chunk(T, Bb, Hp, vmem_budget=8 * 1024 * 1024):
    """Pick Tc so Tc*Bb ~ 256 MXU rows (never the Tc=1 cliff), capped by the
    xg/hidden chunk-scratch VMEM budget, then minimize time padding."""
    target = max(8, 256 // Bb)
    bytes_per_step = Bb * 4 * Hp * 4          # xg (3Hp) + hidden (Hp), f32
    cap = max(1, vmem_budget // bytes_per_step)
    target = max(1, min(target, cap))
    n_chunks = -(-T // target)
    return -(-T // n_chunks)                  # Tc such that Tc*n_chunks >= T, minimal pad


def _vmem_limit_bytes():
    """Raise the scoped VMEM limit toward physical capacity (scoped defaults are
    16-32 MiB); leave headroom for Mosaic-internal scratch."""
    try:
        cap = int(pltpu.get_tpu_info().vmem_capacity_bytes)
    except Exception:
        cap = 64 * 1024 * 1024                # v7x physical; safe everywhere
    return min((cap * 3) // 4, 100 * 1024 * 1024)


# ---------------------------------------------------------------------------
# Fully fused GRU network kernel (all layers + FC head, one pallas_call)
# ---------------------------------------------------------------------------
def _gru_net_kernel(*refs, num_layers):
    x_ref = refs[0]
    layer_refs = [refs[1 + 4 * l: 5 + 4 * l] for l in range(num_layers)]
    i = 1 + 4 * num_layers
    fcw_ref, fcb_ref, out_ref = refs[i], refs[i + 1], refs[i + 2]
    h_carry, xg_scratch, hy_scratch = refs[i + 3], refs[i + 4], refs[i + 5]

    Tc, Bb, _ = x_ref.shape
    Hp = hy_scratch.shape[-1]
    mm_dtype = fcw_ref.dtype                  # bf16 fast path / f32 exact path
    unroll = True if Tc <= 16 else 4

    # The per-layer hidden state is carried in VMEM scratch across the time-chunk
    # axis; this relies on the time axis being the LAST (innermost, "arbitrary")
    # grid axis.  New batch block (chunk index 0): reset h0 = 0 for all layers.
    @pl.when(pl.program_id(1) == 0)
    def _():
        h_carry[...] = jnp.zeros_like(h_carry)

    def run_layer(l, x_chunk_2d):
        wx_ref, bx_ref, wh_ref, bhn_ref = layer_refs[l]

        # phase 1: ONE chunk-level MXU GEMM for the input->gates projection.
        # (r/u bias columns already hold bx+bh; the n column holds bx_n only.)
        xg = jnp.dot(x_chunk_2d.astype(mm_dtype), wx_ref[...],
                     preferred_element_type=jnp.float32) + bx_ref[...]
        xg_scratch[...] = xg.reshape(Tc, Bb, 3 * Hp)

        # phase 2: sequential scan over the chunk; wh / bh_n hoisted out of the loop.
        # TODO(synk): hold wh in the MXU staging registers across the chunk via
        # pltpu.matmul_push_rhs / matmul_acc_lhs to drop the per-step RHS push.
        wh = wh_ref[...]
        bh_n = bhn_ref[...]                   # (1, Hp)

        def step(t, h):
            g = xg_scratch[t]                 # (Bb, 3Hp), gates at 128-aligned offsets
            hg = jnp.dot(h.astype(mm_dtype), wh, preferred_element_type=jnp.float32)
            r = jax.nn.sigmoid(g[:, :Hp] + hg[:, :Hp])
            u = jax.nn.sigmoid(g[:, Hp:2 * Hp] + hg[:, Hp:2 * Hp])
            n = jnp.tanh(g[:, 2 * Hp:] + r * (hg[:, 2 * Hp:] + bh_n))
            hy = u * h + (1.0 - u) * n        # f32 gate math throughout
            hy_scratch[t] = hy
            return hy

        h_carry[l] = jax.lax.fori_loop(0, Tc, step, h_carry[l], unroll=unroll)

    # layer 0 consumes the input chunk; deeper layers consume the previous layer's
    # staged hidden sequence straight from VMEM (no HBM round-trip).
    run_layer(0, x_ref[...].reshape(Tc * Bb, x_ref.shape[-1]))
    for l in range(1, num_layers):
        run_layer(l, hy_scratch[...].reshape(Tc * Bb, Hp))

    # fused FC head: one chunk-level GEMM, lane-dense (128-multiple) output store.
    Op = fcw_ref.shape[-1]
    y = jnp.dot(hy_scratch[...].reshape(Tc * Bb, Hp).astype(mm_dtype), fcw_ref[...],
                preferred_element_type=jnp.float32) + fcb_ref[...]
    out_ref[...] = y.reshape(Tc, Bb, Op).astype(out_ref.dtype)


def _gru_net(x_tbi, layers, fc_w, fc_b, *, Tc, Bb, num_b_blocks):
    Tp, Bp, Ip0 = x_tbi.shape
    Hp = layers[0]["wh"].shape[0]
    Op = fc_w.shape[1]
    L = len(layers)
    num_chunks = Tp // Tc
    assert Tp == Tc * num_chunks and Bp == Bb * num_b_blocks

    const = lambda b, c: (0, 0)
    in_specs = [pl.BlockSpec((Tc, Bb, Ip0), lambda b, c: (c, b, 0))]     # x chunk
    args = [x_tbi]
    for lp in layers:
        Ipl = lp["wx"].shape[0]
        in_specs += [
            pl.BlockSpec((Ipl, 3 * Hp), const),    # x2h weight (pre-T, padded)
            pl.BlockSpec((1, 3 * Hp), const),      # fused gate bias (f32)
            pl.BlockSpec((Hp, 3 * Hp), const),     # h2h weight (pre-T, padded)
            pl.BlockSpec((1, Hp), const),          # bh_n (f32)
        ]
        args += [lp["wx"], lp["bx"], lp["wh"], lp["bhn"]]
    in_specs += [pl.BlockSpec((Hp, Op), const),    # fc weight
                 pl.BlockSpec((1, Op), const)]     # fc bias
    args += [fc_w, fc_b]

    return pl.pallas_call(
        functools.partial(_gru_net_kernel, num_layers=L),
        out_shape=jax.ShapeDtypeStruct((Tp, Bp, Op), jnp.float32),
        grid_spec=pltpu.PrefetchScalarGridSpec(
            num_scalar_prefetch=0,
            grid=(num_b_blocks, num_chunks),       # time MUST stay the last grid axis
            in_specs=in_specs,
            out_specs=pl.BlockSpec((Tc, Bb, Op), lambda b, c: (c, b, 0)),
            scratch_shapes=[
                pltpu.VMEM((L, Bb, Hp), jnp.float32),       # per-layer carried hidden
                pltpu.VMEM((Tc, Bb, 3 * Hp), jnp.float32),  # chunk x->gates projection
                pltpu.VMEM((Tc, Bb, Hp), jnp.float32),      # chunk hidden sequence
            ]),
        compiler_params=pltpu.CompilerParams(
            dimension_semantics=("parallel", "arbitrary"),
            vmem_limit_bytes=_vmem_limit_bytes()),
    )(*args)


# ---------------------------------------------------------------------------
# Full GRU forward (glue in plain JAX, hot path in the fused Pallas kernel)
# ---------------------------------------------------------------------------
def gru_forward(x_bti, params, output_size):
    """x_bti: (B, T, input_size) -> (B, T, output_size). Matches GRU.forward."""
    B, T, I = x_bti.shape
    layers = params["layers"]
    Ip0 = layers[0]["wx"].shape[0]
    Hp = layers[0]["wh"].shape[0]
    Bp = _round_up(B, 8)

    num_b_blocks = _num_batch_blocks(Bp)
    Bb = Bp // num_b_blocks
    Tc = _pick_time_chunk(T, Bb, Hp)
    num_chunks = -(-T // Tc)
    Tp = Tc * num_chunks

    # time-major; zero-pad batch -> Bp (sublanes), time -> Tp (chunk multiple),
    # features -> Ip0 (lanes).  Padded timesteps sit at the END of time, so they
    # never influence the real outputs and are sliced off below.
    # TODO(synk): for large B*T*I, fold the transpose/pad into the first layer's
    # index_map instead of materializing the padded copy in HBM.
    x = jnp.zeros((Tp, Bp, Ip0), jnp.float32)
    x = x.at[:T, :B, :I].set(jnp.transpose(x_bti, (1, 0, 2)).astype(jnp.float32))

    out = _gru_net(x, layers, params["fc_w"], params["fc_b"],
                   Tc=Tc, Bb=Bb, num_b_blocks=num_b_blocks)
    return jnp.transpose(out[:T, :B, :output_size], (1, 0, 2))


# ---------------------------------------------------------------------------
# Parameter init (PyTorch-shaped) + padded/fused layout for the kernel
# ---------------------------------------------------------------------------
def init_params(key, input_size, hidden_size, num_layers, output_size):
    std = 1.0 / np.sqrt(hidden_size)
    layers = []
    in_dim = input_size
    for _ in range(num_layers):
        key, k1, k2, k3, k4 = jax.random.split(key, 5)
        layers.append(dict(
            wx=jax.random.uniform(k1, (3 * hidden_size, in_dim), jnp.float32, -std, std),
            bx=jax.random.uniform(k2, (3 * hidden_size,), jnp.float32, -std, std),
            wh=jax.random.uniform(k3, (3 * hidden_size, hidden_size), jnp.float32, -std, std),
            bh=jax.random.uniform(k4, (3 * hidden_size,), jnp.float32, -std, std)))
        in_dim = hidden_size
    key, k5, k6 = jax.random.split(key, 3)
    fc_w = jax.random.uniform(k5, (output_size, hidden_size), jnp.float32, -std, std)
    fc_b = jax.random.uniform(k6, (output_size,), jnp.float32, -std, std)
    return dict(layers=layers, fc_w=fc_w, fc_b=fc_b)


def prepare_params(raw, hidden_size, matmul_dtype=jnp.bfloat16):
    """Pre-transpose for x @ W, pad to (8,128)-friendly shapes, put each gate at a
    128-aligned column offset, fold bx+bh for the r/u gates (bh_n stays separate),
    and cast the matmul weights to `matmul_dtype` (bf16 default; biases stay f32)."""
    H = hidden_size
    Hp = _round_up(H, 128)
    layers = []
    for lp in raw["layers"]:
        wx, bx, wh, bh = lp["wx"], lp["bx"], lp["wh"], lp["bh"]
        in_dim = wx.shape[1]
        Ip = _round_up(in_dim, 128)
        wx_p = jnp.zeros((Ip, 3 * Hp), jnp.float32)
        wh_p = jnp.zeros((Hp, 3 * Hp), jnp.float32)
        bx_p = jnp.zeros((1, 3 * Hp), jnp.float32)
        for g in range(3):
            wx_p = wx_p.at[:in_dim, g * Hp:g * Hp + H].set(wx[g * H:(g + 1) * H, :].T)
            wh_p = wh_p.at[:H, g * Hp:g * Hp + H].set(wh[g * H:(g + 1) * H, :].T)
            b = bx[g * H:(g + 1) * H]
            if g < 2:                       # r/u gates: fold bh into the x-side bias
                b = b + bh[g * H:(g + 1) * H]
            bx_p = bx_p.at[0, g * Hp:g * Hp + H].set(b)
        bhn_p = jnp.zeros((1, Hp), jnp.float32).at[0, :H].set(bh[2 * H:])
        layers.append(dict(wx=wx_p.astype(matmul_dtype), bx=bx_p,
                           wh=wh_p.astype(matmul_dtype), bhn=bhn_p))
    O = raw["fc_w"].shape[0]
    Op = _round_up(O, 128)
    fc_w = jnp.zeros((Hp, Op), jnp.float32).at[:H, :O].set(raw["fc_w"].T).astype(matmul_dtype)
    fc_b = jnp.zeros((1, Op), jnp.float32).at[0, :O].set(raw["fc_b"])
    return dict(layers=layers, fc_w=fc_w, fc_b=fc_b)


# ---------------------------------------------------------------------------
# Pure-JAX reference (mirrors the PyTorch forward exactly)
# ---------------------------------------------------------------------------
def gru_reference(x_bti, raw, hidden_size):
    B, T, _ = x_bti.shape
    H = hidden_size
    hidden = [jnp.zeros((B, H), jnp.float32) for _ in raw["layers"]]
    outs = []
    for t in range(T):
        inp = x_bti[:, t, :]
        for l, p in enumerate(raw["layers"]):
            layer_in = inp if l == 0 else hidden[l - 1]
            xg = layer_in @ p["wx"].T + p["bx"]
            hg = hidden[l] @ p["wh"].T + p["bh"]
            r = jax.nn.sigmoid(xg[:, :H] + hg[:, :H])
            u = jax.nn.sigmoid(xg[:, H:2 * H] + hg[:, H:2 * H])
            n = jnp.tanh(xg[:, 2 * H:] + r * hg[:, 2 * H:])
            hidden[l] = u * hidden[l] + (1.0 - u) * n
        outs.append(hidden[-1])
    ys = [o @ raw["fc_w"].T + raw["fc_b"] for o in outs]
    return jnp.stack(ys, axis=1)


if __name__ == "__main__":
    B, T = 2, 8
    INPUT_SIZE, HIDDEN_SIZE, NUM_LAYERS, OUTPUT_SIZE = 4, 32, 2, 5

    key = jax.random.PRNGKey(0)
    key, kx = jax.random.split(key)
    x = jax.random.normal(kx, (B, T, INPUT_SIZE), jnp.float32)

    raw = init_params(key, INPUT_SIZE, HIDDEN_SIZE, NUM_LAYERS, OUTPUT_SIZE)
    ref = gru_reference(x, raw, HIDDEN_SIZE)

    fwd = jax.jit(gru_forward, static_argnames=("output_size",))

    # Exact path (f32 matmul operands): tight tolerance against the reference.
    params_f32 = prepare_params(raw, HIDDEN_SIZE, matmul_dtype=jnp.float32)
    out_f32 = jax.block_until_ready(fwd(x, params_f32, output_size=OUTPUT_SIZE))
    assert out_f32.shape == (B, T, OUTPUT_SIZE), out_f32.shape
    err_f32 = float(jnp.max(jnp.abs(out_f32 - ref)))
    assert jnp.allclose(out_f32, ref, atol=1e-3, rtol=1e-3), err_f32

    # Fast path (bf16 matmul operands, f32 accumulation/gates): looser tolerance,
    # since the recurrence compounds bf16 rounding over T.
    params_bf16 = prepare_params(raw, HIDDEN_SIZE)           # default bf16
    out_bf16 = jax.block_until_ready(fwd(x, params_bf16, output_size=OUTPUT_SIZE))
    assert out_bf16.shape == (B, T, OUTPUT_SIZE), out_bf16.shape
    err_bf16 = float(jnp.max(jnp.abs(out_bf16 - ref)))
    assert jnp.allclose(out_bf16, ref, atol=2e-2, rtol=2e-2), err_bf16

    print("KERNEL_OK")
</pallas_src>

<mosaic_0001>
module attributes {stable_mosaic.version = 11 : i64} {
  func.func @_gru_net_kernel(%arg0: i32, %arg1: i32, %arg2: memref<8x8x128xf32, #tpu.memory_space<vmem>>, %arg3: memref<128x384xf32, #tpu.memory_space<vmem>>, %arg4: memref<1x384xf32, #tpu.memory_space<vmem>>, %arg5: memref<128x384xf32, #tpu.memory_space<vmem>>, %arg6: memref<1x128xf32, #tpu.memory_space<vmem>>, %arg7: memref<128x384xf32, #tpu.memory_space<vmem>>, %arg8: memref<1x384xf32, #tpu.memory_space<vmem>>, %arg9: memref<128x384xf32, #tpu.memory_space<vmem>>, %arg10: memref<1x128xf32, #tpu.memory_space<vmem>>, %arg11: memref<128x128xf32, #tpu.memory_space<vmem>>, %arg12: memref<1x128xf32, #tpu.memory_space<vmem>>, %arg13: memref<8x8x128xf32, #tpu.memory_space<vmem>>, %arg14: memref<2x8x128xf32, #tpu.memory_space<vmem>>, %arg15: memref<8x8x384xf32, #tpu.memory_space<vmem>>, %arg16: memref<8x8x128xf32, #tpu.memory_space<vmem>>) attributes {dimension_semantics = [#tpu.dimension_semantics<parallel>, #tpu.dimension_semantics<arbitrary>], iteration_bounds = array<i64: 1, 1>, scalar_prefetch = 0 : i64, scratch_operands = 3 : i64, tpu.core_type = #tpu.core_type<tc>, window_params = [{transform_indices = @transform_0, window_bounds = array<i64: 8, 8, 128>}, {pipeline_mode = #tpu.pipeline_mode<synchronous>, transform_indices = @transform_1, window_bounds = array<i64: 128, 384>}, {pipeline_mode = #tpu.pipeline_mode<synchronous>, transform_indices = @transform_2, window_bounds = array<i64: 1, 384>}, {pipeline_mode = #tpu.pipeline_mode<synchronous>, transform_indices = @transform_3, window_bounds = array<i64: 128, 384>}, {pipeline_mode = #tpu.pipeline_mode<synchronous>, transform_indices = @transform_4, window_bounds = array<i64: 1, 128>}, {pipeline_mode = #tpu.pipeline_mode<synchronous>, transform_indices = @transform_5, window_bounds = array<i64: 128, 384>}, {pipeline_mode = #tpu.pipeline_mode<synchronous>, transform_indices = @transform_6, window_bounds = array<i64: 1, 384>}, {pipeline_mode = #tpu.pipeline_mode<synchronous>, transform_indices = @transform_7, window_bounds = array<i64: 128, 384>}, {pipeline_mode = #tpu.pipeline_mode<synchronous>, transform_indices = @transform_8, window_bounds = array<i64: 1, 128>}, {pipeline_mode = #tpu.pipeline_mode<synchronous>, transform_indices = @transform_9, window_bounds = array<i64: 128, 128>}, {pipeline_mode = #tpu.pipeline_mode<synchronous>, transform_indices = @transform_10, window_bounds = array<i64: 1, 128>}, {transform_indices = @transform_11, window_bounds = array<i64: 8, 8, 128>}]} {
    %c0_i32 = arith.constant 0 : i32
    %0 = arith.cmpi eq, %arg1, %c0_i32 : i32
    %1 = arith.extui %0 : i1 to i32
    %c0_i32_0 = arith.constant 0 : i32
    %2 = arith.cmpi ne, %1, %c0_i32_0 : i32
    scf.if %2 {
      %cst_189 = arith.constant 0.000000e+00 : f32
      %620 = vector.broadcast %cst_189 : f32 to vector<2x8x128xf32>
      %c0_190 = arith.constant 0 : index
      %c0_191 = arith.constant 0 : index
      %c0_192 = arith.constant 0 : index
      %621 = vector.load %arg14[%c0_190, %c0_191, %c0_192] : memref<2x8x128xf32, #tpu.memory_space<vmem>>, vector<2x8x128xf32>
      tpu.vector_store %arg14[%c0_190, %c0_191, %c0_192], %620 {strides = array<i32>} : memref<2x8x128xf32, #tpu.memory_space<vmem>>, vector<2x8x128xf32>,
    } else {
    }
    %c0 = arith.constant 0 : index
    %c0_1 = arith.constant 0 : index
    %c0_2 = arith.constant 0 : index
    %3 = vector.load %arg2[%c0, %c0_1, %c0_2] : memref<8x8x128xf32, #tpu.memory_space<vmem>>, vector<8x8x128xf32>
    %4 = vector.shape_cast %3 : vector<8x8x128xf32> to vector<64x128xf32>
    %c0_3 = arith.constant 0 : index
    %c0_4 = arith.constant 0 : index
    %5 = vector.load %arg3[%c0_3, %c0_4] : memref<128x384xf32, #tpu.memory_space<vmem>>, vector<128x384xf32>
    %cst = arith.constant dense<0.000000e+00> : vector<64x384xf32>
    %6 = tpu.matmul %4, %5, %cst {dimension_numbers = #tpu.dot_dimension_numbers<[1], [0], [0], [1], [0, 0, 1, 1], [], []>} : vector<64x128xf32>, vector<128x384xf32>, vector<64x384xf32> -> vector<64x384xf32>
    %c0_5 = arith.constant 0 : index
    %c0_6 = arith.constant 0 : index
    %7 = vector.load %arg4[%c0_5, %c0_6] : memref<1x384xf32, #tpu.memory_space<vmem>>, vector<1x384xf32>
    %8 = vector.broadcast %7 : vector<1x384xf32> to vector<64x384xf32>
    %9 = arith.addf %6, %8 : vector<64x384xf32>
    %10 = vector.shape_cast %9 : vector<64x384xf32> to vector<8x8x384xf32>
    %c0_7 = arith.constant 0 : index
    %c0_8 = arith.constant 0 : index
    %c0_9 = arith.constant 0 : index
    %11 = vector.load %arg15[%c0_7, %c0_8, %c0_9] : memref<8x8x384xf32, #tpu.memory_space<vmem>>, vector<8x8x384xf32>
    tpu.vector_store %arg15[%c0_7, %c0_8, %c0_9], %10 {strides = array<i32>} : memref<8x8x384xf32, #tpu.memory_space<vmem>>, vector<8x8x384xf32>,
    %c0_10 = arith.constant 0 : index
    %c0_11 = arith.constant 0 : index
    %12 = vector.load %arg5[%c0_10, %c0_11] : memref<128x384xf32, #tpu.memory_space<vmem>>, vector<128x384xf32>
    %c0_12 = arith.constant 0 : index
    %c0_13 = arith.constant 0 : index
    %13 = vector.load %arg6[%c0_12, %c0_13] : memref<1x128xf32, #tpu.memory_space<vmem>>, vector<1x128xf32>
    %c0_14 = arith.constant 0 : index
    %c0_15 = arith.constant 0 : index
    %c0_16 = arith.constant 0 : index
    %14 = vector.load %arg14[%c0_14, %c0_15, %c0_16] : memref<2x8x128xf32, #tpu.memory_space<vmem>>, vector<1x8x128xf32>
    %15 = vector.shape_cast %14 : vector<1x8x128xf32> to vector<8x128xf32>
    %c0_i32_17 = arith.constant 0 : i32
    %16 = arith.index_cast %c0_i32_17 : i32 to index
    %c0_18 = arith.constant 0 : index
    %c0_19 = arith.constant 0 : index
    %17 = vector.load %arg15[%16, %c0_18, %c0_19] : memref<8x8x384xf32, #tpu.memory_space<vmem>>, vector<1x8x384xf32>
    %18 = vector.shape_cast %17 : vector<1x8x384xf32> to vector<8x384xf32>
    %cst_20 = arith.constant dense<0.000000e+00> : vector<8x384xf32>
    %19 = tpu.matmul %15, %12, %cst_20 {dimension_numbers = #tpu.dot_dimension_numbers<[1], [0], [0], [1], [0, 0, 1, 1], [], []>} : vector<8x128xf32>, vector<128x384xf32>, vector<8x384xf32> -> vector<8x384xf32>
    %20 = vector.extract_strided_slice %18 {offsets = [0, 0], sizes = [8, 128], strides = [1, 1]} : vector<8x384xf32> to vector<8x128xf32>
    %21 = vector.extract_strided_slice %19 {offsets = [0, 0], sizes = [8, 128], strides = [1, 1]} : vector<8x384xf32> to vector<8x128xf32>
    %22 = arith.addf %20, %21 : vector<8x128xf32>
    %23 = arith.negf %22 : vector<8x128xf32>
    %24 = math.exp %23 : vector<8x128xf32>
    %cst_21 = arith.constant 1.000000e+00 : f32
    %25 = vector.broadcast %cst_21 : f32 to vector<8x128xf32>
    %26 = arith.addf %25, %24 : vector<8x128xf32>
    %27 = arith.divf %25, %26 : vector<8x128xf32>
    %28 = vector.extract_strided_slice %18 {offsets = [0, 128], sizes = [8, 128], strides = [1, 1]} : vector<8x384xf32> to vector<8x128xf32>
    %29 = vector.extract_strided_slice %19 {offsets = [0, 128], sizes = [8, 128], strides = [1, 1]} : vector<8x384xf32> to vector<8x128xf32>
    %30 = arith.addf %28, %29 : vector<8x128xf32>
    %31 = arith.negf %30 : vector<8x128xf32>
    %32 = math.exp %31 : vector<8x128xf32>
    %cst_22 = arith.constant 1.000000e+00 : f32
    %33 = vector.broadcast %cst_22 : f32 to vector<8x128xf32>
    %34 = arith.addf %33, %32 : vector<8x128xf32>
    %35 = arith.divf %33, %34 : vector<8x128xf32>
    %36 = vector.extract_strided_slice %18 {offsets = [0, 256], sizes = [8, 128], strides = [1, 1]} : vector<8x384xf32> to vector<8x128xf32>
    %37 = vector.extract_strided_slice %19 {offsets = [0, 256], sizes = [8, 128], strides = [1, 1]} : vector<8x384xf32> to vector<8x128xf32>
    %38 = vector.broadcast %13 : vector<1x128xf32> to vector<8x128xf32>
    %39 = arith.addf %37, %38 : vector<8x128xf32>
    %40 = arith.mulf %27, %39 : vector<8x128xf32>
    %41 = arith.addf %36, %40 : vector<8x128xf32>
    %42 = math.tanh %41 : vector<8x128xf32>
    %43 = arith.mulf %35, %15 : vector<8x128xf32>
    %cst_23 = arith.constant 1.000000e+00 : f32
    %44 = vector.broadcast %cst_23 : f32 to vector<8x128xf32>
    %45 = arith.subf %44, %35 : vector<8x128xf32>
    %46 = arith.mulf %45, %42 : vector<8x128xf32>
    %47 = arith.addf %43, %46 : vector<8x128xf32>
    %48 = arith.index_cast %c0_i32_17 : i32 to index
    %c0_24 = arith.constant 0 : index
    %c0_25 = arith.constant 0 : index
    %49 = vector.load %arg16[%48, %c0_24, %c0_25] : memref<8x8x128xf32, #tpu.memory_space<vmem>>, vector<1x8x128xf32>
    %50 = vector.shape_cast %49 : vector<1x8x128xf32> to vector<8x128xf32>
    %51 = vector.shape_cast %47 : vector<8x128xf32> to vector<1x8x128xf32>
    tpu.vector_store %arg16[%48, %c0_24, %c0_25], %51 {strides = array<i32>} : memref<8x8x128xf32, #tpu.memory_space<vmem>>, vector<1x8x128xf32>,
    %c1_i32 = arith.constant 1 : i32
    %52 = arith.index_cast %c1_i32 : i32 to index
    %c0_26 = arith.constant 0 : index
    %c0_27 = arith.constant 0 : index
    %53 = vector.load %arg15[%52, %c0_26, %c0_27] : memref<8x8x384xf32, #tpu.memory_space<vmem>>, vector<1x8x384xf32>
    %54 = vector.shape_cast %53 : vector<1x8x384xf32> to vector<8x384xf32>
    %cst_28 = arith.constant dense<0.000000e+00> : vector<8x384xf32>
    %55 = tpu.matmul %47, %12, %cst_28 {dimension_numbers = #tpu.dot_dimension_numbers<[1], [0], [0], [1], [0, 0, 1, 1], [], []>} : vector<8x128xf32>, vector<128x384xf32>, vector<8x384xf32> -> vector<8x384xf32>
    %56 = vector.extract_strided_slice %54 {offsets = [0, 0], sizes = [8, 128], strides = [1, 1]} : vector<8x384xf32> to vector<8x128xf32>
    %57 = vector.extract_strided_slice %55 {offsets = [0, 0], sizes = [8, 128], strides = [1, 1]} : vector<8x384xf32> to vector<8x128xf32>
    %58 = arith.addf %56, %57 : vector<8x128xf32>
    %59 = arith.negf %58 : vector<8x128xf32>
    %60 = math.exp %59 : vector<8x128xf32>
    %cst_29 = arith.constant 1.000000e+00 : f32
    %61 = vector.broadcast %cst_29 : f32 to vector<8x128xf32>
    %62 = arith.addf %61, %60 : vector<8x128xf32>
    %63 = arith.divf %61, %62 : vector<8x128xf32>
    %64 = vector.extract_strided_slice %54 {offsets = [0, 128], sizes = [8, 128], strides = [1, 1]} : vector<8x384xf32> to vector<8x128xf32>
    %65 = vector.extract_strided_slice %55 {offsets = [0, 128], sizes = [8, 128], strides = [1, 1]} : vector<8x384xf32> to vector<8x128xf32>
    %66 = arith.addf %64, %65 : vector<8x128xf32>
    %67 = arith.negf %66 : vector<8x128xf32>
    %68 = math.exp %67 : vector<8x128xf32>
    %cst_30 = arith.constant 1.000000e+00 : f32
    %69 = vector.broadcast %cst_30 : f32 to vector<8x128xf32>
    %70 = arith.addf %69, %68 : vector<8x128xf32>
    %71 = arith.divf %69, %70 : vector<8x128xf32>
    %72 = vector.extract_strided_slice %54 {offsets = [0, 256], sizes = [8, 128], strides = [1, 1]} : vector<8x384xf32> to vector<8x128xf32>
    %73 = vector.extract_strided_slice %55 {offsets = [0, 256], sizes = [8, 128], strides = [1, 1]} : vector<8x384xf32> to vector<8x128xf32>
    %74 = vector.broadcast %13 : vector<1x128xf32> to vector<8x128xf32>
    %75 = arith.addf %73, %74 : vector<8x128xf32>
    %76 = arith.mulf %63, %75 : vector<8x128xf32>
    %77 = arith.addf %72, %76 : vector<8x128xf32>
    %78 = math.tanh %77 : vector<8x128xf32>
    %79 = arith.mulf %71, %47 : vector<8x128xf32>
    %cst_31 = arith.constant 1.000000e+00 : f32
    %80 = vector.broadcast %cst_31 : f32 to vector<8x128xf32>
    %81 = arith.subf %80, %71 : vector<8x128xf32>
    %82 = arith.mulf %81, %78 : vector<8x128xf32>
    %83 = arith.addf %79, %82 : vector<8x128xf32>
    %84 = arith.index_cast %c1_i32 : i32 to index
    %c0_32 = arith.constant 0 : index
    %c0_33 = arith.constant 0 : index
    %85 = vector.load %arg16[%84, %c0_32, %c0_33] : memref<8x8x128xf32, #tpu.memory_space<vmem>>, vector<1x8x128xf32>
    %86 = vector.shape_cast %85 : vector<1x8x128xf32> to vector<8x128xf32>
    %87 = vector.shape_cast %83 : vector<8x128xf32> to vector<1x8x128xf32>
    tpu.vector_store %arg16[%84, %c0_32, %c0_33], %87 {strides = array<i32>} : memref<8x8x128xf32, #tpu.memory_space<vmem>>, vector<1x8x128xf32>,
    %c2_i32 = arith.constant 2 : i32
    %88 = arith.index_cast %c2_i32 : i32 to index
    %c0_34 = arith.constant 0 : index
    %c0_35 = arith.constant 0 : index
    %89 = vector.load %arg15[%88, %c0_34, %c0_35] : memref<8x8x384xf32, #tpu.memory_space<vmem>>, vector<1x8x384xf32>
    %90 = vector.shape_cast %89 : vector<1x8x384xf32> to vector<8x384xf32>
    %cst_36 = arith.constant dense<0.000000e+00> : vector<8x384xf32>
    %91 = tpu.matmul %83, %12, %cst_36 {dimension_numbers = #tpu.dot_dimension_numbers<[1], [0], [0], [1], [0, 0, 1, 1], [], []>} : vector<8x128xf32>, vector<128x384xf32>, vector<8x384xf32> -> vector<8x384xf32>
    %92 = vector.extract_strided_slice %90 {offsets = [0, 0], sizes = [8, 128], strides = [1, 1]} : vector<8x384xf32> to vector<8x128xf32>
    %93 = vector.extract_strided_slice %91 {offsets = [0, 0], sizes = [8, 128], strides = [1, 1]} : vector<8x384xf32> to vector<8x128xf32>
    %94 = arith.addf %92, %93 : vector<8x128xf32>
    %95 = arith.negf %94 : vector<8x128xf32>
    %96 = math.exp %95 : vector<8x128xf32>
    %cst_37 = arith.constant 1.000000e+00 : f32
    %97 = vector.broadcast %cst_37 : f32 to vector<8x128xf32>
    %98 = arith.addf %97, %96 : vector<8x128xf32>
    %99 = arith.divf %97, %98 : vector<8x128xf32>
    %100 = vector.extract_strided_slice %90 {offsets = [0, 128], sizes = [8, 128], strides = [1, 1]} : vector<8x384xf32> to vector<8x128xf32>
    %101 = vector.extract_strided_slice %91 {offsets = [0, 128], sizes = [8, 128], strides = [1, 1]} : vector<8x384xf32> to vector<8x128xf32>
    %102 = arith.addf %100, %101 : vector<8x128xf32>
    %103 = arith.negf %102 : vector<8x128xf32>
    %104 = math.exp %103 : vector<8x128xf32>
    %cst_38 = arith.constant 1.000000e+00 : f32
    %105 = vector.broadcast %cst_38 : f32 to vector<8x128xf32>
    %106 = arith.addf %105, %104 : vector<8x128xf32>
    %107 = arith.divf %105, %106 : vector<8x128xf32>
    %108 = vector.extract_strided_slice %90 {offsets = [0, 256], sizes = [8, 128], strides = [1, 1]} : vector<8x384xf32> to vector<8x128xf32>
    %109 = vector.extract_strided_slice %91 {offsets = [0, 256], sizes = [8, 128], strides = [1, 1]} : vector<8x384xf32> to vector<8x128xf32>
    %110 = vector.broadcast %13 : vector<1x128xf32> to vector<8x128xf32>
    %111 = arith.addf %109, %110 : vector<8x128xf32>
    %112 = arith.mulf %99, %111 : vector<8x128xf32>
    %113 = arith.addf %108, %112 : vector<8x128xf32>
    %114 = math.tanh %113 : vector<8x128xf32>
    %115 = arith.mulf %107, %83 : vector<8x128xf32>
    %cst_39 = arith.constant 1.000000e+00 : f32
    %116 = vector.broadcast %cst_39 : f32 to vector<8x128xf32>
    %117 = arith.subf %116, %107 : vector<8x128xf32>
    %118 = arith.mulf %117, %114 : vector<8x128xf32>
    %119 = arith.addf %115, %118 : vector<8x128xf32>
    %120 = arith.index_cast %c2_i32 : i32 to index
    %c0_40 = arith.constant 0 : index
    %c0_41 = arith.constant 0 : index
    %121 = vector.load %arg16[%120, %c0_40, %c0_41] : memref<8x8x128xf32, #tpu.memory_space<vmem>>, vector<1x8x128xf32>
    %122 = vector.shape_cast %121 : vector<1x8x128xf32> to vector<8x128xf32>
    %123 = vector.shape_cast %119 : vector<8x128xf32> to vector<1x8x128xf32>
    tpu.vector_store %arg16[%120, %c0_40, %c0_41], %123 {strides = array<i32>} : memref<8x8x128xf32, #tpu.memory_space<vmem>>, vector<1x8x128xf32>,
    %c3_i32 = arith.constant 3 : i32
    %124 = arith.index_cast %c3_i32 : i32 to index
    %c0_42 = arith.constant 0 : index
    %c0_43 = arith.constant 0 : index
    %125 = vector.load %arg15[%124, %c0_42, %c0_43] : memref<8x8x384xf32, #tpu.memory_space<vmem>>, vector<1x8x384xf32>
    %126 = vector.shape_cast %125 : vector<1x8x384xf32> to vector<8x384xf32>
    %cst_44 = arith.constant dense<0.000000e+00> : vector<8x384xf32>
    %127 = tpu.matmul %119, %12, %cst_44 {dimension_numbers = #tpu.dot_dimension_numbers<[1], [0], [0], [1], [0, 0, 1, 1], [], []>} : vector<8x128xf32>, vector<128x384xf32>, vector<8x384xf32> -> vector<8x384xf32>
    %128 = vector.extract_strided_slice %126 {offsets = [0, 0], sizes = [8, 128], strides = [1, 1]} : vector<8x384xf32> to vector<8x128xf32>
    %129 = vector.extract_strided_slice %127 {offsets = [0, 0], sizes = [8, 128], strides = [1, 1]} : vector<8x384xf32> to vector<8x128xf32>
    %130 = arith.addf %128, %129 : vector<8x128xf32>
    %131 = arith.negf %130 : vector<8x128xf32>
    %132 = math.exp %131 : vector<8x128xf32>
    %cst_45 = arith.constant 1.000000e+00 : f32
    %133 = vector.broadcast %cst_45 : f32 to vector<8x128xf32>
    %134 = arith.addf %133, %132 : vector<8x128xf32>
    %135 = arith.divf %133, %134 : vector<8x128xf32>
    %136 = vector.extract_strided_slice %126 {offsets = [0, 128], sizes = [8, 128], strides = [1, 1]} : vector<8x384xf32> to vector<8x128xf32>
    %137 = vector.extract_strided_slice %127 {offsets = [0, 128], sizes = [8, 128], strides = [1, 1]} : vector<8x384xf32> to vector<8x128xf32>
    %138 = arith.addf %136, %137 : vector<8x128xf32>
    %139 = arith.negf %138 : vector<8x128xf32>
    %140 = math.exp %139 : vector<8x128xf32>
    %cst_46 = arith.constant 1.000000e+00 : f32
    %141 = vector.broadcast %cst_46 : f32 to vector<8x128xf32>
    %142 = arith.addf %141, %140 : vector<8x128xf32>
    %143 = arith.divf %141, %142 : vector<8x128xf32>
    %144 = vector.extract_strided_slice %126 {offsets = [0, 256], sizes = [8, 128], strides = [1, 1]} : vector<8x384xf32> to vector<8x128xf32>
    %145 = vector.extract_strided_slice %127 {offsets = [0, 256], sizes = [8, 128], strides = [1, 1]} : vector<8x384xf32> to vector<8x128xf32>
    %146 = vector.broadcast %13 : vector<1x128xf32> to vector<8x128xf32>
    %147 = arith.addf %145, %146 : vector<8x128xf32>
    %148 = arith.mulf %135, %147 : vector<8x128xf32>
    %149 = arith.addf %144, %148 : vector<8x128xf32>
    %150 = math.tanh %149 : vector<8x128xf32>
    %151 = arith.mulf %143, %119 : vector<8x128xf32>
    %cst_47 = arith.constant 1.000000e+00 : f32
    %152 = vector.broadcast %cst_47 : f32 to vector<8x128xf32>
    %153 = arith.subf %152, %143 : vector<8x128xf32>
    %154 = arith.mulf %153, %150 : vector<8x128xf32>
    %155 = arith.addf %151, %154 : vector<8x128xf32>
    %156 = arith.index_cast %c3_i32 : i32 to index
    %c0_48 = arith.constant 0 : index
    %c0_49 = arith.constant 0 : index
    %157 = vector.load %arg16[%156, %c0_48, %c0_49] : memref<8x8x128xf32, #tpu.memory_space<vmem>>, vector<1x8x128xf32>
    %158 = vector.shape_cast %157 : vector<1x8x128xf32> to vector<8x128xf32>
    %159 = vector.shape_cast %155 : vector<8x128xf32> to vector<1x8x128xf32>
    tpu.vector_store %arg16[%156, %c0_48, %c0_49], %159 {strides = array<i32>} : memref<8x8x128xf32, #tpu.memory_space<vmem>>, vector<1x8x128xf32>,
    %c4_i32 = arith.constant 4 : i32
    %160 = arith.index_cast %c4_i32 : i32 to index
    %c0_50 = arith.constant 0 : index
    %c0_51 = arith.constant 0 : index
    %161 = vector.load %arg15[%160, %c0_50, %c0_51] : memref<8x8x384xf32, #tpu.memory_space<vmem>>, vector<1x8x384xf32>
    %162 = vector.shape_cast %161 : vector<1x8x384xf32> to vector<8x384xf32>
    %cst_52 = arith.constant dense<0.000000e+00> : vector<8x384xf32>
    %163 = tpu.matmul %155, %12, %cst_52 {dimension_numbers = #tpu.dot_dimension_numbers<[1], [0], [0], [1], [0, 0, 1, 1], [], []>} : vector<8x128xf32>, vector<128x384xf32>, vector<8x384xf32> -> vector<8x384xf32>
    %164 = vector.extract_strided_slice %162 {offsets = [0, 0], sizes = [8, 128], strides = [1, 1]} : vector<8x384xf32> to vector<8x128xf32>
    %165 = vector.extract_strided_slice %163 {offsets = [0, 0], sizes = [8, 128], strides = [1, 1]} : vector<8x384xf32> to vector<8x128xf32>
    %166 = arith.addf %164, %165 : vector<8x128xf32>
    %167 = arith.negf %166 : vector<8x128xf32>
    %168 = math.exp %167 : vector<8x128xf32>
    %cst_53 = arith.constant 1.000000e+00 : f32
    %169 = vector.broadcast %cst_53 : f32 to vector<8x128xf32>
    %170 = arith.addf %169, %168 : vector<8x128xf32>
    %171 = arith.divf %169, %170 : vector<8x128xf32>
    %172 = vector.extract_strided_slice %162 {offsets = [0, 128], sizes = [8, 128], strides = [1, 1]} : vector<8x384xf32> to vector<8x128xf32>
    %173 = vector.extract_strided_slice %163 {offsets = [0, 128], sizes = [8, 128], strides = [1, 1]} : vector<8x384xf32> to vector<8x128xf32>
    %174 = arith.addf %172, %173 : vector<8x128xf32>
    %175 = arith.negf %174 : vector<8x128xf32>
    %176 = math.exp %175 : vector<8x128xf32>
    %cst_54 = arith.constant 1.000000e+00 : f32
    %177 = vector.broadcast %cst_54 : f32 to vector<8x128xf32>
    %178 = arith.addf %177, %176 : vector<8x128xf32>
    %179 = arith.divf %177, %178 : vector<8x128xf32>
    %180 = vector.extract_strided_slice %162 {offsets = [0, 256], sizes = [8, 128], strides = [1, 1]} : vector<8x384xf32> to vector<8x128xf32>
    %181 = vector.extract_strided_slice %163 {offsets = [0, 256], sizes = [8, 128], strides = [1, 1]} : vector<8x384xf32> to vector<8x128xf32>
    %182 = vector.broadcast %13 : vector<1x128xf32> to vector<8x128xf32>
    %183 = arith.addf %181, %182 : vector<8x128xf32>
    %184 = arith.mulf %171, %183 : vector<8x128xf32>
    %185 = arith.addf %180, %184 : vector<8x128xf32>
    %186 = math.tanh %185 : vector<8x128xf32>
    %187 = arith.mulf %179, %155 : vector<8x128xf32>
    %cst_55 = arith.constant 1.000000e+00 : f32
    %188 = vector.broadcast %cst_55 : f32 to vector<8x128xf32>
    %189 = arith.subf %188, %179 : vector<8x128xf32>
    %190 = arith.mulf %189, %186 : vector<8x128xf32>
    %191 = arith.addf %187, %190 : vector<8x128xf32>
    %192 = arith.index_cast %c4_i32 : i32 to index
    %c0_56 = arith.constant 0 : index
    %c0_57 = arith.constant 0 : index
    %193 = vector.load %arg16[%192, %c0_56, %c0_57] : memref<8x8x128xf32, #tpu.memory_space<vmem>>, vector<1x8x128xf32>
    %194 = vector.shape_cast %193 : vector<1x8x128xf32> to vector<8x128xf32>
    %195 = vector.shape_cast %191 : vector<8x128xf32> to vector<1x8x128xf32>
    tpu.vector_store %arg16[%192, %c0_56, %c0_57], %195 {strides = array<i32>} : memref<8x8x128xf32, #tpu.memory_space<vmem>>, vector<1x8x128xf32>,
    %c5_i32 = arith.constant 5 : i32
    %196 = arith.index_cast %c5_i32 : i32 to index
    %c0_58 = arith.constant 0 : index
    %c0_59 = arith.constant 0 : index
    %197 = vector.load %arg15[%196, %c0_58, %c0_59] : memref<8x8x384xf32, #tpu.memory_space<vmem>>, vector<1x8x384xf32>
    %198 = vector.shape_cast %197 : vector<1x8x384xf32> to vector<8x384xf32>
    %cst_60 = arith.constant dense<0.000000e+00> : vector<8x384xf32>
    %199 = tpu.matmul %191, %12, %cst_60 {dimension_numbers = #tpu.dot_dimension_numbers<[1], [0], [0], [1], [0, 0, 1, 1], [], []>} : vector<8x128xf32>, vector<128x384xf32>, vector<8x384xf32> -> vector<8x384xf32>
    %200 = vector.extract_strided_slice %198 {offsets = [0, 0], sizes = [8, 128], strides = [1, 1]} : vector<8x384xf32> to vector<8x128xf32>
    %201 = vector.extract_strided_slice %199 {offsets = [0, 0], sizes = [8, 128], strides = [1, 1]} : vector<8x384xf32> to vector<8x128xf32>
    %202 = arith.addf %200, %201 : vector<8x128xf32>
    %203 = arith.negf %202 : vector<8x128xf32>
    %204 = math.exp %203 : vector<8x128xf32>
    %cst_61 = arith.constant 1.000000e+00 : f32
    %205 = vector.broadcast %cst_61 : f32 to vector<8x128xf32>
    %206 = arith.addf %205, %204 : vector<8x128xf32>
    %207 = arith.divf %205, %206 : vector<8x128xf32>
    %208 = vector.extract_strided_slice %198 {offsets = [0, 128], sizes = [8, 128], strides = [1, 1]} : vector<8x384xf32> to vector<8x128xf32>
    %209 = vector.extract_strided_slice %199 {offsets = [0, 128], sizes = [8, 128], strides = [1, 1]} : vector<8x384xf32> to vector<8x128xf32>
    %210 = arith.addf %208, %209 : vector<8x128xf32>
    %211 = arith.negf %210 : vector<8x128xf32>
    %212 = math.exp %211 : vector<8x128xf32>
    %cst_62 = arith.constant 1.000000e+00 : f32
    %213 = vector.broadcast %cst_62 : f32 to vector<8x128xf32>
    %214 = arith.addf %213, %212 : vector<8x128xf32>
    %215 = arith.divf %213, %214 : vector<8x128xf32>
    %216 = vector.extract_strided_slice %198 {offsets = [0, 256], sizes = [8, 128], strides = [1, 1]} : vector<8x384xf32> to vector<8x128xf32>
    %217 = vector.extract_strided_slice %199 {offsets = [0, 256], sizes = [8, 128], strides = [1, 1]} : vector<8x384xf32> to vector<8x128xf32>
    %218 = vector.broadcast %13 : vector<1x128xf32> to vector<8x128xf32>
    %219 = arith.addf %217, %218 : vector<8x128xf32>
    %220 = arith.mulf %207, %219 : vector<8x128xf32>
    %221 = arith.addf %216, %220 : vector<8x128xf32>
    %222 = math.tanh %221 : vector<8x128xf32>
    %223 = arith.mulf %215, %191 : vector<8x128xf32>
    %cst_63 = arith.constant 1.000000e+00 : f32
    %224 = vector.broadcast %cst_63 : f32 to vector<8x128xf32>
    %225 = arith.subf %224, %215 : vector<8x128xf32>
    %226 = arith.mulf %225, %222 : vector<8x128xf32>
    %227 = arith.addf %223, %226 : vector<8x128xf32>
    %228 = arith.index_cast %c5_i32 : i32 to index
    %c0_64 = arith.constant 0 : index
    %c0_65 = arith.constant 0 : index
    %229 = vector.load %arg16[%228, %c0_64, %c0_65] : memref<8x8x128xf32, #tpu.memory_space<vmem>>, vector<1x8x128xf32>
    %230 = vector.shape_cast %229 : vector<1x8x128xf32> to vector<8x128xf32>
    %231 = vector.shape_cast %227 : vector<8x128xf32> to vector<1x8x128xf32>
    tpu.vector_store %arg16[%228, %c0_64, %c0_65], %231 {strides = array<i32>} : memref<8x8x128xf32, #tpu.memory_space<vmem>>, vector<1x8x128xf32>,
    %c6_i32 = arith.constant 6 : i32
    %232 = arith.index_cast %c6_i32 : i32 to index
    %c0_66 = arith.constant 0 : index
    %c0_67 = arith.constant 0 : index
    %233 = vector.load %arg15[%232, %c0_66, %c0_67] : memref<8x8x384xf32, #tpu.memory_space<vmem>>, vector<1x8x384xf32>
    %234 = vector.shape_cast %233 : vector<1x8x384xf32> to vector<8x384xf32>
    %cst_68 = arith.constant dense<0.000000e+00> : vector<8x384xf32>
    %235 = tpu.matmul %227, %12, %cst_68 {dimension_numbers = #tpu.dot_dimension_numbers<[1], [0], [0], [1], [0, 0, 1, 1], [], []>} : vector<8x128xf32>, vector<128x384xf32>, vector<8x384xf32> -> vector<8x384xf32>
    %236 = vector.extract_strided_slice %234 {offsets = [0, 0], sizes = [8, 128], strides = [1, 1]} : vector<8x384xf32> to vector<8x128xf32>
    %237 = vector.extract_strided_slice %235 {offsets = [0, 0], sizes = [8, 128], strides = [1, 1]} : vector<8x384xf32> to vector<8x128xf32>
    %238 = arith.addf %236, %237 : vector<8x128xf32>
    %239 = arith.negf %238 : vector<8x128xf32>
    %240 = math.exp %239 : vector<8x128xf32>
    %cst_69 = arith.constant 1.000000e+00 : f32
    %241 = vector.broadcast %cst_69 : f32 to vector<8x128xf32>
    %242 = arith.addf %241, %240 : vector<8x128xf32>
    %243 = arith.divf %241, %242 : vector<8x128xf32>
    %244 = vector.extract_strided_slice %234 {offsets = [0, 128], sizes = [8, 128], strides = [1, 1]} : vector<8x384xf32> to vector<8x128xf32>
    %245 = vector.extract_strided_slice %235 {offsets = [0, 128], sizes = [8, 128], strides = [1, 1]} : vector<8x384xf32> to vector<8x128xf32>
    %246 = arith.addf %244, %245 : vector<8x128xf32>
    %247 = arith.negf %246 : vector<8x128xf32>
    %248 = math.exp %247 : vector<8x128xf32>
    %cst_70 = arith.constant 1.000000e+00 : f32
    %249 = vector.broadcast %cst_70 : f32 to vector<8x128xf32>
    %250 = arith.addf %249, %248 : vector<8x128xf32>
    %251 = arith.divf %249, %250 : vector<8x128xf32>
    %252 = vector.extract_strided_slice %234 {offsets = [0, 256], sizes = [8, 128], strides = [1, 1]} : vector<8x384xf32> to vector<8x128xf32>
    %253 = vector.extract_strided_slice %235 {offsets = [0, 256], sizes = [8, 128], strides = [1, 1]} : vector<8x384xf32> to vector<8x128xf32>
    %254 = vector.broadcast %13 : vector<1x128xf32> to vector<8x128xf32>
    %255 = arith.addf %253, %254 : vector<8x128xf32>
    %256 = arith.mulf %243, %255 : vector<8x128xf32>
    %257 = arith.addf %252, %256 : vector<8x128xf32>
    %258 = math.tanh %257 : vector<8x128xf32>
    %259 = arith.mulf %251, %227 : vector<8x128xf32>
    %cst_71 = arith.constant 1.000000e+00 : f32
    %260 = vector.broadcast %cst_71 : f32 to vector<8x128xf32>
    %261 = arith.subf %260, %251 : vector<8x128xf32>
    %262 = arith.mulf %261, %258 : vector<8x128xf32>
    %263 = arith.addf %259, %262 : vector<8x128xf32>
    %264 = arith.index_cast %c6_i32 : i32 to index
    %c0_72 = arith.constant 0 : index
    %c0_73 = arith.constant 0 : index
    %265 = vector.load %arg16[%264, %c0_72, %c0_73] : memref<8x8x128xf32, #tpu.memory_space<vmem>>, vector<1x8x128xf32>
    %266 = vector.shape_cast %265 : vector<1x8x128xf32> to vector<8x128xf32>
    %267 = vector.shape_cast %263 : vector<8x128xf32> to vector<1x8x128xf32>
    tpu.vector_store %arg16[%264, %c0_72, %c0_73], %267 {strides = array<i32>} : memref<8x8x128xf32, #tpu.memory_space<vmem>>, vector<1x8x128xf32>,
    %c7_i32 = arith.constant 7 : i32
    %268 = arith.index_cast %c7_i32 : i32 to index
    %c0_74 = arith.constant 0 : index
    %c0_75 = arith.constant 0 : index
    %269 = vector.load %arg15[%268, %c0_74, %c0_75] : memref<8x8x384xf32, #tpu.memory_space<vmem>>, vector<1x8x384xf32>
    %270 = vector.shape_cast %269 : vector<1x8x384xf32> to vector<8x384xf32>
    %cst_76 = arith.constant dense<0.000000e+00> : vector<8x384xf32>
    %271 = tpu.matmul %263, %12, %cst_76 {dimension_numbers = #tpu.dot_dimension_numbers<[1], [0], [0], [1], [0, 0, 1, 1], [], []>} : vector<8x128xf32>, vector<128x384xf32>, vector<8x384xf32> -> vector<8x384xf32>
    %272 = vector.extract_strided_slice %270 {offsets = [0, 0], sizes = [8, 128], strides = [1, 1]} : vector<8x384xf32> to vector<8x128xf32>
    %273 = vector.extract_strided_slice %271 {offsets = [0, 0], sizes = [8, 128], strides = [1, 1]} : vector<8x384xf32> to vector<8x128xf32>
    %274 = arith.addf %272, %273 : vector<8x128xf32>
    %275 = arith.negf %274 : vector<8x128xf32>
    %276 = math.exp %275 : vector<8x128xf32>
    %cst_77 = arith.constant 1.000000e+00 : f32
    %277 = vector.broadcast %cst_77 : f32 to vector<8x128xf32>
    %278 = arith.addf %277, %276 : vector<8x128xf32>
    %279 = arith.divf %277, %278 : vector<8x128xf32>
    %280 = vector.extract_strided_slice %270 {offsets = [0, 128], sizes = [8, 128], strides = [1, 1]} : vector<8x384xf32> to vector<8x128xf32>
    %281 = vector.extract_strided_slice %271 {offsets = [0, 128], sizes = [8, 128], strides = [1, 1]} : vector<8x384xf32> to vector<8x128xf32>
    %282 = arith.addf %280, %281 : vector<8x128xf32>
    %283 = arith.negf %282 : vector<8x128xf32>
    %284 = math.exp %283 : vector<8x128xf32>
    %cst_78 = arith.constant 1.000000e+00 : f32
    %285 = vector.broadcast %cst_78 : f32 to vector<8x128xf32>
    %286 = arith.addf %285, %284 : vector<8x128xf32>
    %287 = arith.divf %285, %286 : vector<8x128xf32>
    %288 = vector.extract_strided_slice %270 {offsets = [0, 256], sizes = [8, 128], strides = [1, 1]} : vector<8x384xf32> to vector<8x128xf32>
    %289 = vector.extract_strided_slice %271 {offsets = [0, 256], sizes = [8, 128], strides = [1, 1]} : vector<8x384xf32> to vector<8x128xf32>
    %290 = vector.broadcast %13 : vector<1x128xf32> to vector<8x128xf32>
    %291 = arith.addf %289, %290 : vector<8x128xf32>
    %292 = arith.mulf %279, %291 : vector<8x128xf32>
    %293 = arith.addf %288, %292 : vector<8x128xf32>
    %294 = math.tanh %293 : vector<8x128xf32>
    %295 = arith.mulf %287, %263 : vector<8x128xf32>
    %cst_79 = arith.constant 1.000000e+00 : f32
    %296 = vector.broadcast %cst_79 : f32 to vector<8x128xf32>
    %297 = arith.subf %296, %287 : vector<8x128xf32>
    %298 = arith.mulf %297, %294 : vector<8x128xf32>
    %299 = arith.addf %295, %298 : vector<8x128xf32>
    %300 = arith.index_cast %c7_i32 : i32 to index
    %c0_80 = arith.constant 0 : index
    %c0_81 = arith.constant 0 : index
    %301 = vector.load %arg16[%300, %c0_80, %c0_81] : memref<8x8x128xf32, #tpu.memory_space<vmem>>, vector<1x8x128xf32>
    %302 = vector.shape_cast %301 : vector<1x8x128xf32> to vector<8x128xf32>
    %303 = vector.shape_cast %299 : vector<8x128xf32> to vector<1x8x128xf32>
    tpu.vector_store %arg16[%300, %c0_80, %c0_81], %303 {strides = array<i32>} : memref<8x8x128xf32, #tpu.memory_space<vmem>>, vector<1x8x128xf32>,
    %c8_i32 = arith.constant 8 : i32
    %c0_82 = arith.constant 0 : index
    %c0_83 = arith.constant 0 : index
    %c0_84 = arith.constant 0 : index
    %304 = vector.load %arg14[%c0_82, %c0_83, %c0_84] : memref<2x8x128xf32, #tpu.memory_space<vmem>>, vector<1x8x128xf32>
    %305 = vector.shape_cast %304 : vector<1x8x128xf32> to vector<8x128xf32>
    %306 = vector.shape_cast %299 : vector<8x128xf32> to vector<1x8x128xf32>
    tpu.vector_store %arg14[%c0_82, %c0_83, %c0_84], %306 {strides = array<i32>} : memref<2x8x128xf32, #tpu.memory_space<vmem>>, vector<1x8x128xf32>,
    %c0_85 = arith.constant 0 : index
    %c0_86 = arith.constant 0 : index
    %c0_87 = arith.constant 0 : index
    %307 = vector.load %arg16[%c0_85, %c0_86, %c0_87] : memref<8x8x128xf32, #tpu.memory_space<vmem>>, vector<8x8x128xf32>
    %308 = vector.shape_cast %307 : vector<8x8x128xf32> to vector<64x128xf32>
    %c0_88 = arith.constant 0 : index
    %c0_89 = arith.constant 0 : index
    %309 = vector.load %arg7[%c0_88, %c0_89] : memref<128x384xf32, #tpu.memory_space<vmem>>, vector<128x384xf32>
    %cst_90 = arith.constant dense<0.000000e+00> : vector<64x384xf32>
    %310 = tpu.matmul %308, %309, %cst_90 {dimension_numbers = #tpu.dot_dimension_numbers<[1], [0], [0], [1], [0, 0, 1, 1], [], []>} : vector<64x128xf32>, vector<128x384xf32>, vector<64x384xf32> -> vector<64x384xf32>
    %c0_91 = arith.constant 0 : index
    %c0_92 = arith.constant 0 : index
    %311 = vector.load %arg8[%c0_91, %c0_92] : memref<1x384xf32, #tpu.memory_space<vmem>>, vector<1x384xf32>
    %312 = vector.broadcast %311 : vector<1x384xf32> to vector<64x384xf32>
    %313 = arith.addf %310, %312 : vector<64x384xf32>
    %314 = vector.shape_cast %313 : vector<64x384xf32> to vector<8x8x384xf32>
    %c0_93 = arith.constant 0 : index
    %c0_94 = arith.constant 0 : index
    %c0_95 = arith.constant 0 : index
    %315 = vector.load %arg15[%c0_93, %c0_94, %c0_95] : memref<8x8x384xf32, #tpu.memory_space<vmem>>, vector<8x8x384xf32>
    tpu.vector_store %arg15[%c0_93, %c0_94, %c0_95], %314 {strides = array<i32>} : memref<8x8x384xf32, #tpu.memory_space<vmem>>, vector<8x8x384xf32>,
    %c0_96 = arith.constant 0 : index
    %c0_97 = arith.constant 0 : index
    %316 = vector.load %arg9[%c0_96, %c0_97] : memref<128x384xf32, #tpu.memory_space<vmem>>, vector<128x384xf32>
    %c0_98 = arith.constant 0 : index
    %c0_99 = arith.constant 0 : index
    %317 = vector.load %arg10[%c0_98, %c0_99] : memref<1x128xf32, #tpu.memory_space<vmem>>, vector<1x128xf32>
    %c1 = arith.constant 1 : index
    %c0_100 = arith.constant 0 : index
    %c0_101 = arith.constant 0 : index
    %318 = vector.load %arg14[%c1, %c0_100, %c0_101] : memref<2x8x128xf32, #tpu.memory_space<vmem>>, vector<1x8x128xf32>
    %319 = vector.shape_cast %318 : vector<1x8x128xf32> to vector<8x128xf32>
    %c0_i32_102 = arith.constant 0 : i32
    %320 = arith.index_cast %c0_i32_102 : i32 to index
    %c0_103 = arith.constant 0 : index
    %c0_104 = arith.constant 0 : index
    %321 = vector.load %arg15[%320, %c0_103, %c0_104] : memref<8x8x384xf32, #tpu.memory_space<vmem>>, vector<1x8x384xf32>
    %322 = vector.shape_cast %321 : vector<1x8x384xf32> to vector<8x384xf32>
    %cst_105 = arith.constant dense<0.000000e+00> : vector<8x384xf32>
    %323 = tpu.matmul %319, %316, %cst_105 {dimension_numbers = #tpu.dot_dimension_numbers<[1], [0], [0], [1], [0, 0, 1, 1], [], []>} : vector<8x128xf32>, vector<128x384xf32>, vector<8x384xf32> -> vector<8x384xf32>
    %324 = vector.extract_strided_slice %322 {offsets = [0, 0], sizes = [8, 128], strides = [1, 1]} : vector<8x384xf32> to vector<8x128xf32>
    %325 = vector.extract_strided_slice %323 {offsets = [0, 0], sizes = [8, 128], strides = [1, 1]} : vector<8x384xf32> to vector<8x128xf32>
    %326 = arith.addf %324, %325 : vector<8x128xf32>
    %327 = arith.negf %326 : vector<8x128xf32>
    %328 = math.exp %327 : vector<8x128xf32>
    %cst_106 = arith.constant 1.000000e+00 : f32
    %329 = vector.broadcast %cst_106 : f32 to vector<8x128xf32>
    %330 = arith.addf %329, %328 : vector<8x128xf32>
    %331 = arith.divf %329, %330 : vector<8x128xf32>
    %332 = vector.extract_strided_slice %322 {offsets = [0, 128], sizes = [8, 128], strides = [1, 1]} : vector<8x384xf32> to vector<8x128xf32>
    %333 = vector.extract_strided_slice %323 {offsets = [0, 128], sizes = [8, 128], strides = [1, 1]} : vector<8x384xf32> to vector<8x128xf32>
    %334 = arith.addf %332, %333 : vector<8x128xf32>
    %335 = arith.negf %334 : vector<8x128xf32>
    %336 = math.exp %335 : vector<8x128xf32>
    %cst_107 = arith.constant 1.000000e+00 : f32
    %337 = vector.broadcast %cst_107 : f32 to vector<8x128xf32>
    %338 = arith.addf %337, %336 : vector<8x128xf32>
    %339 = arith.divf %337, %338 : vector<8x128xf32>
    %340 = vector.extract_strided_slice %322 {offsets = [0, 256], sizes = [8, 128], strides = [1, 1]} : vector<8x384xf32> to vector<8x128xf32>
    %341 = vector.extract_strided_slice %323 {offsets = [0, 256], sizes = [8, 128], strides = [1, 1]} : vector<8x384xf32> to vector<8x128xf32>
    %342 = vector.broadcast %317 : vector<1x128xf32> to vector<8x128xf32>
    %343 = arith.addf %341, %342 : vector<8x128xf32>
    %344 = arith.mulf %331, %343 : vector<8x128xf32>
    %345 = arith.addf %340, %344 : vector<8x128xf32>
    %346 = math.tanh %345 : vector<8x128xf32>
    %347 = arith.mulf %339, %319 : vector<8x128xf32>
    %cst_108 = arith.constant 1.000000e+00 : f32
    %348 = vector.broadcast %cst_108 : f32 to vector<8x128xf32>
    %349 = arith.subf %348, %339 : vector<8x128xf32>
    %350 = arith.mulf %349, %346 : vector<8x128xf32>
    %351 = arith.addf %347, %350 : vector<8x128xf32>
    %352 = arith.index_cast %c0_i32_102 : i32 to index
    %c0_109 = arith.constant 0 : index
    %c0_110 = arith.constant 0 : index
    %353 = vector.load %arg16[%352, %c0_109, %c0_110] : memref<8x8x128xf32, #tpu.memory_space<vmem>>, vector<1x8x128xf32>
    %354 = vector.shape_cast %353 : vector<1x8x128xf32> to vector<8x128xf32>
    %355 = vector.shape_cast %351 : vector<8x128xf32> to vector<1x8x128xf32>
    tpu.vector_store %arg16[%352, %c0_109, %c0_110], %355 {strides = array<i32>} : memref<8x8x128xf32, #tpu.memory_space<vmem>>, vector<1x8x128xf32>,
    %c1_i32_111 = arith.constant 1 : i32
    %356 = arith.index_cast %c1_i32_111 : i32 to index
    %c0_112 = arith.constant 0 : index
    %c0_113 = arith.constant 0 : index
    %357 = vector.load %arg15[%356, %c0_112, %c0_113] : memref<8x8x384xf32, #tpu.memory_space<vmem>>, vector<1x8x384xf32>
    %358 = vector.shape_cast %357 : vector<1x8x384xf32> to vector<8x384xf32>
    %cst_114 = arith.constant dense<0.000000e+00> : vector<8x384xf32>
    %359 = tpu.matmul %351, %316, %cst_114 {dimension_numbers = #tpu.dot_dimension_numbers<[1], [0], [0], [1], [0, 0, 1, 1], [], []>} : vector<8x128xf32>, vector<128x384xf32>, vector<8x384xf32> -> vector<8x384xf32>
    %360 = vector.extract_strided_slice %358 {offsets = [0, 0], sizes = [8, 128], strides = [1, 1]} : vector<8x384xf32> to vector<8x128xf32>
    %361 = vector.extract_strided_slice %359 {offsets = [0, 0], sizes = [8, 128], strides = [1, 1]} : vector<8x384xf32> to vector<8x128xf32>
    %362 = arith.addf %360, %361 : vector<8x128xf32>
    %363 = arith.negf %362 : vector<8x128xf32>
    %364 = math.exp %363 : vector<8x128xf32>
    %cst_115 = arith.constant 1.000000e+00 : f32
    %365 = vector.broadcast %cst_115 : f32 to vector<8x128xf32>
    %366 = arith.addf %365, %364 : vector<8x128xf32>
    %367 = arith.divf %365, %366 : vector<8x128xf32>
    %368 = vector.extract_strided_slice %358 {offsets = [0, 128], sizes = [8, 128], strides = [1, 1]} : vector<8x384xf32> to vector<8x128xf32>
    %369 = vector.extract_strided_slice %359 {offsets = [0, 128], sizes = [8, 128], strides = [1, 1]} : vector<8x384xf32> to vector<8x128xf32>
    %370 = arith.addf %368, %369 : vector<8x128xf32>
    %371 = arith.negf %370 : vector<8x128xf32>
    %372 = math.exp %371 : vector<8x128xf32>
    %cst_116 = arith.constant 1.000000e+00 : f32
    %373 = vector.broadcast %cst_116 : f32 to vector<8x128xf32>
    %374 = arith.addf %373, %372 : vector<8x128xf32>
    %375 = arith.divf %373, %374 : vector<8x128xf32>
    %376 = vector.extract_strided_slice %358 {offsets = [0, 256], sizes = [8, 128], strides = [1, 1]} : vector<8x384xf32> to vector<8x128xf32>
    %377 = vector.extract_strided_slice %359 {offsets = [0, 256], sizes = [8, 128], strides = [1, 1]} : vector<8x384xf32> to vector<8x128xf32>
    %378 = vector.broadcast %317 : vector<1x128xf32> to vector<8x128xf32>
    %379 = arith.addf %377, %378 : vector<8x128xf32>
    %380 = arith.mulf %367, %379 : vector<8x128xf32>
    %381 = arith.addf %376, %380 : vector<8x128xf32>
    %382 = math.tanh %381 : vector<8x128xf32>
    %383 = arith.mulf %375, %351 : vector<8x128xf32>
    %cst_117 = arith.constant 1.000000e+00 : f32
    %384 = vector.broadcast %cst_117 : f32 to vector<8x128xf32>
    %385 = arith.subf %384, %375 : vector<8x128xf32>
    %386 = arith.mulf %385, %382 : vector<8x128xf32>
    %387 = arith.addf %383, %386 : vector<8x128xf32>
    %388 = arith.index_cast %c1_i32_111 : i32 to index
    %c0_118 = arith.constant 0 : index
    %c0_119 = arith.constant 0 : index
    %389 = vector.load %arg16[%388, %c0_118, %c0_119] : memref<8x8x128xf32, #tpu.memory_space<vmem>>, vector<1x8x128xf32>
    %390 = vector.shape_cast %389 : vector<1x8x128xf32> to vector<8x128xf32>
    %391 = vector.shape_cast %387 : vector<8x128xf32> to vector<1x8x128xf32>
    tpu.vector_store %arg16[%388, %c0_118, %c0_119], %391 {strides = array<i32>} : memref<8x8x128xf32, #tpu.memory_space<vmem>>, vector<1x8x128xf32>,
    %c2_i32_120 = arith.constant 2 : i32
    %392 = arith.index_cast %c2_i32_120 : i32 to index
    %c0_121 = arith.constant 0 : index
    %c0_122 = arith.constant 0 : index
    %393 = vector.load %arg15[%392, %c0_121, %c0_122] : memref<8x8x384xf32, #tpu.memory_space<vmem>>, vector<1x8x384xf32>
    %394 = vector.shape_cast %393 : vector<1x8x384xf32> to vector<8x384xf32>
    %cst_123 = arith.constant dense<0.000000e+00> : vector<8x384xf32>
    %395 = tpu.matmul %387, %316, %cst_123 {dimension_numbers = #tpu.dot_dimension_numbers<[1], [0], [0], [1], [0, 0, 1, 1], [], []>} : vector<8x128xf32>, vector<128x384xf32>, vector<8x384xf32> -> vector<8x384xf32>
    %396 = vector.extract_strided_slice %394 {offsets = [0, 0], sizes = [8, 128], strides = [1, 1]} : vector<8x384xf32> to vector<8x128xf32>
    %397 = vector.extract_strided_slice %395 {offsets = [0, 0], sizes = [8, 128], strides = [1, 1]} : vector<8x384xf32> to vector<8x128xf32>
    %398 = arith.addf %396, %397 : vector<8x128xf32>
    %399 = arith.negf %398 : vector<8x128xf32>
    %400 = math.exp %399 : vector<8x128xf32>
    %cst_124 = arith.constant 1.000000e+00 : f32
    %401 = vector.broadcast %cst_124 : f32 to vector<8x128xf32>
    %402 = arith.addf %401, %400 : vector<8x128xf32>
    %403 = arith.divf %401, %402 : vector<8x128xf32>
    %404 = vector.extract_strided_slice %394 {offsets = [0, 128], sizes = [8, 128], strides = [1, 1]} : vector<8x384xf32> to vector<8x128xf32>
    %405 = vector.extract_strided_slice %395 {offsets = [0, 128], sizes = [8, 128], strides = [1, 1]} : vector<8x384xf32> to vector<8x128xf32>
    %406 = arith.addf %404, %405 : vector<8x128xf32>
    %407 = arith.negf %406 : vector<8x128xf32>
    %408 = math.exp %407 : vector<8x128xf32>
    %cst_125 = arith.constant 1.000000e+00 : f32
    %409 = vector.broadcast %cst_125 : f32 to vector<8x128xf32>
    %410 = arith.addf %409, %408 : vector<8x128xf32>
    %411 = arith.divf %409, %410 : vector<8x128xf32>
    %412 = vector.extract_strided_slice %394 {offsets = [0, 256], sizes = [8, 128], strides = [1, 1]} : vector<8x384xf32> to vector<8x128xf32>
    %413 = vector.extract_strided_slice %395 {offsets = [0, 256], sizes = [8, 128], strides = [1, 1]} : vector<8x384xf32> to vector<8x128xf32>
    %414 = vector.broadcast %317 : vector<1x128xf32> to vector<8x128xf32>
    %415 = arith.addf %413, %414 : vector<8x128xf32>
    %416 = arith.mulf %403, %415 : vector<8x128xf32>
    %417 = arith.addf %412, %416 : vector<8x128xf32>
    %418 = math.tanh %417 : vector<8x128xf32>
    %419 = arith.mulf %411, %387 : vector<8x128xf32>
    %cst_126 = arith.constant 1.000000e+00 : f32
    %420 = vector.broadcast %cst_126 : f32 to vector<8x128xf32>
    %421 = arith.subf %420, %411 : vector<8x128xf32>
    %422 = arith.mulf %421, %418 : vector<8x128xf32>
    %423 = arith.addf %419, %422 : vector<8x128xf32>
    %424 = arith.index_cast %c2_i32_120 : i32 to index
    %c0_127 = arith.constant 0 : index
    %c0_128 = arith.constant 0 : index
    %425 = vector.load %arg16[%424, %c0_127, %c0_128] : memref<8x8x128xf32, #tpu.memory_space<vmem>>, vector<1x8x128xf32>
    %426 = vector.shape_cast %425 : vector<1x8x128xf32> to vector<8x128xf32>
    %427 = vector.shape_cast %423 : vector<8x128xf32> to vector<1x8x128xf32>
    tpu.vector_store %arg16[%424, %c0_127, %c0_128], %427 {strides = array<i32>} : memref<8x8x128xf32, #tpu.memory_space<vmem>>, vector<1x8x128xf32>,
    %c3_i32_129 = arith.constant 3 : i32
    %428 = arith.index_cast %c3_i32_129 : i32 to index
    %c0_130 = arith.constant 0 : index
    %c0_131 = arith.constant 0 : index
    %429 = vector.load %arg15[%428, %c0_130, %c0_131] : memref<8x8x384xf32, #tpu.memory_space<vmem>>, vector<1x8x384xf32>
    %430 = vector.shape_cast %429 : vector<1x8x384xf32> to vector<8x384xf32>
    %cst_132 = arith.constant dense<0.000000e+00> : vector<8x384xf32>
    %431 = tpu.matmul %423, %316, %cst_132 {dimension_numbers = #tpu.dot_dimension_numbers<[1], [0], [0], [1], [0, 0, 1, 1], [], []>} : vector<8x128xf32>, vector<128x384xf32>, vector<8x384xf32> -> vector<8x384xf32>
    %432 = vector.extract_strided_slice %430 {offsets = [0, 0], sizes = [8, 128], strides = [1, 1]} : vector<8x384xf32> to vector<8x128xf32>
    %433 = vector.extract_strided_slice %431 {offsets = [0, 0], sizes = [8, 128], strides = [1, 1]} : vector<8x384xf32> to vector<8x128xf32>
    %434 = arith.addf %432, %433 : vector<8x128xf32>
    %435 = arith.negf %434 : vector<8x128xf32>
    %436 = math.exp %435 : vector<8x128xf32>
    %cst_133 = arith.constant 1.000000e+00 : f32
    %437 = vector.broadcast %cst_133 : f32 to vector<8x128xf32>
    %438 = arith.addf %437, %436 : vector<8x128xf32>
    %439 = arith.divf %437, %438 : vector<8x128xf32>
    %440 = vector.extract_strided_slice %430 {offsets = [0, 128], sizes = [8, 128], strides = [1, 1]} : vector<8x384xf32> to vector<8x128xf32>
    %441 = vector.extract_strided_slice %431 {offsets = [0, 128], sizes = [8, 128], strides = [1, 1]} : vector<8x384xf32> to vector<8x128xf32>
    %442 = arith.addf %440, %441 : vector<8x128xf32>
    %443 = arith.negf %442 : vector<8x128xf32>
    %444 = math.exp %443 : vector<8x128xf32>
    %cst_134 = arith.constant 1.000000e+00 : f32
    %445 = vector.broadcast %cst_134 : f32 to vector<8x128xf32>
    %446 = arith.addf %445, %444 : vector<8x128xf32>
    %447 = arith.divf %445, %446 : vector<8x128xf32>
    %448 = vector.extract_strided_slice %430 {offsets = [0, 256], sizes = [8, 128], strides = [1, 1]} : vector<8x384xf32> to vector<8x128xf32>
    %449 = vector.extract_strided_slice %431 {offsets = [0, 256], sizes = [8, 128], strides = [1, 1]} : vector<8x384xf32> to vector<8x128xf32>
    %450 = vector.broadcast %317 : vector<1x128xf32> to vector<8x128xf32>
    %451 = arith.addf %449, %450 : vector<8x128xf32>
    %452 = arith.mulf %439, %451 : vector<8x128xf32>
    %453 = arith.addf %448, %452 : vector<8x128xf32>
    %454 = math.tanh %453 : vector<8x128xf32>
    %455 = arith.mulf %447, %423 : vector<8x128xf32>
    %cst_135 = arith.constant 1.000000e+00 : f32
    %456 = vector.broadcast %cst_135 : f32 to vector<8x128xf32>
    %457 = arith.subf %456, %447 : vector<8x128xf32>
    %458 = arith.mulf %457, %454 : vector<8x128xf32>
    %459 = arith.addf %455, %458 : vector<8x128xf32>
    %460 = arith.index_cast %c3_i32_129 : i32 to index
    %c0_136 = arith.constant 0 : index
    %c0_137 = arith.constant 0 : index
    %461 = vector.load %arg16[%460, %c0_136, %c0_137] : memref<8x8x128xf32, #tpu.memory_space<vmem>>, vector<1x8x128xf32>
    %462 = vector.shape_cast %461 : vector<1x8x128xf32> to vector<8x128xf32>
    %463 = vector.shape_cast %459 : vector<8x128xf32> to vector<1x8x128xf32>
    tpu.vector_store %arg16[%460, %c0_136, %c0_137], %463 {strides = array<i32>} : memref<8x8x128xf32, #tpu.memory_space<vmem>>, vector<1x8x128xf32>,
    %c4_i32_138 = arith.constant 4 : i32
    %464 = arith.index_cast %c4_i32_138 : i32 to index
    %c0_139 = arith.constant 0 : index
    %c0_140 = arith.constant 0 : index
    %465 = vector.load %arg15[%464, %c0_139, %c0_140] : memref<8x8x384xf32, #tpu.memory_space<vmem>>, vector<1x8x384xf32>
    %466 = vector.shape_cast %465 : vector<1x8x384xf32> to vector<8x384xf32>
    %cst_141 = arith.constant dense<0.000000e+00> : vector<8x384xf32>
    %467 = tpu.matmul %459, %316, %cst_141 {dimension_numbers = #tpu.dot_dimension_numbers<[1], [0], [0], [1], [0, 0, 1, 1], [], []>} : vector<8x128xf32>, vector<128x384xf32>, vector<8x384xf32> -> vector<8x384xf32>
    %468 = vector.extract_strided_slice %466 {offsets = [0, 0], sizes = [8, 128], strides = [1, 1]} : vector<8x384xf32> to vector<8x128xf32>
    %469 = vector.extract_strided_slice %467 {offsets = [0, 0], sizes = [8, 128], strides = [1, 1]} : vector<8x384xf32> to vector<8x128xf32>
    %470 = arith.addf %468, %469 : vector<8x128xf32>
    %471 = arith.negf %470 : vector<8x128xf32>
    %472 = math.exp %471 : vector<8x128xf32>
    %cst_142 = arith.constant 1.000000e+00 : f32
    %473 = vector.broadcast %cst_142 : f32 to vector<8x128xf32>
    %474 = arith.addf %473, %472 : vector<8x128xf32>
    %475 = arith.divf %473, %474 : vector<8x128xf32>
    %476 = vector.extract_strided_slice %466 {offsets = [0, 128], sizes = [8, 128], strides = [1, 1]} : vector<8x384xf32> to vector<8x128xf32>
    %477 = vector.extract_strided_slice %467 {offsets = [0, 128], sizes = [8, 128], strides = [1, 1]} : vector<8x384xf32> to vector<8x128xf32>
    %478 = arith.addf %476, %477 : vector<8x128xf32>
    %479 = arith.negf %478 : vector<8x128xf32>
    %480 = math.exp %479 : vector<8x128xf32>
    %cst_143 = arith.constant 1.000000e+00 : f32
    %481 = vector.broadcast %cst_143 : f32 to vector<8x128xf32>
    %482 = arith.addf %481, %480 : vector<8x128xf32>
    %483 = arith.divf %481, %482 : vector<8x128xf32>
    %484 = vector.extract_strided_slice %466 {offsets = [0, 256], sizes = [8, 128], strides = [1, 1]} : vector<8x384xf32> to vector<8x128xf32>
    %485 = vector.extract_strided_slice %467 {offsets = [0, 256], sizes = [8, 128], strides = [1, 1]} : vector<8x384xf32> to vector<8x128xf32>
    %486 = vector.broadcast %317 : vector<1x128xf32> to vector<8x128xf32>
    %487 = arith.addf %485, %486 : vector<8x128xf32>
    %488 = arith.mulf %475, %487 : vector<8x128xf32>
    %489 = arith.addf %484, %488 : vector<8x128xf32>
    %490 = math.tanh %489 : vector<8x128xf32>
    %491 = arith.mulf %483, %459 : vector<8x128xf32>
    %cst_144 = arith.constant 1.000000e+00 : f32
    %492 = vector.broadcast %cst_144 : f32 to vector<8x128xf32>
    %493 = arith.subf %492, %483 : vector<8x128xf32>
    %494 = arith.mulf %493, %490 : vector<8x128xf32>
    %495 = arith.addf %491, %494 : vector<8x128xf32>
    %496 = arith.index_cast %c4_i32_138 : i32 to index
    %c0_145 = arith.constant 0 : index
    %c0_146 = arith.constant 0 : index
    %497 = vector.load %arg16[%496, %c0_145, %c0_146] : memref<8x8x128xf32, #tpu.memory_space<vmem>>, vector<1x8x128xf32>
    %498 = vector.shape_cast %497 : vector<1x8x128xf32> to vector<8x128xf32>
    %499 = vector.shape_cast %495 : vector<8x128xf32> to vector<1x8x128xf32>
    tpu.vector_store %arg16[%496, %c0_145, %c0_146], %499 {strides = array<i32>} : memref<8x8x128xf32, #tpu.memory_space<vmem>>, vector<1x8x128xf32>,
    %c5_i32_147 = arith.constant 5 : i32
    %500 = arith.index_cast %c5_i32_147 : i32 to index
    %c0_148 = arith.constant 0 : index
    %c0_149 = arith.constant 0 : index
    %501 = vector.load %arg15[%500, %c0_148, %c0_149] : memref<8x8x384xf32, #tpu.memory_space<vmem>>, vector<1x8x384xf32>
    %502 = vector.shape_cast %501 : vector<1x8x384xf32> to vector<8x384xf32>
    %cst_150 = arith.constant dense<0.000000e+00> : vector<8x384xf32>
    %503 = tpu.matmul %495, %316, %cst_150 {dimension_numbers = #tpu.dot_dimension_numbers<[1], [0], [0], [1], [0, 0, 1, 1], [], []>} : vector<8x128xf32>, vector<128x384xf32>, vector<8x384xf32> -> vector<8x384xf32>
    %504 = vector.extract_strided_slice %502 {offsets = [0, 0], sizes = [8, 128], strides = [1, 1]} : vector<8x384xf32> to vector<8x128xf32>
    %505 = vector.extract_strided_slice %503 {offsets = [0, 0], sizes = [8, 128], strides = [1, 1]} : vector<8x384xf32> to vector<8x128xf32>
    %506 = arith.addf %504, %505 : vector<8x128xf32>
    %507 = arith.negf %506 : vector<8x128xf32>
    %508 = math.exp %507 : vector<8x128xf32>
    %cst_151 = arith.constant 1.000000e+00 : f32
    %509 = vector.broadcast %cst_151 : f32 to vector<8x128xf32>
    %510 = arith.addf %509, %508 : vector<8x128xf32>
    %511 = arith.divf %509, %510 : vector<8x128xf32>
    %512 = vector.extract_strided_slice %502 {offsets = [0, 128], sizes = [8, 128], strides = [1, 1]} : vector<8x384xf32> to vector<8x128xf32>
    %513 = vector.extract_strided_slice %503 {offsets = [0, 128], sizes = [8, 128], strides = [1, 1]} : vector<8x384xf32> to vector<8x128xf32>
    %514 = arith.addf %512, %513 : vector<8x128xf32>
    %515 = arith.negf %514 : vector<8x128xf32>
    %516 = math.exp %515 : vector<8x128xf32>
    %cst_152 = arith.constant 1.000000e+00 : f32
    %517 = vector.broadcast %cst_152 : f32 to vector<8x128xf32>
    %518 = arith.addf %517, %516 : vector<8x128xf32>
    %519 = arith.divf %517, %518 : vector<8x128xf32>
    %520 = vector.extract_strided_slice %502 {offsets = [0, 256], sizes = [8, 128], strides = [1, 1]} : vector<8x384xf32> to vector<8x128xf32>
    %521 = vector.extract_strided_slice %503 {offsets = [0, 256], sizes = [8, 128], strides = [1, 1]} : vector<8x384xf32> to vector<8x128xf32>
    %522 = vector.broadcast %317 : vector<1x128xf32> to vector<8x128xf32>
    %523 = arith.addf %521, %522 : vector<8x128xf32>
    %524 = arith.mulf %511, %523 : vector<8x128xf32>
    %525 = arith.addf %520, %524 : vector<8x128xf32>
    %526 = math.tanh %525 : vector<8x128xf32>
    %527 = arith.mulf %519, %495 : vector<8x128xf32>
    %cst_153 = arith.constant 1.000000e+00 : f32
    %528 = vector.broadcast %cst_153 : f32 to vector<8x128xf32>
    %529 = arith.subf %528, %519 : vector<8x128xf32>
    %530 = arith.mulf %529, %526 : vector<8x128xf32>
    %531 = arith.addf %527, %530 : vector<8x128xf32>
    %532 = arith.index_cast %c5_i32_147 : i32 to index
    %c0_154 = arith.constant 0 : index
    %c0_155 = arith.constant 0 : index
    %533 = vector.load %arg16[%532, %c0_154, %c0_155] : memref<8x8x128xf32, #tpu.memory_space<vmem>>, vector<1x8x128xf32>
    %534 = vector.shape_cast %533 : vector<1x8x128xf32> to vector<8x128xf32>
    %535 = vector.shape_cast %531 : vector<8x128xf32> to vector<1x8x128xf32>
    tpu.vector_store %arg16[%532, %c0_154, %c0_155], %535 {strides = array<i32>} : memref<8x8x128xf32, #tpu.memory_space<vmem>>, vector<1x8x128xf32>,
    %c6_i32_156 = arith.constant 6 : i32
    %536 = arith.index_cast %c6_i32_156 : i32 to index
    %c0_157 = arith.constant 0 : index
    %c0_158 = arith.constant 0 : index
    %537 = vector.load %arg15[%536, %c0_157, %c0_158] : memref<8x8x384xf32, #tpu.memory_space<vmem>>, vector<1x8x384xf32>
    %538 = vector.shape_cast %537 : vector<1x8x384xf32> to vector<8x384xf32>
    %cst_159 = arith.constant dense<0.000000e+00> : vector<8x384xf32>
    %539 = tpu.matmul %531, %316, %cst_159 {dimension_numbers = #tpu.dot_dimension_numbers<[1], [0], [0], [1], [0, 0, 1, 1], [], []>} : vector<8x128xf32>, vector<128x384xf32>, vector<8x384xf32> -> vector<8x384xf32>
    %540 = vector.extract_strided_slice %538 {offsets = [0, 0], sizes = [8, 128], strides = [1, 1]} : vector<8x384xf32> to vector<8x128xf32>
    %541 = vector.extract_strided_slice %539 {offsets = [0, 0], sizes = [8, 128], strides = [1, 1]} : vector<8x384xf32> to vector<8x128xf32>
    %542 = arith.addf %540, %541 : vector<8x128xf32>
    %543 = arith.negf %542 : vector<8x128xf32>
    %544 = math.exp %543 : vector<8x128xf32>
    %cst_160 = arith.constant 1.000000e+00 : f32
    %545 = vector.broadcast %cst_160 : f32 to vector<8x128xf32>
    %546 = arith.addf %545, %544 : vector<8x128xf32>
    %547 = arith.divf %545, %546 : vector<8x128xf32>
    %548 = vector.extract_strided_slice %538 {offsets = [0, 128], sizes = [8, 128], strides = [1, 1]} : vector<8x384xf32> to vector<8x128xf32>
    %549 = vector.extract_strided_slice %539 {offsets = [0, 128], sizes = [8, 128], strides = [1, 1]} : vector<8x384xf32> to vector<8x128xf32>
    %550 = arith.addf %548, %549 : vector<8x128xf32>
    %551 = arith.negf %550 : vector<8x128xf32>
    %552 = math.exp %551 : vector<8x128xf32>
    %cst_161 = arith.constant 1.000000e+00 : f32
    %553 = vector.broadcast %cst_161 : f32 to vector<8x128xf32>
    %554 = arith.addf %553, %552 : vector<8x128xf32>
    %555 = arith.divf %553, %554 : vector<8x128xf32>
    %556 = vector.extract_strided_slice %538 {offsets = [0, 256], sizes = [8, 128], strides = [1, 1]} : vector<8x384xf32> to vector<8x128xf32>
    %557 = vector.extract_strided_slice %539 {offsets = [0, 256], sizes = [8, 128], strides = [1, 1]} : vector<8x384xf32> to vector<8x128xf32>
    %558 = vector.broadcast %317 : vector<1x128xf32> to vector<8x128xf32>
    %559 = arith.addf %557, %558 : vector<8x128xf32>
    %560 = arith.mulf %547, %559 : vector<8x128xf32>
    %561 = arith.addf %556, %560 : vector<8x128xf32>
    %562 = math.tanh %561 : vector<8x128xf32>
    %563 = arith.mulf %555, %531 : vector<8x128xf32>
    %cst_162 = arith.constant 1.000000e+00 : f32
    %564 = vector.broadcast %cst_162 : f32 to vector<8x128xf32>
    %565 = arith.subf %564, %555 : vector<8x128xf32>
    %566 = arith.mulf %565, %562 : vector<8x128xf32>
    %567 = arith.addf %563, %566 : vector<8x128xf32>
    %568 = arith.index_cast %c6_i32_156 : i32 to index
    %c0_163 = arith.constant 0 : index
    %c0_164 = arith.constant 0 : index
    %569 = vector.load %arg16[%568, %c0_163, %c0_164] : memref<8x8x128xf32, #tpu.memory_space<vmem>>, vector<1x8x128xf32>
    %570 = vector.shape_cast %569 : vector<1x8x128xf32> to vector<8x128xf32>
    %571 = vector.shape_cast %567 : vector<8x128xf32> to vector<1x8x128xf32>
    tpu.vector_store %arg16[%568, %c0_163, %c0_164], %571 {strides = array<i32>} : memref<8x8x128xf32, #tpu.memory_space<vmem>>, vector<1x8x128xf32>,
    %c7_i32_165 = arith.constant 7 : i32
    %572 = arith.index_cast %c7_i32_165 : i32 to index
    %c0_166 = arith.constant 0 : index
    %c0_167 = arith.constant 0 : index
    %573 = vector.load %arg15[%572, %c0_166, %c0_167] : memref<8x8x384xf32, #tpu.memory_space<vmem>>, vector<1x8x384xf32>
    %574 = vector.shape_cast %573 : vector<1x8x384xf32> to vector<8x384xf32>
    %cst_168 = arith.constant dense<0.000000e+00> : vector<8x384xf32>
    %575 = tpu.matmul %567, %316, %cst_168 {dimension_numbers = #tpu.dot_dimension_numbers<[1], [0], [0], [1], [0, 0, 1, 1], [], []>} : vector<8x128xf32>, vector<128x384xf32>, vector<8x384xf32> -> vector<8x384xf32>
    %576 = vector.extract_strided_slice %574 {offsets = [0, 0], sizes = [8, 128], strides = [1, 1]} : vector<8x384xf32> to vector<8x128xf32>
    %577 = vector.extract_strided_slice %575 {offsets = [0, 0], sizes = [8, 128], strides = [1, 1]} : vector<8x384xf32> to vector<8x128xf32>
    %578 = arith.addf %576, %577 : vector<8x128xf32>
    %579 = arith.negf %578 : vector<8x128xf32>
    %580 = math.exp %579 : vector<8x128xf32>
    %cst_169 = arith.constant 1.000000e+00 : f32
    %581 = vector.broadcast %cst_169 : f32 to vector<8x128xf32>
    %582 = arith.addf %581, %580 : vector<8x128xf32>
    %583 = arith.divf %581, %582 : vector<8x128xf32>
    %584 = vector.extract_strided_slice %574 {offsets = [0, 128], sizes = [8, 128], strides = [1, 1]} : vector<8x384xf32> to vector<8x128xf32>
    %585 = vector.extract_strided_slice %575 {offsets = [0, 128], sizes = [8, 128], strides = [1, 1]} : vector<8x384xf32> to vector<8x128xf32>
    %586 = arith.addf %584, %585 : vector<8x128xf32>
    %587 = arith.negf %586 : vector<8x128xf32>
    %588 = math.exp %587 : vector<8x128xf32>
    %cst_170 = arith.constant 1.000000e+00 : f32
    %589 = vector.broadcast %cst_170 : f32 to vector<8x128xf32>
    %590 = arith.addf %589, %588 : vector<8x128xf32>
    %591 = arith.divf %589, %590 : vector<8x128xf32>
    %592 = vector.extract_strided_slice %574 {offsets = [0, 256], sizes = [8, 128], strides = [1, 1]} : vector<8x384xf32> to vector<8x128xf32>
    %593 = vector.extract_strided_slice %575 {offsets = [0, 256], sizes = [8, 128], strides = [1, 1]} : vector<8x384xf32> to vector<8x128xf32>
    %594 = vector.broadcast %317 : vector<1x128xf32> to vector<8x128xf32>
    %595 = arith.addf %593, %594 : vector<8x128xf32>
    %596 = arith.mulf %583, %595 : vector<8x128xf32>
    %597 = arith.addf %592, %596 : vector<8x128xf32>
    %598 = math.tanh %597 : vector<8x128xf32>
    %599 = arith.mulf %591, %567 : vector<8x128xf32>
    %cst_171 = arith.constant 1.000000e+00 : f32
    %600 = vector.broadcast %cst_171 : f32 to vector<8x128xf32>
    %601 = arith.subf %600, %591 : vector<8x128xf32>
    %602 = arith.mulf %601, %598 : vector<8x128xf32>
    %603 = arith.addf %599, %602 : vector<8x128xf32>
    %604 = arith.index_cast %c7_i32_165 : i32 to index
    %c0_172 = arith.constant 0 : index
    %c0_173 = arith.constant 0 : index
    %605 = vector.load %arg16[%604, %c0_172, %c0_173] : memref<8x8x128xf32, #tpu.memory_space<vmem>>, vector<1x8x128xf32>
    %606 = vector.shape_cast %605 : vector<1x8x128xf32> to vector<8x128xf32>
    %607 = vector.shape_cast %603 : vector<8x128xf32> to vector<1x8x128xf32>
    tpu.vector_store %arg16[%604, %c0_172, %c0_173], %607 {strides = array<i32>} : memref<8x8x128xf32, #tpu.memory_space<vmem>>, vector<1x8x128xf32>,
    %c8_i32_174 = arith.constant 8 : i32
    %c1_175 = arith.constant 1 : index
    %c0_176 = arith.constant 0 : index
    %c0_177 = arith.constant 0 : index
    %608 = vector.load %arg14[%c1_175, %c0_176, %c0_177] : memref<2x8x128xf32, #tpu.memory_space<vmem>>, vector<1x8x128xf32>
    %609 = vector.shape_cast %608 : vector<1x8x128xf32> to vector<8x128xf32>
    %610 = vector.shape_cast %603 : vector<8x128xf32> to vector<1x8x128xf32>
    tpu.vector_store %arg14[%c1_175, %c0_176, %c0_177], %610 {strides = array<i32>} : memref<2x8x128xf32, #tpu.memory_space<vmem>>, vector<1x8x128xf32>,
    %c0_178 = arith.constant 0 : index
    %c0_179 = arith.constant 0 : index
    %c0_180 = arith.constant 0 : index
    %611 = vector.load %arg16[%c0_178, %c0_179, %c0_180] : memref<8x8x128xf32, #tpu.memory_space<vmem>>, vector<8x8x128xf32>
    %612 = vector.shape_cast %611 : vector<8x8x128xf32> to vector<64x128xf32>
    %c0_181 = arith.constant 0 : index
    %c0_182 = arith.constant 0 : index
    %613 = vector.load %arg11[%c0_181, %c0_182] : memref<128x128xf32, #tpu.memory_space<vmem>>, vector<128x128xf32>
    %cst_183 = arith.constant dense<0.000000e+00> : vector<64x128xf32>
    %614 = tpu.matmul %612, %613, %cst_183 {dimension_numbers = #tpu.dot_dimension_numbers<[1], [0], [0], [1], [0, 0, 1, 1], [], []>} : vector<64x128xf32>, vector<128x128xf32>, vector<64x128xf32> -> vector<64x128xf32>
    %c0_184 = arith.constant 0 : index
    %c0_185 = arith.constant 0 : index
    %615 = vector.load %arg12[%c0_184, %c0_185] : memref<1x128xf32, #tpu.memory_space<vmem>>, vector<1x128xf32>
    %616 = vector.broadcast %615 : vector<1x128xf32> to vector<64x128xf32>
    %617 = arith.addf %614, %616 : vector<64x128xf32>
    %618 = vector.shape_cast %617 : vector<64x128xf32> to vector<8x8x128xf32>
    %c0_186 = arith.constant 0 : index
    %c0_187 = arith.constant 0 : index
    %c0_188 = arith.constant 0 : index
    %619 = vector.load %arg13[%c0_186, %c0_187, %c0_188] : memref<8x8x128xf32, #tpu.memory_space<vmem>>, vector<8x8x128xf32>
    tpu.vector_store %arg13[%c0_186, %c0_187, %c0_188], %618 {strides = array<i32>} : memref<8x8x128xf32, #tpu.memory_space<vmem>>, vector<8x8x128xf32>,
    return
  }
  func.func @transform_0(%arg0: i32, %arg1: i32) -> (i32, i32, i32) {
    %c0_i32 = arith.constant 0 : i32
    %c0_i32_0 = arith.constant 0 : i32
    return %arg1, %arg0, %c0_i32 : i32, i32, i32
  }
  func.func @transform_1(%arg0: i32, %arg1: i32) -> (i32, i32) {
    %c0_i32 = arith.constant 0 : i32
    %c0_i32_0 = arith.constant 0 : i32
    %c0_i32_1 = arith.constant 0 : i32
    return %c0_i32, %c0_i32_0 : i32, i32
  }
  func.func @transform_2(%arg0: i32, %arg1: i32) -> (i32, i32) {
    %c0_i32 = arith.constant 0 : i32
    %c0_i32_0 = arith.constant 0 : i32
    %c0_i32_1 = arith.constant 0 : i32
    return %c0_i32, %c0_i32_0 : i32, i32
  }
  func.func @transform_3(%arg0: i32, %arg1: i32) -> (i32, i32) {
    %c0_i32 = arith.constant 0 : i32
    %c0_i32_0 = arith.constant 0 : i32
    %c0_i32_1 = arith.constant 0 : i32
    return %c0_i32, %c0_i32_0 : i32, i32
  }
  func.func @transform_4(%arg0: i32, %arg1: i32) -> (i32, i32) {
    %c0_i32 = arith.constant 0 : i32
    %c0_i32_0 = arith.constant 0 : i32
    %c0_i32_1 = arith.constant 0 : i32
    return %c0_i32, %c0_i32_0 : i32, i32
  }
  func.func @transform_5(%arg0: i32, %arg1: i32) -> (i32, i32) {
    %c0_i32 = arith.constant 0 : i32
    %c0_i32_0 = arith.constant 0 : i32
    %c0_i32_1 = arith.constant 0 : i32
    return %c0_i32, %c0_i32_0 : i32, i32
  }
  func.func @transform_6(%arg0: i32, %arg1: i32) -> (i32, i32) {
    %c0_i32 = arith.constant 0 : i32
    %c0_i32_0 = arith.constant 0 : i32
    %c0_i32_1 = arith.constant 0 : i32
    return %c0_i32, %c0_i32_0 : i32, i32
  }
  func.func @transform_7(%arg0: i32, %arg1: i32) -> (i32, i32) {
    %c0_i32 = arith.constant 0 : i32
    %c0_i32_0 = arith.constant 0 : i32
    %c0_i32_1 = arith.constant 0 : i32
    return %c0_i32, %c0_i32_0 : i32, i32
  }
  func.func @transform_8(%arg0: i32, %arg1: i32) -> (i32, i32) {
    %c0_i32 = arith.constant 0 : i32
    %c0_i32_0 = arith.constant 0 : i32
    %c0_i32_1 = arith.constant 0 : i32
    return %c0_i32, %c0_i32_0 : i32, i32
  }
  func.func @transform_9(%arg0: i32, %arg1: i32) -> (i32, i32) {
    %c0_i32 = arith.constant 0 : i32
    %c0_i32_0 = arith.constant 0 : i32
    %c0_i32_1 = arith.constant 0 : i32
    return %c0_i32, %c0_i32_0 : i32, i32
  }
  func.func @transform_10(%arg0: i32, %arg1: i32) -> (i32, i32) {
    %c0_i32 = arith.constant 0 : i32
    %c0_i32_0 = arith.constant 0 : i32
    %c0_i32_1 = arith.constant 0 : i32
    return %c0_i32, %c0_i32_0 : i32, i32
  }
  func.func @transform_11(%arg0: i32, %arg1: i32) -> (i32, i32, i32) {
    %c0_i32 = arith.constant 0 : i32
    %c0_i32_0 = arith.constant 0 : i32
    return %arg1, %arg0, %c0_i32 : i32, i32, i32
  }
}

</mosaic_0001>

<bundles_post_ra>
// kernel: gru_forward.1
= control target key start
LH: loop header
LB: loop body
LE: loop exit
PB: predicated region body
PF: predicated region fallthrough
CT: control target
= control target key end

     0   :  { %16 = vsyncpa [#allocation6], 0  ;;  %s7330_s0 = inlined_call_operand.vmem [shape: f32[8,8,128], index: 0, kind: input, shape index: {}]   ;;  %s7331_s1 = inlined_call_operand.hbm [shape: f32[128,384], index: 1, kind: input, shape index: {}]   ;;  %s7332_s2 = inlined_call_operand.vmem [shape: f32[1,384], index: 2, kind: input, shape index: {}]   ;;  %s7333_s3 = inlined_call_operand.hbm [shape: f32[128,384], index: 3, kind: input, shape index: {}]   ;;  %s7334_s4 = inlined_call_operand.vmem [shape: f32[1,128], index: 4, kind: input, shape index: {}]   ;;  %s7335_s5 = inlined_call_operand.hbm [shape: f32[128,384], index: 5, kind: input, shape index: {}]   ;;  %s7336_s6 = inlined_call_operand.vmem [shape: f32[1,384], index: 6, kind: input, shape index: {}]   ;;  %s7337_s7 = inlined_call_operand.hbm [shape: f32[128,384], index: 7, kind: input, shape index: {}]   ;;  %s7338_s8 = inlined_call_operand.vmem [shape: f32[1,128], index: 8, kind: input, shape index: {}]   ;;  %s7339_s9 = inlined_call_operand.hbm [shape: f32[128,128], index: 9, kind: input, shape index: {}]   ;;  %s7340_s10 = inlined_call_operand.vmem [shape: f32[1,128], index: 10, kind: input, shape index: {}]   ;;  %s7341_s11 = inlined_call_operand.vmem [shape: f32[8,8,128], index: 11, kind: output, shape index: {}]  }
   0x1   :  { %17 = vsyncpa [#allocation8], 0 }
   0x2   :  { %18 = vsyncpa [#allocation11], 0  ;;  %s6174_s17 = smov [#allocation7]   ;;  %s6175_s19 = smov [#allocation10]  }
   0x3   :  { %s40_s18 = sshll.u32 %s6174_s17, 4  ;;  %s68_s20 = sshll.u32 %s6175_s19, 4  ;;  %s41_s18 = int_to_ptr.vmem [resolvable:$true] %s40_s18  ;;  %s6246_s20 = int_to_ptr.vmem [resolvable:$true] %s68_s20 }
   0x4   :  { %s6058_s23 = scalar_lea.hbm %s7333_s3, 6144 }
   0x5   :  { %p6059_p0 = scmp.ne.s32.totalorder %s7333_s3, %s6058_s23  ;;  %p6062_p1 = scmp.lt.u32.totalorder %s6058_s23, %s7333_s3 }
   0x7   :  { %p6064_p2 = pnand %p6062_p1, %p6059_p0 }
   0x9   :  { %6067 = shalt.err (!%p6064_p2)
}
   0xa   :  { %s6068_s28 = scalar_lea.vmem %s41_s18, 6144  ;;  %p6073_p4 = scmp.lt.s32.totalorder %s41_s18, %s41_s18 }
   0xb   :  { %p6069_p3 = scmp.ne.s32.totalorder %s41_s18, %s6068_s28  ;;  %p6074_p5 = scmp.lt.s32.totalorder %s6068_s28, %s6068_s28 }
   0xd   :  { %p6075_p6 = por %p6074_p5, %p6073_p4 }
   0xf   :  { %p6076_p7 = pnand %p6075_p6, %p6069_p3 }
  0x11   :  { %6079 = shalt.err (!%p6076_p7)
}
  0x12   :  { %s6176_s29 = smov 384   ;;  %s6177_s30 = smov 24  }
  0x13   :  { %46 = dma.hbm_to_vmem [thread:$0]  %s7333_s3, 6144, %s41_s18, [#allocation8], %s6176_s29, %s6176_s29, %s6177_s30  }
  0x14   :  { %s6080_s16 = scalar_lea.hbm %s7337_s7, 6144 }
  0x15   :  { %p6081_p8 = scmp.ne.s32.totalorder %s7337_s7, %s6080_s16  ;;  %p6084_p9 = scmp.lt.u32.totalorder %s6080_s16, %s7337_s7 }
  0x17   :  { %p6086_p10 = pnand %p6084_p9, %p6081_p8 }
  0x19   :  { %6089 = shalt.err (!%p6086_p10)
}
  0x1a   :  { %s6090_s23 = scalar_lea.vmem %s6246_s20, 6144  ;;  %p6095_p12 = scmp.lt.s32.totalorder %s6246_s20, %s6246_s20 }
  0x1b   :  { %p6091_p11 = scmp.ne.s32.totalorder %s6246_s20, %s6090_s23  ;;  %p6096_p13 = scmp.lt.s32.totalorder %s6090_s23, %s6090_s23 }
  0x1d   :  { %p6097_p0 = por %p6096_p13, %p6095_p12 }
  0x1f   :  { %p6098_p1 = pnand %p6097_p0, %p6091_p11 }
  0x21   :  { %6101 = shalt.err (!%p6098_p1)
}
  0x22   :  { %74 = dma.hbm_to_vmem [thread:$0]  %s7337_s7, 6144, %s6246_s20, [#allocation11], %s6176_s29, %s6176_s29, %s6177_s30  }
  0x23   :  { %s6178_s24 = smov [#allocation5]   ;;  %s6179_s26 = smov [#allocation9]  }
  0x24   :  { %s26_s25 = sshll.u32 %s6178_s24, 4  ;;  %s54_s27 = sshll.u32 %s6179_s26, 4  ;;  %s27_s25 = int_to_ptr.vmem [resolvable:$true] %s26_s25  ;;  %s6283_s27 = int_to_ptr.vmem [resolvable:$true] %s54_s27 }
  0x25   :  { %s6102_s13 = scalar_lea.hbm %s7331_s1, 6144 }
  0x26   :  { %p6103_p2 = scmp.ne.s32.totalorder %s7331_s1, %s6102_s13  ;;  %p6106_p3 = scmp.lt.u32.totalorder %s6102_s13, %s7331_s1 }
  0x28   :  { %p6108_p4 = pnand %p6106_p3, %p6103_p2 }
  0x2a   :  { %6111 = shalt.err (!%p6108_p4)
}
  0x2b   :  { %s6112_s7 = scalar_lea.vmem %s27_s25, 6144  ;;  %p6117_p6 = scmp.lt.s32.totalorder %s27_s25, %s27_s25 }
  0x2c   :  { %p6113_p5 = scmp.ne.s32.totalorder %s27_s25, %s6112_s7  ;;  %p6118_p7 = scmp.lt.s32.totalorder %s6112_s7, %s6112_s7 }
  0x2e   :  { %p6119_p8 = por %p6118_p7, %p6117_p6 }
  0x30   :  { %p6120_p9 = pnand %p6119_p8, %p6113_p5 }
  0x32   :  { %6123 = shalt.err (!%p6120_p9)
}
  0x33   :  { %32 = dma.hbm_to_vmem [thread:$0]  %s7331_s1, 6144, %s27_s25, [#allocation6], %s6176_s29, %s6176_s29, %s6177_s30  }
  0x34   :  { %s6124_s23 = scalar_lea.hbm %s7335_s5, 6144 }
  0x35   :  { %p6125_p10 = scmp.ne.s32.totalorder %s7335_s5, %s6124_s23  ;;  %p6128_p11 = scmp.lt.u32.totalorder %s6124_s23, %s7335_s5 }
  0x37   :  { %p6130_p12 = pnand %p6128_p11, %p6125_p10 }
  0x39   :  { %6133 = shalt.err (!%p6130_p12)
}
  0x3a   :  { %s6134_s28 = scalar_lea.vmem %s6283_s27, 6144  ;;  %p6139_p0 = scmp.lt.s32.totalorder %s6283_s27, %s6283_s27 }
  0x3b   :  { %p6135_p13 = scmp.ne.s32.totalorder %s6283_s27, %s6134_s28  ;;  %p6140_p1 = scmp.lt.s32.totalorder %s6134_s28, %s6134_s28 }
  0x3d   :  { %p6141_p2 = por %p6140_p1, %p6139_p0 }
  0x3f   :  { %p6142_p3 = pnand %p6141_p2, %p6135_p13 }
  0x41   :  { %6145 = shalt.err (!%p6142_p3)
}
  0x42   :  { %60 = dma.hbm_to_vmem [thread:$0]  %s7335_s5, 6144, %s6283_s27, [#allocation8], %s6176_s29, %s6176_s29, %s6177_s30  }
  0x43   :  { %s6180_s12 = smov [#allocation12]   ;;  %s6146_s16 = scalar_lea.hbm %s7339_s9, 2048 }
  0x44   :  { %s82_s13 = sshll.u32 %s6180_s12, 4  ;;  %p6147_p4 = scmp.ne.s32.totalorder %s7339_s9, %s6146_s16  ;;  %s83_s13 = int_to_ptr.vmem [resolvable:$true] %s82_s13 }
  0x45   :  { %p6150_p5 = scmp.lt.u32.totalorder %s6146_s16, %s7339_s9 }
  0x47   :  { %p6152_p6 = pnand %p6150_p5, %p6147_p4 }
  0x49   :  { %6155 = shalt.err (!%p6152_p6)
}
  0x4a   :  { %s6156_s21 = scalar_lea.vmem %s83_s13, 2048  ;;  %p6161_p8 = scmp.lt.s32.totalorder %s83_s13, %s83_s13 }
  0x4b   :  { %p6157_p7 = scmp.ne.s32.totalorder %s83_s13, %s6156_s21  ;;  %p6162_p9 = scmp.lt.s32.totalorder %s6156_s21, %s6156_s21 }
  0x4d   :  { %p6163_p10 = por %p6162_p9, %p6161_p8 }
  0x4f   :  { %p6164_p11 = pnand %p6163_p10, %p6157_p7 }
  0x51   :  { %6167 = shalt.err (!%p6164_p11)
}
  0x52   :  { %s6181_s5 = smov 128   ;;  %s6182_s29 = smov 8  }
  0x53   :  { %88 = dma.hbm_to_vmem [thread:$0]  %s7339_s9, 2048, %s83_s13, [#allocation11], %s6181_s5, %s6181_s5, %s6182_s29  }
  0x54   :  { %6168 = dma.done.wait [#allocation6], 6144  }
  0x55   :  { %6169 = vsyncadd [#allocation6], 4294961152 }
  0x56   :  { %6170 = dma.done.wait [#allocation8], 12288  }
  0x57   :  { %6171 = vsyncadd [#allocation8], 4294955008 }
  0x58   :  { %6172 = dma.done.wait [#allocation11], 8192  }
  0x59   :  { %6173 = vsyncadd [#allocation11], 4294959104  ;;  %v7345_v0 = vmov 0.0   ;;  %v121_v1 = vld [vmem:[#allocation5 + $0x8] sm:$0xff]  ;;  %v124_v2 = vld [vmem:[#allocation5 + $0x20] sm:$0xff]  ;;  %vm6185_vm0 = vmmov 0  }
  0x5a   :  { %249 = vmatprep.mubr.f32.mxu1 %v7345_v0  ;;  %544 = vmatprep.mubr.f32.mxu0 %v7345_v0  ;;  %v120_v3 = vld [vmem:[#allocation5] sm:$0xff]  ;;  %v4765_v4 = vpack.c.bf16 %v124_v2, %v121_v1  ;;  %v123_v5 = vld [vmem:[#allocation5 + $0x18] sm:$0xff]  ;;  %v428_v6 = vld [vmem:[#allocation7 + $0x8] sm:$0xff] }
  0x5b   :  { %v431_v7 = vld [vmem:[#allocation7 + $0x20] sm:$0xff]  ;;  %v4767_v8 = vpack.c.bf16 %v123_v5, %v120_v3  ;;  %v430_v11 = vld [vmem:[#allocation7 + $0x18] sm:$0xff]  ;;  %v130_v14 = vld [vmem:[#allocation5 + $0x50] sm:$0xff] }
  0x5c   :  { %v6334_v9 = vpack.c.bf16 %v431_v7, %v428_v6  ;;  %v427_v10 = vld [vmem:[#allocation7] sm:$0xff]  ;;  %v127_v12 = vld [vmem:[#allocation5 + $0x38] sm:$0xff]  ;;  %4766 = vmatprep.subr.bf16.mxu1 %v4765_v4  ;;  %v126_v15 = vld [vmem:[#allocation5 + $0x30] sm:$0xff] }
  0x5d   :  { %v6336_v13 = vpack.c.bf16 %v430_v11, %v427_v10  ;;  %v129_v16 = vld [vmem:[#allocation5 + $0x48] sm:$0xff]  ;;  %4768 = vmatpush1.bf16.msra.mxu1 %v4767_v8  ;;  %v4769_v17 = vpack.c.bf16 %v130_v14, %v127_v12  ;;  %v434_v19 = vld [vmem:[#allocation7 + $0x38] sm:$0xff]  ;;  %v437_v20 = vld [vmem:[#allocation7 + $0x50] sm:$0xff] }
  0x5e   :  { %4830 = vmatprep.subr.bf16.mxu0 %v6334_v9  ;;  %v4771_v18 = vpack.c.bf16 %v129_v16, %v126_v15  ;;  %v433_v21 = vld [vmem:[#allocation7 + $0x30] sm:$0xff]  ;;  %v6340_v22 = vpack.c.bf16 %v437_v20, %v434_v19  ;;  %v436_v23 = vld [vmem:[#allocation7 + $0x48] sm:$0xff]  ;;  %v136_v25 = vld [vmem:[#allocation5 + $0x80] sm:$0xff] }
  0x5f   :  { %4832 = vmatpush1.bf16.msra.mxu0 %v6336_v13  ;;  %v133_v24 = vld [vmem:[#allocation5 + $0x68] sm:$0xff]  ;;  %4770 = vmatprep.subr.bf16.mxu1 %v4769_v17  ;;  %v6342_v26 = vpack.c.bf16 %v436_v23, %v433_v21  ;;  %v132_v28 = vld [vmem:[#allocation5 + $0x60] sm:$0xff]  ;;  %v135_v29 = vld [vmem:[#allocation5 + $0x78] sm:$0xff] }
  0x60   :  { %v4773_v27 = vpack.c.bf16 %v136_v25, %v133_v24  ;;  %v440_v30 = vld [vmem:[#allocation7 + $0x68] sm:$0xff]  ;;  %4834 = vmatprep.subr.bf16.mxu0 %v6340_v22  ;;  %v443_v31 = vld [vmem:[#allocation7 + $0x80] sm:$0xff]  ;;  %v442_v33 = vld [vmem:[#allocation7 + $0x78] sm:$0xff]  ;;  %v4775_v34 = vpack.c.bf16 %v135_v29, %v132_v28 }
  0x61   :  { %v439_v32 = vld [vmem:[#allocation7 + $0x60] sm:$0xff]  ;;  %4772 = vmatpush1.bf16.msra.mxu1 %v4771_v18  ;;  %v6345_v35 = vpack.c.bf16 %v443_v31, %v440_v30  ;;  %v139_v36 = vld [vmem:[#allocation5 + $0x98] sm:$0xff]  ;;  %v142_v37 = vld [vmem:[#allocation5 + $0xb0] sm:$0xff] }
  0x62   :  { %v138_v38 = vld [vmem:[#allocation5 + $0x90] sm:$0xff]  ;;  %4774 = vmatprep.subr.bf16.mxu1 %v4773_v27  ;;  %v6348_v39 = vpack.c.bf16 %v442_v33, %v439_v32  ;;  %v4777_v40 = vpack.c.bf16 %v142_v37, %v139_v36  ;;  %v141_v41 = vld [vmem:[#allocation5 + $0xa8] sm:$0xff]  ;;  %v446_v42 = vld [vmem:[#allocation7 + $0x98] sm:$0xff] }
  0x63   :  { %4836 = vmatpush1.bf16.msra.mxu0 %v6342_v26  ;;  %v449_v43 = vld [vmem:[#allocation7 + $0xb0] sm:$0xff]  ;;  %v448_v46 = vld [vmem:[#allocation7 + $0xa8] sm:$0xff]  ;;  %v148_v48 = vld [vmem:[#allocation5 + $0xe0] sm:$0xff]  ;;  %v4779_v49 = vpack.c.bf16 %v141_v41, %v138_v38 }
  0x64   :  { %4838 = vmatprep.subr.bf16.mxu0 %v6345_v35  ;;  %v6351_v44 = vpack.c.bf16 %v449_v43, %v446_v42  ;;  %v445_v45 = vld [vmem:[#allocation7 + $0x90] sm:$0xff]  ;;  %v145_v47 = vld [vmem:[#allocation5 + $0xc8] sm:$0xff]  ;;  %v455_v51 = vld [vmem:[#allocation7 + $0xe0] sm:$0xff] }
  0x65   :  { %4776 = vmatpush1.bf16.msra.mxu1 %v4775_v34  ;;  %v452_v50 = vld [vmem:[#allocation7 + $0xc8] sm:$0xff]  ;;  %v6354_v52 = vpack.c.bf16 %v448_v46, %v445_v45  ;;  %v4781_v53 = vpack.c.bf16 %v148_v48, %v145_v47  ;;  %v144_v54 = vld [vmem:[#allocation5 + $0xc0] sm:$0xff]  ;;  %v147_v55 = vld [vmem:[#allocation5 + $0xd8] sm:$0xff] }
  0x66   :  { %4778 = vmatprep.subr.bf16.mxu1 %v4777_v40  ;;  %v451_v56 = vld [vmem:[#allocation7 + $0xc0] sm:$0xff]  ;;  %v6357_v57 = vpack.c.bf16 %v455_v51, %v452_v50  ;;  %v454_v58 = vld [vmem:[#allocation7 + $0xd8] sm:$0xff]  ;;  %v154_v60 = vld [vmem:[#allocation5 + $0x110] sm:$0xff]  ;;  %v4783_v63 = vpack.c.bf16 %v147_v55, %v144_v54 }
  0x67   :  { %4840 = vmatpush1.bf16.msra.mxu0 %v6348_v39  ;;  %v151_v59 = vld [vmem:[#allocation5 + $0xf8] sm:$0xff]  ;;  %v461_v62 = vld [vmem:[#allocation7 + $0x110] sm:$0xff]  ;;  %v6360_v1 = vpack.c.bf16 %v454_v58, %v451_v56  ;;  %v153_v4 = vld [vmem:[#allocation5 + $0x108] sm:$0xff] }
  0x68   :  { %4842 = vmatprep.subr.bf16.mxu0 %v6351_v44  ;;  %v458_v61 = vld [vmem:[#allocation7 + $0xf8] sm:$0xff]  ;;  %v4785_v2 = vpack.c.bf16 %v154_v60, %v151_v59  ;;  %v150_v3 = vld [vmem:[#allocation5 + $0xf0] sm:$0xff]  ;;  %v460_v7 = vld [vmem:[#allocation7 + $0x108] sm:$0xff] }
  0x69   :  { %4780 = vmatpush1.bf16.msra.mxu1 %v4779_v49  ;;  %v457_v5 = vld [vmem:[#allocation7 + $0xf0] sm:$0xff]  ;;  %v6363_v6 = vpack.c.bf16 %v461_v62, %v458_v61  ;;  %v157_v8 = vld [vmem:[#allocation5 + $0x128] sm:$0xff]  ;;  %v160_v10 = vld [vmem:[#allocation5 + $0x140] sm:$0xff]  ;;  %v4787_v14 = vpack.c.bf16 %v153_v4, %v150_v3 }
  0x6a   :  { %4782 = vmatprep.subr.bf16.mxu1 %v4781_v53  ;;  %v464_v11 = vld [vmem:[#allocation7 + $0x128] sm:$0xff]  ;;  %v467_v12 = vld [vmem:[#allocation7 + $0x140] sm:$0xff]  ;;  %v6366_v15 = vpack.c.bf16 %v460_v7, %v457_v5  ;;  %v4789_v16 = vpack.c.bf16 %v160_v10, %v157_v8  ;;  %v159_v18 = vld [vmem:[#allocation5 + $0x138] sm:$0xff] }
  0x6b   :  { %4844 = vmatpush1.bf16.msra.mxu0 %v6354_v52  ;;  %v156_v17 = vld [vmem:[#allocation5 + $0x120] sm:$0xff]  ;;  %v6369_v20 = vpack.c.bf16 %v467_v12, %v464_v11  ;;  %v466_v21 = vld [vmem:[#allocation7 + $0x138] sm:$0xff]  ;;  %v166_v24 = vld [vmem:[#allocation5 + $0x170] sm:$0xff] }
  0x6c   :  { %4846 = vmatprep.subr.bf16.mxu0 %v6357_v57  ;;  %v463_v19 = vld [vmem:[#allocation7 + $0x120] sm:$0xff]  ;;  %v163_v23 = vld [vmem:[#allocation5 + $0x158] sm:$0xff]  ;;  %v473_v27 = vld [vmem:[#allocation7 + $0x170] sm:$0xff]  ;;  %v4791_v28 = vpack.c.bf16 %v159_v18, %v156_v17 }
  0x6d   :  { %4784 = vmatpush1.bf16.msra.mxu1 %v4783_v63  ;;  %v470_v25 = vld [vmem:[#allocation7 + $0x158] sm:$0xff]  ;;  %v6372_v29 = vpack.c.bf16 %v466_v21, %v463_v19  ;;  %v4793_v30 = vpack.c.bf16 %v166_v24, %v163_v23  ;;  %v162_v31 = vld [vmem:[#allocation5 + $0x150] sm:$0xff]  ;;  %v165_v32 = vld [vmem:[#allocation5 + $0x168] sm:$0xff]  ;;  %v7347_v21 = vmov 0.0|0.0  }
  0x6e   :  { %4786 = vmatprep.subr.bf16.mxu1 %v4785_v2  ;;  %v469_v33 = vld [vmem:[#allocation7 + $0x150] sm:$0xff]  ;;  %v6375_v34 = vpack.c.bf16 %v473_v27, %v470_v25  ;;  %v472_v36 = vld [vmem:[#allocation7 + $0x168] sm:$0xff]  ;;  %v4795_v40 = vpack.c.bf16 %v165_v32, %v162_v31  ;;  %v128_v43 = vld [vmem:[#allocation5 + $0x40] sm:$0xff] }
  0x6f   :  { %4848 = vmatpush1.bf16.msra.mxu0 %v6360_v1  ;;  %v122_v37 = vld [vmem:[#allocation5 + $0x10] sm:$0xff]  ;;  %v125_v38 = vld [vmem:[#allocation5 + $0x28] sm:$0xff]  ;;  %v6378_v41 = vpack.c.bf16 %v472_v36, %v469_v33  ;;  %v131_v45 = vld [vmem:[#allocation5 + $0x58] sm:$0xff] }
  0x70   :  { %4850 = vmatprep.subr.bf16.mxu0 %v6363_v6  ;;  %v4797_v42 = vpack.c.bf16 %v125_v38, %v122_v37  ;;  %v6384_v46 = vld [vmem:[%s7330_s0] sm:$0xff]  ;;  %v4801_v47 = vpack.c.bf16 %v131_v45, %v128_v43  ;;  %v134_v48 = vld [vmem:[#allocation5 + $0x70] sm:$0xff]  ;;  %v137_v49 = vld [vmem:[#allocation5 + $0x88] sm:$0xff] }
  0x71   :  { %4788 = vmatpush1.bf16.msra.mxu1 %v4787_v14  ;;  %v6393_v50 = vld [vmem:[%s7330_s0 + $0x8] sm:$0xff]  ;;  %v4805_v51 = vpack.c.bf16 %v137_v49, %v134_v48  ;;  %v140_v53 = vld [vmem:[#allocation5 + $0xa0] sm:$0xff]  ;;  %v143_v54 = vld [vmem:[#allocation5 + $0xb8] sm:$0xff] }
  0x72   :  { %4790 = vmatprep.subr.bf16.mxu1 %v4789_v16  ;;  %v6404_v55 = vld [vmem:[%s7330_s0 + $0x10] sm:$0xff]  ;;  %v4809_v56 = vpack.c.bf16 %v143_v54, %v140_v53  ;;  %v149_v59 = vld [vmem:[#allocation5 + $0xe8] sm:$0xff]  ;;  %v115_v60 = vld [vmem:[%s7330_s0 + $0x18] sm:$0xff] }
  0x73   :  { %4852 = vmatpush1.bf16.msra.mxu0 %v6366_v15  ;;  %v146_v58 = vld [vmem:[#allocation5 + $0xd0] sm:$0xff]  ;;  %v152_v62 = vld [vmem:[#allocation5 + $0x100] sm:$0xff]  ;;  %v155_v63 = vld [vmem:[#allocation5 + $0x118] sm:$0xff] }
  0x74   :  { %4854 = vmatprep.subr.bf16.mxu0 %v6369_v20  ;;  %v4813_v61 = vpack.c.bf16 %v149_v59, %v146_v58  ;;  %v116_v2 = vld [vmem:[%s7330_s0 + $0x20] sm:$0xff]  ;;  %v4817_v3 = vpack.c.bf16 %v155_v63, %v152_v62  ;;  %v158_v4 = vld [vmem:[#allocation5 + $0x130] sm:$0xff]  ;;  %v161_v5 = vld [vmem:[#allocation5 + $0x148] sm:$0xff] }
  0x75   :  { %4792 = vmatpush1.bf16.msra.mxu1 %v4791_v28  ;;  %v117_v7 = vld [vmem:[%s7330_s0 + $0x28] sm:$0xff]  ;;  %v4821_v8 = vpack.c.bf16 %v161_v5, %v158_v4  ;;  %v164_v10 = vld [vmem:[#allocation5 + $0x160] sm:$0xff]  ;;  %v167_v11 = vld [vmem:[#allocation5 + $0x178] sm:$0xff] }
  0x76   :  { %4794 = vmatprep.subr.bf16.mxu1 %v4793_v30  ;;  %v118_v12 = vld [vmem:[%s7330_s0 + $0x30] sm:$0xff]  ;;  %v4825_v14 = vpack.c.bf16 %v167_v11, %v164_v10  ;;  %v119_v16 = vld [vmem:[%s7330_s0 + $0x38] sm:$0xff]  ;;  %v432_v18 = vld [vmem:[#allocation7 + $0x28] sm:$0xff] }
  0x77   :  { %4856 = vmatpush1.bf16.msra.mxu0 %v6372_v29  ;;  %v429_v17 = vld [vmem:[#allocation7 + $0x10] sm:$0xff]  ;;  %v435_v23 = vld [vmem:[#allocation7 + $0x40] sm:$0xff]  ;;  %v438_v24 = vld [vmem:[#allocation7 + $0x58] sm:$0xff] }
  0x78   :  { %4858 = vmatprep.subr.bf16.mxu0 %v6375_v34  ;;  %v6440_v19 = vpack.c.bf16 %v432_v18, %v429_v17  ;;  %v6447_v25 = vpack.c.bf16 %v438_v24, %v435_v23  ;;  %v441_v27 = vld [vmem:[#allocation7 + $0x70] sm:$0xff]  ;;  %v444_v28 = vld [vmem:[#allocation7 + $0x88] sm:$0xff]  ;;  %v447_v31 = vld [vmem:[#allocation7 + $0xa0] sm:$0xff] }
  0x79   :  { %4796 = vmatpush1.bf16.msra.mxu1 %v4795_v40  ;;  %v6452_v30 = vpack.c.bf16 %v444_v28, %v441_v27  ;;  %v450_v32 = vld [vmem:[#allocation7 + $0xb8] sm:$0xff]  ;;  %v453_v36 = vld [vmem:[#allocation7 + $0xd0] sm:$0xff]  ;;  %v456_v37 = vld [vmem:[#allocation7 + $0xe8] sm:$0xff] }
  0x7a   :  { %4798 = vmatprep.subr.bf16.mxu1 %v4797_v42  ;;  %v6456_v33 = vpack.c.bf16 %v450_v32, %v447_v31  ;;  %v6460_v38 = vpack.c.bf16 %v456_v37, %v453_v36  ;;  %v459_v40 = vld [vmem:[#allocation7 + $0x100] sm:$0xff]  ;;  %v465_v45 = vld [vmem:[#allocation7 + $0x130] sm:$0xff]  ;;  %v474_v49 = vld [vmem:[#allocation7 + $0x178] sm:$0xff] }
  0x7b   :  { %4860 = vmatpush1.bf16.msra.mxu0 %v6378_v41  ;;  %v471_v48 = vld [vmem:[#allocation7 + $0x160] sm:$0xff] }
  0x7c   :  { %4886 = vmatprep.subr.bf16.mxu0 %v6334_v9  ;;  %250 = vmatmul.mubr.f32.vlgmr.msra.gmra.mrb[0].mxu1 %v6384_v46 }
  0x7d   :  { %4800 = vmatpush3.bf16.msra.mxu1 %v4797_v42  ;;  %255 = vmatprep.mubr.f32.mxu1 %v7345_v0  ;;  %v462_v42 = vld [vmem:[#allocation7 + $0x118] sm:$0xff] }
  0x7e   :  { %545 = vmatmul.mubr.f32.vlgmr.msra.gmra.mrb[0].mxu0 %v7345_v0  ;;  %4802 = vmatprep.subr.bf16.mxu1 %v4801_v47  ;;  %v6466_v43 = vpack.c.bf16 %v462_v42, %v459_v40 }
  0x7f   :  { %4888 = vmatpush1.bf16.msra.mxu0 %v6336_v13  ;;  %718 = vmatprep.mubr.f32.mxu0 %v7345_v0 }
  0x80   :  { %256 = vmatmul.mubr.f32.gmra.mrb[2].mxu1 %v6393_v50  ;;  %4890 = vmatprep.subr.bf16.mxu0 %v6340_v22 }
  0x81   :  { %4804 = vmatpush3.bf16.msra.mxu1 %v4801_v47  ;;  %261 = vmatprep.mubr.f32.mxu1 %v7345_v0 }
  0x82   :  { %4806 = vmatprep.subr.bf16.mxu1 %v4805_v51 }
  0x83   :  { %4892 = vmatpush1.bf16.msra.mxu0 %v6342_v26 }
  0x84   :  { %262 = vmatmul.mubr.f32.gmra.mrb[4].mxu1 %v6404_v55  ;;  %4894 = vmatprep.subr.bf16.mxu0 %v6345_v35 }
  0x85   :  { %4808 = vmatpush3.bf16.msra.mxu1 %v4805_v51  ;;  %267 = vmatprep.mubr.f32.mxu1 %v7345_v0  ;;  %v170_v51 = vlaneseq }
  0x86   :  { %4810 = vmatprep.subr.bf16.mxu1 %v4809_v56 }
  0x87   :  { %4896 = vmatpush1.bf16.msra.mxu0 %v6348_v39  ;;  %v6498_v53 = vshrl.u32 %v170_v51, 7 }
  0x88   :  { %268 = vmatmul.mubr.f32.gmra.mrb[6].mxu1 %v115_v60  ;;  %4898 = vmatprep.subr.bf16.mxu0 %v6351_v44 }
  0x89   :  { %4812 = vmatpush3.bf16.msra.mxu1 %v4809_v56  ;;  %273 = vmatprep.mubr.f32.mxu1 %v7345_v0  ;;  %7351 = vst [vmem:[#allocation16_spill] sm:$0xff] %v6498_v53  ;;  %v7344_v54 = vsub.s32 0, %v6498_v53  ;;  %v7343_v56 = vsub.s32 1, %v6498_v53  ;;  %v7342_v51 = vsub.s32 2, %v6498_v53 }
  0x8a   :  { %4814 = vmatprep.subr.bf16.mxu1 %v4813_v61 }
  0x8b   :  { %4900 = vmatpush1.bf16.msra.mxu0 %v6354_v52 }
  0x8c   :  { %274 = vmatmul.mubr.f32.gmra.mrb[8].mxu1 %v116_v2  ;;  %4902 = vmatprep.subr.bf16.mxu0 %v6357_v57 }
  0x8d   :  { %4816 = vmatpush3.bf16.msra.mxu1 %v4813_v61  ;;  %279 = vmatprep.mubr.f32.mxu1 %v7345_v0 }
  0x8e   :  { %4818 = vmatprep.subr.bf16.mxu1 %v4817_v3 }
  0x8f   :  { %4904 = vmatpush1.bf16.msra.mxu0 %v6360_v1 }
  0x90   :  { %280 = vmatmul.mubr.f32.gmra.mrb[10].mxu1 %v117_v7  ;;  %4906 = vmatprep.subr.bf16.mxu0 %v6363_v6 }
  0x91   :  { %4820 = vmatpush3.bf16.msra.mxu1 %v4817_v3  ;;  %285 = vmatprep.mubr.f32.mxu1 %v7345_v0 }
  0x92   :  { %4822 = vmatprep.subr.bf16.mxu1 %v4821_v8 }
  0x93   :  { %4908 = vmatpush1.bf16.msra.mxu0 %v6366_v15 }
  0x94   :  { %286 = vmatmul.mubr.f32.gmra.mrb[12].mxu1 %v118_v12  ;;  %4910 = vmatprep.subr.bf16.mxu0 %v6369_v20 }
  0x95   :  { %4824 = vmatpush3.bf16.msra.mxu1 %v4821_v8  ;;  %291 = vmatprep.mubr.f32.mxu1 %v7345_v0 }
  0x96   :  { %4826 = vmatprep.subr.bf16.mxu1 %v4825_v14 }
  0x97   :  { %4912 = vmatpush1.bf16.msra.mxu0 %v6372_v29 }
  0x98   :  { %292 = vmatmul.mubr.f32.gmra.mrb[14].mxu1 %v119_v16  ;;  %4914 = vmatprep.subr.bf16.mxu0 %v6375_v34 }
  0x99   :  { %4828 = vmatpush3.bf16.msra.mxu1 %v4825_v14  ;;  %4105 = vmatprep.mubr.f32.mxu1 %v6384_v46  ;;  %v468_v46 = vld [vmem:[#allocation7 + $0x148] sm:$0xff] }
  0x9a   :  { %4861 = vmatprep.subr.bf16.mxu1 %v7347_v21  ;;  %v6470_v47 = vpack.c.bf16 %v468_v46, %v465_v45 }
  0x9b   :  { %4916 = vmatpush1.bf16.msra.mxu0 %v6378_v41 }
  0x9c   :  { %4106 = vmatmul.mubr.f32.vlgmr.msra.gmra.mrb[16].mxu1 %v6393_v50  ;;  %4942 = vmatprep.subr.bf16.mxu0 %v6334_v9  ;;  %v6474_v50 = vpack.c.bf16 %v474_v49, %v471_v48 }
  0x9d   :  { %4863 = vmatpush3.bf16.msra.mxu1 %v6440_v19  ;;  %4108 = vmatprep.mubr.f32.mxu1 %v6404_v55  ;;  %v168_v55 = vld [vmem:[%s7332_s2] sm:$0x7] }
  0x9e   :  { %4864 = vmatprep.subr.bf16.mxu1 %v7347_v21  ;;  %v173_v58 = vrot.slane %v168_v55, %v7344_v54  ;;  %v177_v59 = vrot.slane %v168_v55, %v7343_v56 }
  0xa0   :  { %4109 = vmatmul.mubr.f32.gmra.mrb[18].mxu1 %v115_v60 }
  0xa1   :  { %4866 = vmatpush3.bf16.msra.mxu1 %v6447_v25  ;;  %4111 = vmatprep.mubr.f32.mxu1 %v116_v2 }
  0xa2   :  { %4867 = vmatprep.subr.bf16.mxu1 %v7347_v21 }
  0xa4   :  { %4112 = vmatmul.mubr.f32.gmra.mrb[20].mxu1 %v117_v7 }
  0xa5   :  { %4869 = vmatpush3.bf16.msra.mxu1 %v6452_v30  ;;  %4114 = vmatprep.mubr.f32.mxu1 %v118_v12 }
  0xa6   :  { %4870 = vmatprep.subr.bf16.mxu1 %v7347_v21 }
  0xa8   :  { %4115 = vmatmul.mubr.f32.gmra.mrb[22].mxu1 %v119_v16 }
  0xa9   :  { %4872 = vmatpush3.bf16.msra.mxu1 %v6456_v33  ;;  %4149 = vmatprep.mubr.msk.f32.mxu1 %vm6185_vm0, %v7345_v0 }
  0xaa   :  { %4873 = vmatprep.subr.bf16.mxu1 %v7347_v21 }
  0xad   :  { %4875 = vmatpush3.bf16.msra.mxu1 %v6460_v38 }
  0xae   :  { %4876 = vmatprep.subr.bf16.mxu1 %v7347_v21 }
  0xb1   :  { %4878 = vmatpush3.bf16.msra.mxu1 %v6466_v43 }
  0xb2   :  { %4879 = vmatprep.subr.bf16.mxu1 %v7347_v21 }
  0xb5   :  { %4881 = vmatpush3.bf16.msra.mxu1 %v6470_v47 }
  0xb6   :  { %4882 = vmatprep.subr.bf16.mxu1 %v7347_v21 }
  0xb9   :  { %4884 = vmatpush3.bf16.msra.mxu1 %v6474_v50 }
  0xba   :  { %4917 = vmatprep.subr.bf16.mxu1 %v7347_v21 }
  0xbc   :  { %4150 = vmatmul.mubr.f32.vlgmr.msra.gmra.mrb[24].mxu1 %v7345_v0 }
  0xbd   :  { %4919 = vmatpush3.bf16.msra.mxu1 %v6440_v19  ;;  %4184 = vmatprep.mubr.msk.f32.mxu1 %vm6185_vm0, %v7345_v0 }
  0xbe   :  { %4920 = vmatprep.subr.bf16.mxu1 %v7347_v21 }
  0xc1   :  { %4922 = vmatpush3.bf16.msra.mxu1 %v6447_v25 }
  0xc2   :  { %4923 = vmatprep.subr.bf16.mxu1 %v7347_v21 }
  0xc5   :  { %4925 = vmatpush3.bf16.msra.mxu1 %v6452_v30 }
  0xc6   :  { %4926 = vmatprep.subr.bf16.mxu1 %v7347_v21 }
  0xc9   :  { %4928 = vmatpush3.bf16.msra.mxu1 %v6456_v33 }
  0xca   :  { %4929 = vmatprep.subr.bf16.mxu1 %v7347_v21 }
  0xcd   :  { %4931 = vmatpush3.bf16.msra.mxu1 %v6460_v38 }
  0xce   :  { %4932 = vmatprep.subr.bf16.mxu1 %v7347_v21 }
  0xd1   :  { %4934 = vmatpush3.bf16.msra.mxu1 %v6466_v43 }
  0xd2   :  { %4935 = vmatprep.subr.bf16.mxu1 %v7347_v21 }
  0xd5   :  { %4937 = vmatpush3.bf16.msra.mxu1 %v6470_v47 }
  0xd6   :  { %4938 = vmatprep.subr.bf16.mxu1 %v7347_v21 }
  0xd9   :  { %4940 = vmatpush3.bf16.msra.mxu1 %v6474_v50 }
  0xda   :  { %4973 = vmatprep.subr.bf16.mxu1 %v7347_v21 }
 0x14f   :  { %v251_v60 = vpop.f32.mrb[0].mxu1 }
 0x150   :  { %v252_v61 = vadd.f32 %v251_v60, %v173_v58  ;;  %v253_v62 = vpop.f32.mrb[1].mxu1 }
 0x151   :  { %v546_v63 = vpop.f32.mrb[0].mxu0  ;;  %v254_v2 = vadd.f32 %v253_v62, %v177_v59 }
 0x152   :  { %v548_v3 = vpop.f32.mrb[1].mxu0  ;;  %v621_v4 = vadd.f32 %v546_v63, %v252_v61 }
 0x153   :  { %v628_v5 = vadd.f32 %v548_v3, %v254_v2  ;;  %v257_v7 = vpop.f32.mrb[2].mxu1  ;;  %v181_v2 = vrot.slane %v168_v55, %v7342_v51 }
 0x154   :  { %v6509_v8 = vadd.f32 %v257_v7, %v173_v58  ;;  %v259_v10 = vpop.f32.mrb[3].mxu1 }
 0x155   :  { %v6511_v11 = vadd.f32 %v259_v10, %v177_v59 }
 0x157   :  { %v263_v12 = vpop.f32.mrb[4].mxu1 }
 0x158   :  { %v6513_v14 = vadd.f32 %v263_v12, %v173_v58  ;;  %v265_v16 = vpop.f32.mrb[5].mxu1 }
 0x159   :  { %v6515_v17 = vadd.f32 %v265_v16, %v177_v59  ;;  %v3694_v16 = vmul.f32 -1.442695, %v621_v4 }
 0x15b   :  { %v269_v18 = vpop.f32.mrb[6].mxu1  ;;  %5897 = vpow2.f32 %v3694_v16  ;;  %v6557_v16 = vld [vmem:[%s7334_s4] ss:$0 sm:$0xff] }
 0x15c   :  { %v6517_v23 = vadd.f32 %v269_v18, %v173_v58  ;;  %v271_v24 = vpop.f32.mrb[7].mxu1 }
 0x15d   :  { %v6519_v27 = vadd.f32 %v271_v24, %v177_v59 }
 0x15f   :  { %v275_v28 = vpop.f32.mrb[8].mxu1 }
 0x160   :  { %v6521_v31 = vadd.f32 %v275_v28, %v173_v58  ;;  %v277_v32 = vpop.f32.mrb[9].mxu1 }
 0x161   :  { %v6523_v36 = vadd.f32 %v277_v32, %v177_v59 }
 0x163   :  { %v281_v37 = vpop.f32.mrb[10].mxu1 }
 0x164   :  { %v6525_v40 = vadd.f32 %v281_v37, %v173_v58  ;;  %v283_v42 = vpop.f32.mrb[11].mxu1 }
 0x165   :  { %v6527_v45 = vadd.f32 %v283_v42, %v177_v59  ;;  %v5898_v4 = vpop.eup %5897 }
 0x167   :  { %v287_v46 = vpop.f32.mrb[12].mxu1 }
 0x168   :  { %v6529_v48 = vadd.f32 %v287_v46, %v173_v58  ;;  %v289_v49 = vpop.f32.mrb[13].mxu1 }
 0x169   :  { %v6532_v60 = vadd.f32 %v289_v49, %v177_v59 }
 0x16b   :  { %v293_v61 = vpop.f32.mrb[14].mxu1 }
 0x16c   :  { %v6534_v62 = vadd.f32 %v293_v61, %v173_v58  ;;  %v295_v63 = vpop.f32.mrb[15].mxu1  ;;  %v3695_v61 = vmul.f32 -1.442695, %v628_v5 }
 0x16d   :  { %v6538_v3 = vadd.f32 %v295_v63, %v177_v59 }
 0x16e   :  { %5899 = vpow2.f32 %v3695_v61 }
 0x16f   :  { %v4107_v7 = vpop.f32.mrb[16].mxu1 }
 0x170   :  { %v6540_v10 = vadd.f32 %v4107_v7, %v181_v2  ;;  %v364_v12 = vpop.f32.mrb[17].mxu1  ;;  %v625_v7 = vadd.f32 1.0, %v5898_v4 }
 0x171   :  { %v365_v5 = vadd.f32 %v364_v12, %v181_v2 }
 0x172   :  { %5901 = vrcp.f32 %v625_v7 }
 0x173   :  { %v4110_v18 = vpop.f32.mrb[18].mxu1 }
 0x174   :  { %v6542_v24 = vadd.f32 %v4110_v18, %v181_v2  ;;  %v374_v28 = vpop.f32.mrb[19].mxu1 }
 0x175   :  { %v6544_v32 = vadd.f32 %v374_v28, %v181_v2 }
 0x177   :  { %v4113_v58 = vpop.f32.mrb[20].mxu1 }
 0x178   :  { %v6546_v37 = vadd.f32 %v4113_v58, %v181_v2  ;;  %v384_v42 = vpop.f32.mrb[21].mxu1  ;;  %v5900_v18 = vpop.eup %5899 }
 0x179   :  { %v6548_v46 = vadd.f32 %v384_v42, %v181_v2  ;;  %v632_v28 = vadd.f32 1.0, %v5900_v18 }
 0x17b   :  { %v4116_v55 = vpop.f32.mrb[22].mxu1  ;;  %5903 = vrcp.f32 %v632_v28 }
 0x17c   :  { %v6550_v59 = vadd.f32 %v4116_v55, %v181_v2  ;;  %v394_v49 = vpop.f32.mrb[23].mxu1  ;;  %v5902_v51 = vpop.eup %5901 }
 0x17d   :  { %v6552_v63 = vadd.f32 %v394_v49, %v181_v2 }
 0x185   :  { %v5904_v61 = vpop.eup %5903 }
 0x186   :  { %v646_v4 = vsub.f32 1.0, %v5904_v61  ;;  %v645_v54 = vmul.f32 0.0, %v5904_v61 }
 0x18f   :  { %v617_v58 = vpop.f32.mrb[24].mxu1 }
 0x190   :  { %v641_v42 = vadd.f32 %v6557_v16, %v617_v58  ;;  %v4151_v55 = vpop.f32.mrb[25].mxu1 }
 0x192   :  { %v642_v49 = vmul.f32 %v5902_v51, %v641_v42  ;;  %v7352_v51 = vmov 0.0|0.0  }
 0x194   :  { %v643_v56 = vadd.f32 %v642_v49, %v365_v5 }
 0x196   :  { %5905 = vtanh.f32 %v643_v56  ;;  %v7353_v56 = vmov 0.0  }
 0x1a0   :  { %v5906_v7 = vpop.eup %5905 }
 0x1a1   :  { %v647_v0 = vmul.f32 %v5906_v7, %v646_v4 }
 0x1a3   :  { %v6560_v21 = vadd.f32 %v647_v0, %v645_v54 }
 0x1a5   :  { %719 = vmatmul.mubr.f32.vlgmr.msra.gmra.mrb[2].mxu0 %v6560_v21  ;;  %4185 = vmatmul.mubr.f32.vlgmr.msra.gmra.mrb[26].mxu1 %v6560_v21 }
 0x1a6   :  { %4944 = vmatpush1.bf16.msra.mxu0 %v6336_v13  ;;  %4975 = vmatpush3.bf16.msra.mxu1 %v6440_v19 }
 0x1a7   :  { %4946 = vmatprep.subr.bf16.mxu0 %v6340_v22  ;;  %4976 = vmatprep.subr.bf16.mxu1 %v7352_v51 }
 0x1a8   :  { %887 = vmatprep.mubr.f32.mxu0 %v7353_v56  ;;  %4219 = vmatprep.mubr.msk.f32.mxu1 %vm6185_vm0, %v7353_v56 }
 0x1aa   :  { %4948 = vmatpush1.bf16.msra.mxu0 %v6342_v26  ;;  %4978 = vmatpush3.bf16.msra.mxu1 %v6447_v25 }
 0x1ab   :  { %4950 = vmatprep.subr.bf16.mxu0 %v6345_v35  ;;  %4979 = vmatprep.subr.bf16.mxu1 %v7352_v51 }
 0x1ae   :  { %4952 = vmatpush1.bf16.msra.mxu0 %v6348_v39  ;;  %4981 = vmatpush3.bf16.msra.mxu1 %v6452_v30 }
 0x1af   :  { %4954 = vmatprep.subr.bf16.mxu0 %v6351_v44  ;;  %4982 = vmatprep.subr.bf16.mxu1 %v7352_v51 }
 0x1b2   :  { %4956 = vmatpush1.bf16.msra.mxu0 %v6354_v52  ;;  %4984 = vmatpush3.bf16.msra.mxu1 %v6456_v33 }
 0x1b3   :  { %4958 = vmatprep.subr.bf16.mxu0 %v6357_v57  ;;  %4985 = vmatprep.subr.bf16.mxu1 %v7352_v51 }
 0x1b6   :  { %4960 = vmatpush1.bf16.msra.mxu0 %v6360_v1  ;;  %4987 = vmatpush3.bf16.msra.mxu1 %v6460_v38 }
 0x1b7   :  { %4962 = vmatprep.subr.bf16.mxu0 %v6363_v6  ;;  %4988 = vmatprep.subr.bf16.mxu1 %v7352_v51 }
 0x1ba   :  { %4964 = vmatpush1.bf16.msra.mxu0 %v6366_v15  ;;  %4990 = vmatpush3.bf16.msra.mxu1 %v6466_v43 }
 0x1bb   :  { %4966 = vmatprep.subr.bf16.mxu0 %v6369_v20  ;;  %4991 = vmatprep.subr.bf16.mxu1 %v7352_v51 }
 0x1be   :  { %4968 = vmatpush1.bf16.msra.mxu0 %v6372_v29  ;;  %4993 = vmatpush3.bf16.msra.mxu1 %v6470_v47 }
 0x1bf   :  { %4970 = vmatprep.subr.bf16.mxu0 %v6375_v34  ;;  %4994 = vmatprep.subr.bf16.mxu1 %v7352_v51 }
 0x1c2   :  { %4972 = vmatpush1.bf16.msra.mxu0 %v6378_v41  ;;  %4996 = vmatpush3.bf16.msra.mxu1 %v6474_v50 }
 0x1c3   :  { %4998 = vmatprep.subr.bf16.mxu0 %v6334_v9  ;;  %5029 = vmatprep.subr.bf16.mxu1 %v7352_v51 }
 0x278   :  { %v720_v0 = vpop.f32.mrb[2].mxu0  ;;  %v791_v54 = vpop.f32.mrb[26].mxu1 }
 0x279   :  { %v795_v2 = vadd.f32 %v720_v0, %v6509_v8  ;;  %v722_v12 = vpop.f32.mrb[3].mxu0  ;;  %v4186_v18 = vpop.f32.mrb[27].mxu1  ;;  %v809_v4 = vadd.f32 %v6557_v16, %v791_v54 }
 0x27a   :  { %v802_v28 = vadd.f32 %v722_v12, %v6511_v11 }
 0x27b   :  { %v3697_v58 = vmul.f32 -1.442695, %v795_v2 }
 0x27c   :  { %v3698_v42 = vmul.f32 -1.442695, %v802_v28 }
 0x27d   :  { %5907 = vpow2.f32 %v3697_v58 }
 0x27e   :  { %5909 = vpow2.f32 %v3698_v42 }
 0x287   :  { %v5908_v55 = vpop.eup %5907 }
 0x288   :  { %v799_v5 = vadd.f32 1.0, %v5908_v55  ;;  %v5910_v49 = vpop.eup %5909 }
 0x289   :  { %v806_v61 = vadd.f32 1.0, %v5910_v49 }
 0x28a   :  { %5911 = vrcp.f32 %v799_v5 }
 0x28b   :  { %5913 = vrcp.f32 %v806_v61 }
 0x294   :  { %v5912_v7 = vpop.eup %5911 }
 0x295   :  { %v810_v53 = vmul.f32 %v5912_v7, %v809_v4  ;;  %v5914_v0 = vpop.eup %5913 }
 0x296   :  { %v814_v18 = vsub.f32 1.0, %v5914_v0  ;;  %v813_v2 = vmul.f32 %v5914_v0, %v6560_v21 }
 0x297   :  { %v811_v8 = vadd.f32 %v810_v53, %v6540_v10 }
 0x299   :  { %5915 = vtanh.f32 %v811_v8 }
 0x2a3   :  { %v5916_v11 = vpop.eup %5915 }
 0x2a4   :  { %v815_v12 = vmul.f32 %v5916_v11, %v814_v18 }
 0x2a6   :  { %v6604_v28 = vadd.f32 %v815_v12, %v813_v2 }
 0x2a8   :  { %888 = vmatmul.mubr.f32.vlgmr.msra.gmra.mrb[4].mxu0 %v6604_v28  ;;  %4220 = vmatmul.mubr.f32.vlgmr.msra.gmra.mrb[28].mxu1 %v6604_v28 }
 0x2a9   :  { %5000 = vmatpush1.bf16.msra.mxu0 %v6336_v13  ;;  %5031 = vmatpush3.bf16.msra.mxu1 %v6440_v19 }
 0x2aa   :  { %5002 = vmatprep.subr.bf16.mxu0 %v6340_v22  ;;  %5032 = vmatprep.subr.bf16.mxu1 %v7352_v51 }
 0x2ab   :  { %1056 = vmatprep.mubr.f32.mxu0 %v7353_v56  ;;  %4254 = vmatprep.mubr.msk.f32.mxu1 %vm6185_vm0, %v7353_v56 }
 0x2ad   :  { %5004 = vmatpush1.bf16.msra.mxu0 %v6342_v26  ;;  %5034 = vmatpush3.bf16.msra.mxu1 %v6447_v25 }
 0x2ae   :  { %5006 = vmatprep.subr.bf16.mxu0 %v6345_v35  ;;  %5035 = vmatprep.subr.bf16.mxu1 %v7352_v51 }
 0x2b1   :  { %5008 = vmatpush1.bf16.msra.mxu0 %v6348_v39  ;;  %5037 = vmatpush3.bf16.msra.mxu1 %v6452_v30 }
 0x2b2   :  { %5010 = vmatprep.subr.bf16.mxu0 %v6351_v44  ;;  %5038 = vmatprep.subr.bf16.mxu1 %v7352_v51 }
 0x2b5   :  { %5012 = vmatpush1.bf16.msra.mxu0 %v6354_v52  ;;  %5040 = vmatpush3.bf16.msra.mxu1 %v6456_v33 }
 0x2b6   :  { %5014 = vmatprep.subr.bf16.mxu0 %v6357_v57  ;;  %5041 = vmatprep.subr.bf16.mxu1 %v7352_v51 }
 0x2b9   :  { %5016 = vmatpush1.bf16.msra.mxu0 %v6360_v1  ;;  %5043 = vmatpush3.bf16.msra.mxu1 %v6460_v38 }
 0x2ba   :  { %5018 = vmatprep.subr.bf16.mxu0 %v6363_v6  ;;  %5044 = vmatprep.subr.bf16.mxu1 %v7352_v51 }
 0x2bd   :  { %5020 = vmatpush1.bf16.msra.mxu0 %v6366_v15  ;;  %5046 = vmatpush3.bf16.msra.mxu1 %v6466_v43 }
 0x2be   :  { %5022 = vmatprep.subr.bf16.mxu0 %v6369_v20  ;;  %5047 = vmatprep.subr.bf16.mxu1 %v7352_v51 }
 0x2c1   :  { %5024 = vmatpush1.bf16.msra.mxu0 %v6372_v29  ;;  %5049 = vmatpush3.bf16.msra.mxu1 %v6470_v47 }
 0x2c2   :  { %5026 = vmatprep.subr.bf16.mxu0 %v6375_v34  ;;  %5050 = vmatprep.subr.bf16.mxu1 %v7352_v51 }
 0x2c5   :  { %5028 = vmatpush1.bf16.msra.mxu0 %v6378_v41  ;;  %5052 = vmatpush3.bf16.msra.mxu1 %v6474_v50 }
 0x2c6   :  { %5054 = vmatprep.subr.bf16.mxu0 %v6334_v9  ;;  %5085 = vmatprep.subr.bf16.mxu1 %v7352_v51 }
 0x37b   :  { %v889_v53 = vpop.f32.mrb[4].mxu0  ;;  %v960_v10 = vpop.f32.mrb[28].mxu1 }
 0x37c   :  { %v964_v54 = vadd.f32 %v889_v53, %v6513_v14  ;;  %v891_v58 = vpop.f32.mrb[5].mxu0  ;;  %v4221_v42 = vpop.f32.mrb[29].mxu1  ;;  %v978_v0 = vadd.f32 %v6557_v16, %v960_v10 }
 0x37d   :  { %v971_v55 = vadd.f32 %v891_v58, %v6515_v17 }
 0x37e   :  { %v3699_v5 = vmul.f32 -1.442695, %v964_v54 }
 0x37f   :  { %v3700_v49 = vmul.f32 -1.442695, %v971_v55 }
 0x380   :  { %5917 = vpow2.f32 %v3699_v5 }
 0x381   :  { %5919 = vpow2.f32 %v3700_v49 }
 0x38a   :  { %v5918_v61 = vpop.eup %5917 }
 0x38b   :  { %v968_v4 = vadd.f32 1.0, %v5918_v61  ;;  %v5920_v7 = vpop.eup %5919 }
 0x38c   :  { %v975_v8 = vadd.f32 1.0, %v5920_v7 }
 0x38d   :  { %5921 = vrcp.f32 %v968_v4 }
 0x38e   :  { %5923 = vrcp.f32 %v975_v8 }
 0x397   :  { %v5922_v18 = vpop.eup %5921 }
 0x398   :  { %v979_v11 = vmul.f32 %v5922_v18, %v978_v0  ;;  %v5924_v2 = vpop.eup %5923 }
 0x399   :  { %v983_v12 = vsub.f32 1.0, %v5924_v2  ;;  %v982_v53 = vmul.f32 %v5924_v2, %v6604_v28 }
 0x39a   :  { %v980_v14 = vadd.f32 %v979_v11, %v6544_v32 }
 0x39c   :  { %5925 = vtanh.f32 %v980_v14 }
 0x3a6   :  { %v5926_v17 = vpop.eup %5925 }
 0x3a7   :  { %v984_v54 = vmul.f32 %v5926_v17, %v983_v12 }
 0x3a9   :  { %v6648_v58 = vadd.f32 %v984_v54, %v982_v53 }
 0x3ab   :  { %1057 = vmatmul.mubr.f32.vlgmr.msra.gmra.mrb[6].mxu0 %v6648_v58  ;;  %4255 = vmatmul.mubr.f32.vlgmr.msra.gmra.mrb[30].mxu1 %v6648_v58 }
 0x3ac   :  { %5056 = vmatpush1.bf16.msra.mxu0 %v6336_v13  ;;  %5087 = vmatpush3.bf16.msra.mxu1 %v6440_v19 }
 0x3ad   :  { %5058 = vmatprep.subr.bf16.mxu0 %v6340_v22  ;;  %5088 = vmatprep.subr.bf16.mxu1 %v7352_v51 }
 0x3ae   :  { %1225 = vmatprep.mubr.f32.mxu0 %v7353_v56  ;;  %4289 = vmatprep.mubr.msk.f32.mxu1 %vm6185_vm0, %v7353_v56 }
 0x3b0   :  { %5060 = vmatpush1.bf16.msra.mxu0 %v6342_v26  ;;  %5090 = vmatpush3.bf16.msra.mxu1 %v6447_v25 }
 0x3b1   :  { %5062 = vmatprep.subr.bf16.mxu0 %v6345_v35  ;;  %5091 = vmatprep.subr.bf16.mxu1 %v7352_v51 }
 0x3b4   :  { %5064 = vmatpush1.bf16.msra.mxu0 %v6348_v39  ;;  %5093 = vmatpush3.bf16.msra.mxu1 %v6452_v30 }
 0x3b5   :  { %5066 = vmatprep.subr.bf16.mxu0 %v6351_v44  ;;  %5094 = vmatprep.subr.bf16.mxu1 %v7352_v51 }
 0x3b8   :  { %5068 = vmatpush1.bf16.msra.mxu0 %v6354_v52  ;;  %5096 = vmatpush3.bf16.msra.mxu1 %v6456_v33 }
 0x3b9   :  { %5070 = vmatprep.subr.bf16.mxu0 %v6357_v57  ;;  %5097 = vmatprep.subr.bf16.mxu1 %v7352_v51 }
 0x3bc   :  { %5072 = vmatpush1.bf16.msra.mxu0 %v6360_v1  ;;  %5099 = vmatpush3.bf16.msra.mxu1 %v6460_v38 }
 0x3bd   :  { %5074 = vmatprep.subr.bf16.mxu0 %v6363_v6  ;;  %5100 = vmatprep.subr.bf16.mxu1 %v7352_v51 }
 0x3c0   :  { %5076 = vmatpush1.bf16.msra.mxu0 %v6366_v15  ;;  %5102 = vmatpush3.bf16.msra.mxu1 %v6466_v43 }
 0x3c1   :  { %5078 = vmatprep.subr.bf16.mxu0 %v6369_v20  ;;  %5103 = vmatprep.subr.bf16.mxu1 %v7352_v51 }
 0x3c4   :  { %5080 = vmatpush1.bf16.msra.mxu0 %v6372_v29  ;;  %5105 = vmatpush3.bf16.msra.mxu1 %v6470_v47 }
 0x3c5   :  { %5082 = vmatprep.subr.bf16.mxu0 %v6375_v34  ;;  %5106 = vmatprep.subr.bf16.mxu1 %v7352_v51 }
 0x3c8   :  { %5084 = vmatpush1.bf16.msra.mxu0 %v6378_v41  ;;  %5108 = vmatpush3.bf16.msra.mxu1 %v6474_v50 }
 0x3c9   :  { %5110 = vmatprep.subr.bf16.mxu0 %v6334_v9  ;;  %5141 = vmatprep.subr.bf16.mxu1 %v7352_v51 }
 0x47e   :  { %v1058_v32 = vpop.f32.mrb[6].mxu0  ;;  %v1129_v10 = vpop.f32.mrb[30].mxu1 }
 0x47f   :  { %v1133_v42 = vadd.f32 %v1058_v32, %v6517_v23  ;;  %v1060_v55 = vpop.f32.mrb[7].mxu0  ;;  %v4256_v5 = vpop.f32.mrb[31].mxu1  ;;  %v1147_v11 = vadd.f32 %v6557_v16, %v1129_v10 }
 0x480   :  { %v1140_v49 = vadd.f32 %v1060_v55, %v6519_v27 }
 0x481   :  { %v3701_v61 = vmul.f32 -1.442695, %v1133_v42 }
 0x482   :  { %v3702_v4 = vmul.f32 -1.442695, %v1140_v49 }
 0x483   :  { %5927 = vpow2.f32 %v3701_v61 }
 0x484   :  { %5929 = vpow2.f32 %v3702_v4 }
 0x48d   :  { %v5928_v7 = vpop.eup %5927 }
 0x48e   :  { %v1137_v8 = vadd.f32 1.0, %v5928_v7  ;;  %v5930_v0 = vpop.eup %5929 }
 0x48f   :  { %v1144_v18 = vadd.f32 1.0, %v5930_v0 }
 0x490   :  { %5931 = vrcp.f32 %v1137_v8 }
 0x491   :  { %5933 = vrcp.f32 %v1144_v18 }
 0x49a   :  { %v5932_v14 = vpop.eup %5931 }
 0x49b   :  { %v1148_v2 = vmul.f32 %v5932_v14, %v1147_v11  ;;  %v5934_v12 = vpop.eup %5933 }
 0x49c   :  { %v1152_v17 = vsub.f32 1.0, %v5934_v12  ;;  %v1151_v53 = vmul.f32 %v5934_v12, %v6648_v58 }
 0x49d   :  { %v1149_v23 = vadd.f32 %v1148_v2, %v6542_v24 }
 0x49f   :  { %5935 = vtanh.f32 %v1149_v23 }
 0x4a9   :  { %v5936_v27 = vpop.eup %5935 }
 0x4aa   :  { %v1153_v54 = vmul.f32 %v5936_v27, %v1152_v17 }
 0x4ac   :  { %v6692_v32 = vadd.f32 %v1153_v54, %v1151_v53 }
 0x4ae   :  { %1226 = vmatmul.mubr.f32.vlgmr.msra.gmra.mrb[8].mxu0 %v6692_v32  ;;  %4290 = vmatmul.mubr.f32.vlgmr.msra.gmra.mrb[32].mxu1 %v6692_v32 }
 0x4af   :  { %5112 = vmatpush1.bf16.msra.mxu0 %v6336_v13  ;;  %5143 = vmatpush3.bf16.msra.mxu1 %v6440_v19 }
 0x4b0   :  { %5114 = vmatprep.subr.bf16.mxu0 %v6340_v22  ;;  %5144 = vmatprep.subr.bf16.mxu1 %v7352_v51 }
 0x4b1   :  { %1394 = vmatprep.mubr.f32.mxu0 %v7353_v56  ;;  %4324 = vmatprep.mubr.msk.f32.mxu1 %vm6185_vm0, %v7353_v56 }
 0x4b3   :  { %5116 = vmatpush1.bf16.msra.mxu0 %v6342_v26  ;;  %5146 = vmatpush3.bf16.msra.mxu1 %v6447_v25 }
 0x4b4   :  { %5118 = vmatprep.subr.bf16.mxu0 %v6345_v35  ;;  %5147 = vmatprep.subr.bf16.mxu1 %v7352_v51 }
 0x4b7   :  { %5120 = vmatpush1.bf16.msra.mxu0 %v6348_v39  ;;  %5149 = vmatpush3.bf16.msra.mxu1 %v6452_v30 }
 0x4b8   :  { %5122 = vmatprep.subr.bf16.mxu0 %v6351_v44  ;;  %5150 = vmatprep.subr.bf16.mxu1 %v7352_v51 }
 0x4bb   :  { %5124 = vmatpush1.bf16.msra.mxu0 %v6354_v52  ;;  %5152 = vmatpush3.bf16.msra.mxu1 %v6456_v33 }
 0x4bc   :  { %5126 = vmatprep.subr.bf16.mxu0 %v6357_v57  ;;  %5153 = vmatprep.subr.bf16.mxu1 %v7352_v51 }
 0x4bf   :  { %5128 = vmatpush1.bf16.msra.mxu0 %v6360_v1  ;;  %5155 = vmatpush3.bf16.msra.mxu1 %v6460_v38 }
 0x4c0   :  { %5130 = vmatprep.subr.bf16.mxu0 %v6363_v6  ;;  %5156 = vmatprep.subr.bf16.mxu1 %v7352_v51 }
 0x4c3   :  { %5132 = vmatpush1.bf16.msra.mxu0 %v6366_v15  ;;  %5158 = vmatpush3.bf16.msra.mxu1 %v6466_v43 }
 0x4c4   :  { %5134 = vmatprep.subr.bf16.mxu0 %v6369_v20  ;;  %5159 = vmatprep.subr.bf16.mxu1 %v7352_v51 }
 0x4c7   :  { %5136 = vmatpush1.bf16.msra.mxu0 %v6372_v29  ;;  %5161 = vmatpush3.bf16.msra.mxu1 %v6470_v47 }
 0x4c8   :  { %5138 = vmatprep.subr.bf16.mxu0 %v6375_v34  ;;  %5162 = vmatprep.subr.bf16.mxu1 %v7352_v51 }
 0x4cb   :  { %5140 = vmatpush1.bf16.msra.mxu0 %v6378_v41  ;;  %5164 = vmatpush3.bf16.msra.mxu1 %v6474_v50 }
 0x4cc   :  { %5166 = vmatprep.subr.bf16.mxu0 %v6334_v9  ;;  %5197 = vmatprep.subr.bf16.mxu1 %v7352_v51 }
 0x581   :  { %v1227_v24 = vpop.f32.mrb[8].mxu0  ;;  %v1298_v10 = vpop.f32.mrb[32].mxu1 }
 0x582   :  { %v1302_v42 = vadd.f32 %v1227_v24, %v6521_v31  ;;  %v1229_v55 = vpop.f32.mrb[9].mxu0  ;;  %v4291_v5 = vpop.f32.mrb[33].mxu1  ;;  %v1316_v11 = vadd.f32 %v6557_v16, %v1298_v10 }
 0x583   :  { %v1309_v49 = vadd.f32 %v1229_v55, %v6523_v36 }
 0x584   :  { %v3703_v61 = vmul.f32 -1.442695, %v1302_v42 }
 0x585   :  { %v3704_v4 = vmul.f32 -1.442695, %v1309_v49 }
 0x586   :  { %5937 = vpow2.f32 %v3703_v61 }
 0x587   :  { %5939 = vpow2.f32 %v3704_v4 }
 0x590   :  { %v5938_v7 = vpop.eup %5937 }
 0x591   :  { %v1306_v8 = vadd.f32 1.0, %v5938_v7  ;;  %v5940_v0 = vpop.eup %5939 }
 0x592   :  { %v1313_v18 = vadd.f32 1.0, %v5940_v0 }
 0x593   :  { %5941 = vrcp.f32 %v1306_v8 }
 0x594   :  { %5943 = vrcp.f32 %v1313_v18 }
 0x59d   :  { %v5942_v14 = vpop.eup %5941 }
 0x59e   :  { %v1317_v2 = vmul.f32 %v5942_v14, %v1316_v11  ;;  %v5944_v23 = vpop.eup %5943 }
 0x59f   :  { %v1321_v12 = vsub.f32 1.0, %v5944_v23  ;;  %v1320_v17 = vmul.f32 %v5944_v23, %v6692_v32 }
 0x5a0   :  { %v1318_v31 = vadd.f32 %v1317_v2, %v6548_v46 }
 0x5a2   :  { %5945 = vtanh.f32 %v1318_v31 }
 0x5ac   :  { %v5946_v36 = vpop.eup %5945 }
 0x5ad   :  { %v1322_v27 = vmul.f32 %v5946_v36, %v1321_v12  ;;  %v1849_v36 = vld [vmem:[#allocation9 + $0x38] sm:$0xff] }
 0x5af   :  { %v6736_v53 = vadd.f32 %v1322_v27, %v1320_v17  ;;  %v1852_v17 = vld [vmem:[#allocation9 + $0x50] sm:$0xff] }
 0x5b1   :  { %1395 = vmatmul.mubr.f32.vlgmr.msra.gmra.mrb[10].mxu0 %v6736_v53  ;;  %4325 = vmatmul.mubr.f32.vlgmr.msra.gmra.mrb[34].mxu1 %v6736_v53 }
 0x5b2   :  { %5168 = vmatpush1.bf16.msra.mxu0 %v6336_v13  ;;  %5199 = vmatpush3.bf16.msra.mxu1 %v6440_v19 }
 0x5b3   :  { %5170 = vmatprep.subr.bf16.mxu0 %v6340_v22  ;;  %5200 = vmatprep.subr.bf16.mxu1 %v7352_v51 }
 0x5b4   :  { %1563 = vmatprep.mubr.f32.mxu0 %v7353_v56  ;;  %4359 = vmatprep.mubr.msk.f32.mxu1 %vm6185_vm0, %v7353_v56 }
 0x5b6   :  { %5172 = vmatpush1.bf16.msra.mxu0 %v6342_v26  ;;  %5202 = vmatpush3.bf16.msra.mxu1 %v6447_v25 }
 0x5b7   :  { %5174 = vmatprep.subr.bf16.mxu0 %v6345_v35  ;;  %5203 = vmatprep.subr.bf16.mxu1 %v7352_v51 }
 0x5ba   :  { %5176 = vmatpush1.bf16.msra.mxu0 %v6348_v39  ;;  %5205 = vmatpush3.bf16.msra.mxu1 %v6452_v30 }
 0x5bb   :  { %5178 = vmatprep.subr.bf16.mxu0 %v6351_v44  ;;  %5206 = vmatprep.subr.bf16.mxu1 %v7352_v51 }
 0x5be   :  { %5180 = vmatpush1.bf16.msra.mxu0 %v6354_v52  ;;  %5208 = vmatpush3.bf16.msra.mxu1 %v6456_v33 }
 0x5bf   :  { %5182 = vmatprep.subr.bf16.mxu0 %v6357_v57  ;;  %5209 = vmatprep.subr.bf16.mxu1 %v7352_v51 }
 0x5c2   :  { %5184 = vmatpush1.bf16.msra.mxu0 %v6360_v1  ;;  %5211 = vmatpush3.bf16.msra.mxu1 %v6460_v38 }
 0x5c3   :  { %5186 = vmatprep.subr.bf16.mxu0 %v6363_v6  ;;  %5212 = vmatprep.subr.bf16.mxu1 %v7352_v51 }
 0x5c6   :  { %5188 = vmatpush1.bf16.msra.mxu0 %v6366_v15  ;;  %5214 = vmatpush3.bf16.msra.mxu1 %v6466_v43 }
 0x5c7   :  { %5190 = vmatprep.subr.bf16.mxu0 %v6369_v20  ;;  %5215 = vmatprep.subr.bf16.mxu1 %v7352_v51 }
 0x5ca   :  { %5192 = vmatpush1.bf16.msra.mxu0 %v6372_v29  ;;  %5217 = vmatpush3.bf16.msra.mxu1 %v6470_v47 }
 0x5cb   :  { %5194 = vmatprep.subr.bf16.mxu0 %v6375_v34  ;;  %5218 = vmatprep.subr.bf16.mxu1 %v7352_v51 }
 0x5ce   :  { %5196 = vmatpush1.bf16.msra.mxu0 %v6378_v41  ;;  %5220 = vmatpush3.bf16.msra.mxu1 %v6474_v50 }
 0x5cf   :  { %5222 = vmatprep.subr.bf16.mxu0 %v6334_v9  ;;  %5253 = vmatprep.subr.bf16.mxu1 %v7352_v51 }
 0x684   :  { %v1396_v46 = vpop.f32.mrb[10].mxu0  ;;  %v1467_v54 = vpop.f32.mrb[34].mxu1 }
 0x685   :  { %v1471_v24 = vadd.f32 %v1396_v46, %v6525_v40  ;;  %v1398_v10 = vpop.f32.mrb[11].mxu0  ;;  %v4326_v42 = vpop.f32.mrb[35].mxu1  ;;  %v1485_v9 = vadd.f32 %v6557_v16, %v1467_v54  ;;  %v1850_v54 = vld [vmem:[#allocation9 + $0x40] sm:$0xff] }
 0x686   :  { %v1478_v55 = vadd.f32 %v1398_v10, %v6527_v45  ;;  %v5281_v42 = vpack.c.bf16 %v1852_v17, %v1849_v36 }
 0x687   :  { %v3705_v5 = vmul.f32 -1.442695, %v1471_v24  ;;  %v1853_v24 = vld [vmem:[#allocation9 + $0x58] sm:$0xff] }
 0x688   :  { %v3706_v49 = vmul.f32 -1.442695, %v1478_v55  ;;  %v1848_v55 = vld [vmem:[#allocation9 + $0x30] sm:$0xff] }
 0x689   :  { %5947 = vpow2.f32 %v3705_v5  ;;  %v1851_v5 = vld [vmem:[#allocation9 + $0x48] sm:$0xff] }
 0x68a   :  { %5949 = vpow2.f32 %v3706_v49  ;;  %v5313_v49 = vpack.c.bf16 %v1853_v24, %v1850_v54  ;;  %v1885_v54 = vld [vmem:[#allocation9 + $0x158] sm:$0xff]  ;;  %v1888_v24 = vld [vmem:[#allocation9 + $0x170] sm:$0xff] }
 0x693   :  { %v5948_v61 = vpop.eup %5947 }
 0x694   :  { %v1475_v4 = vadd.f32 1.0, %v5948_v61  ;;  %v5950_v7 = vpop.eup %5949  ;;  %v1858_v61 = vld [vmem:[#allocation9 + $0x80] sm:$0xff] }
 0x695   :  { %v1482_v8 = vadd.f32 1.0, %v5950_v7  ;;  %v1859_v7 = vld [vmem:[#allocation9 + $0x88] sm:$0xff] }
 0x696   :  { %5951 = vrcp.f32 %v1475_v4  ;;  %v1856_v4 = vld [vmem:[#allocation9 + $0x70] sm:$0xff] }
 0x697   :  { %5953 = vrcp.f32 %v1482_v8  ;;  %v5283_v8 = vpack.c.bf16 %v1851_v5, %v1848_v55  ;;  %v5305_v5 = vpack.c.bf16 %v1888_v24, %v1885_v54  ;;  %v2191_v54 = vld [vmem:[#allocation10 + $0x150] sm:$0xff]  ;;  %v2194_v24 = vld [vmem:[#allocation10 + $0x168] sm:$0xff] }
 0x6a0   :  { %v5952_v0 = vpop.eup %5951 }
 0x6a1   :  { %v1486_v18 = vmul.f32 %v5952_v0, %v1485_v9  ;;  %v5954_v11 = vpop.eup %5953  ;;  %v5317_v0 = vpack.c.bf16 %v1859_v7, %v1856_v4  ;;  %v2149_v7 = vld [vmem:[#allocation10] sm:$0xff] }
 0x6a2   :  { %v1490_v14 = vsub.f32 1.0, %v5954_v11  ;;  %v1489_v2 = vmul.f32 %v5954_v11, %v6736_v53  ;;  %v1861_v11 = vld [vmem:[#allocation9 + $0x98] sm:$0xff] }
 0x6a3   :  { %v1487_v40 = vadd.f32 %v1486_v18, %v6546_v37  ;;  %v1845_v37 = vld [vmem:[#allocation9 + $0x18] sm:$0xff]  ;;  %v1854_v18 = vld [vmem:[#allocation9 + $0x60] sm:$0xff] }
 0x6a5   :  { %5955 = vtanh.f32 %v1487_v40  ;;  %v1857_v40 = vld [vmem:[#allocation9 + $0x78] sm:$0xff] }
 0x6af   :  { %v5956_v45 = vpop.eup %5955 }
 0x6b0   :  { %v1491_v31 = vmul.f32 %v5956_v45, %v1490_v14  ;;  %v1864_v14 = vld [vmem:[#allocation9 + $0xb0] sm:$0xff]  ;;  %v1862_v45 = vld [vmem:[#allocation9 + $0xa0] sm:$0xff] }
 0x6b2   :  { %v6780_v23 = vadd.f32 %v1491_v31, %v1489_v2  ;;  %v1865_v2 = vld [vmem:[#allocation9 + $0xb8] sm:$0xff]  ;;  %v5287_v31 = vpack.c.bf16 %v1857_v40, %v1854_v18  ;;  %v2158_v18 = vld [vmem:[#allocation10 + $0x48] sm:$0xff] }
 0x6b4   :  { %1564 = vmatmul.mubr.f32.vlgmr.msra.gmra.mrb[12].mxu0 %v6780_v23  ;;  %4360 = vmatmul.mubr.f32.vlgmr.msra.gmra.mrb[36].mxu1 %v6780_v23 }
 0x6b5   :  { %5224 = vmatpush1.bf16.msra.mxu0 %v6336_v13  ;;  %5255 = vmatpush3.bf16.msra.mxu1 %v6440_v19  ;;  %v1843_v13 = vld [vmem:[#allocation9 + $0x8] sm:$0xff] }
 0x6b6   :  { %5226 = vmatprep.subr.bf16.mxu0 %v6340_v22  ;;  %5256 = vmatprep.subr.bf16.mxu1 %v7352_v51  ;;  %v1846_v22 = vld [vmem:[#allocation9 + $0x20] sm:$0xff] }
 0x6b7   :  { %1732 = vmatprep.mubr.f32.mxu0 %v7353_v56  ;;  %4394 = vmatprep.mubr.msk.f32.mxu1 %vm6185_vm0, %v7353_v56 }
 0x6b9   :  { %5228 = vmatpush1.bf16.msra.mxu0 %v6342_v26  ;;  %5258 = vmatpush3.bf16.msra.mxu1 %v6447_v25  ;;  %v1844_v26 = vld [vmem:[#allocation9 + $0x10] sm:$0xff] }
 0x6ba   :  { %5230 = vmatprep.subr.bf16.mxu0 %v6345_v35  ;;  %5259 = vmatprep.subr.bf16.mxu1 %v7352_v51  ;;  %v5277_v35 = vpack.c.bf16 %v1846_v22, %v1843_v13  ;;  %v5289_v13 = vpack.c.bf16 %v1864_v14, %v1861_v11  ;;  %v5321_v22 = vpack.c.bf16 %v1865_v2, %v1862_v45  ;;  %v2162_v11 = vld [vmem:[#allocation10 + $0x68] sm:$0xff]  ;;  %v2165_v14 = vld [vmem:[#allocation10 + $0x80] sm:$0xff] }
 0x6bb   :  { %v6861_v45 = vpack.c.bf16 %v2165_v14, %v2162_v11  ;;  %v2161_v2 = vld [vmem:[#allocation10 + $0x60] sm:$0xff]  ;;  %v2187_v11 = vld [vmem:[#allocation10 + $0x130] sm:$0xff]  ;;  %v2190_v14 = vld [vmem:[#allocation10 + $0x148] sm:$0xff] }
 0x6bd   :  { %5232 = vmatpush1.bf16.msra.mxu0 %v6348_v39  ;;  %5261 = vmatpush3.bf16.msra.mxu1 %v6452_v30  ;;  %v1847_v39 = vld [vmem:[#allocation9 + $0x28] sm:$0xff] }
 0x6be   :  { %5234 = vmatprep.subr.bf16.mxu0 %v6351_v44  ;;  %5262 = vmatprep.subr.bf16.mxu1 %v7352_v51  ;;  %v5309_v44 = vpack.c.bf16 %v1847_v39, %v1844_v26  ;;  %v1860_v26 = vld [vmem:[#allocation9 + $0x90] sm:$0xff]  ;;  %v1867_v39 = vld [vmem:[#allocation9 + $0xc8] sm:$0xff] }
 0x6c1   :  { %5236 = vmatpush1.bf16.msra.mxu0 %v6354_v52  ;;  %5264 = vmatpush3.bf16.msra.mxu1 %v6456_v33 }
 0x6c2   :  { %5238 = vmatprep.subr.bf16.mxu0 %v6357_v57  ;;  %5265 = vmatprep.subr.bf16.mxu1 %v7352_v51 }
 0x6c5   :  { %5240 = vmatpush1.bf16.msra.mxu0 %v6360_v1  ;;  %5267 = vmatpush3.bf16.msra.mxu1 %v6460_v38 }
 0x6c6   :  { %5242 = vmatprep.subr.bf16.mxu0 %v6363_v6  ;;  %5268 = vmatprep.subr.bf16.mxu1 %v7352_v51 }
 0x6c9   :  { %5244 = vmatpush1.bf16.msra.mxu0 %v6366_v15  ;;  %5270 = vmatpush3.bf16.msra.mxu1 %v6466_v43 }
 0x6ca   :  { %5246 = vmatprep.subr.bf16.mxu0 %v6369_v20  ;;  %5271 = vmatprep.subr.bf16.mxu1 %v7352_v51 }
 0x6cd   :  { %5248 = vmatpush1.bf16.msra.mxu0 %v6372_v29  ;;  %5273 = vmatpush3.bf16.msra.mxu1 %v6470_v47 }
 0x6ce   :  { %5250 = vmatprep.subr.bf16.mxu0 %v6375_v34  ;;  %5274 = vmatprep.subr.bf16.mxu1 %v7352_v51 }
 0x6d1   :  { %5252 = vmatpush1.bf16.msra.mxu0 %v6378_v41  ;;  %5276 = vmatpush3.bf16.msra.mxu1 %v6474_v50 }
 0x6d2   :  { %5278 = vmatprep.subr.bf16.mxu0 %v5277_v35  ;;  %5310 = vmatprep.subr.bf16.mxu1 %v5309_v44  ;;  %v1863_v35 = vld [vmem:[#allocation9 + $0xa8] sm:$0xff] }
 0x787   :  { %v1565_v52 = vpop.f32.mrb[12].mxu0  ;;  %v1636_v57 = vpop.f32.mrb[36].mxu1 }
 0x788   :  { %v1640_v1 = vadd.f32 %v1565_v52, %v6529_v48  ;;  %v1567_v6 = vpop.f32.mrb[13].mxu0  ;;  %v4361_v15 = vpop.f32.mrb[37].mxu1  ;;  %v1654_v33 = vadd.f32 %v6557_v16, %v1636_v57  ;;  %v1868_v52 = vld [vmem:[#allocation9 + $0xd0] sm:$0xff]  ;;  %v1871_v57 = vld [vmem:[#allocation9 + $0xe8] sm:$0xff] }
 0x789   :  { %v1647_v20 = vadd.f32 %v1567_v6, %v6532_v60  ;;  %v1842_v60 = vld [vmem:[#allocation9] sm:$0xff]  ;;  %v5325_v15 = vpack.c.bf16 %v1871_v57, %v1868_v52  ;;  %v2174_v57 = vld [vmem:[#allocation10 + $0xc8] sm:$0xff] }
 0x78a   :  { %v3707_v29 = vmul.f32 -1.442695, %v1640_v1  ;;  %v5279_v10 = vpack.c.bf16 %v1845_v37, %v1842_v60  ;;  %v5291_v1 = vpack.c.bf16 %v1863_v35, %v1860_v26  ;;  %v1880_v60 = vld [vmem:[#allocation9 + $0x130] sm:$0xff]  ;;  %v1883_v37 = vld [vmem:[#allocation9 + $0x148] sm:$0xff] }
 0x78b   :  { %v3708_v34 = vmul.f32 -1.442695, %v1647_v20  ;;  %v1866_v20 = vld [vmem:[#allocation9 + $0xc0] sm:$0xff]  ;;  %v5333_v17 = vpack.c.bf16 %v1883_v37, %v1880_v60  ;;  %v2171_v26 = vld [vmem:[#allocation10 + $0xb0] sm:$0xff]  ;;  %v2154_v37 = vld [vmem:[#allocation10 + $0x28] sm:$0xff] }
 0x78c   :  { %5957 = vpow2.f32 %v3707_v29  ;;  %v1869_v29 = vld [vmem:[#allocation9 + $0xd8] sm:$0xff]  ;;  %v2151_v60 = vld [vmem:[#allocation10 + $0x10] sm:$0xff] }
 0x78d   :  { %5959 = vpow2.f32 %v3708_v34  ;;  %v1873_v34 = vld [vmem:[#allocation9 + $0xf8] sm:$0xff] }
 0x796   :  { %v5958_v41 = vpop.eup %5957 }
 0x797   :  { %v1644_v19 = vadd.f32 1.0, %v5958_v41  ;;  %v5960_v25 = vpop.eup %5959  ;;  %v1876_v41 = vld [vmem:[#allocation9 + $0x110] sm:$0xff] }
 0x798   :  { %v1651_v30 = vadd.f32 1.0, %v5960_v25  ;;  %v1877_v25 = vld [vmem:[#allocation9 + $0x118] sm:$0xff] }
 0x799   :  { %5961 = vrcp.f32 %v1644_v19  ;;  %v1874_v19 = vld [vmem:[#allocation9 + $0x100] sm:$0xff] }
 0x79a   :  { %5963 = vrcp.f32 %v1651_v30  ;;  %v5295_v30 = vpack.c.bf16 %v1869_v29, %v1866_v20  ;;  %v2176_v20 = vld [vmem:[#allocation10 + $0xd8] sm:$0xff] }
 0x7a3   :  { %v5962_v38 = vpop.eup %5961 }
 0x7a4   :  { %v1655_v43 = vmul.f32 %v5962_v38, %v1654_v33  ;;  %v5964_v50 = vpop.eup %5963  ;;  %v5297_v33 = vpack.c.bf16 %v1876_v41, %v1873_v34  ;;  %v5329_v38 = vpack.c.bf16 %v1877_v25, %v1874_v19  ;;  %v2180_v34 = vld [vmem:[#allocation10 + $0xf8] sm:$0xff]  ;;  %v2183_v41 = vld [vmem:[#allocation10 + $0x110] sm:$0xff] }
 0x7a5   :  { %v1659_v48 = vsub.f32 1.0, %v5964_v50  ;;  %v1658_v27 = vmul.f32 %v5964_v50, %v6780_v23  ;;  %v1879_v50 = vld [vmem:[#allocation9 + $0x128] sm:$0xff]  ;;  %v6879_v19 = vpack.c.bf16 %v2183_v41, %v2180_v34  ;;  %v2179_v25 = vld [vmem:[#allocation10 + $0xf0] sm:$0xff] }
 0x7a6   :  { %v1656_v47 = vadd.f32 %v1655_v43, %v6552_v63  ;;  %v1855_v63 = vld [vmem:[#allocation9 + $0x68] sm:$0xff]  ;;  %v1872_v43 = vld [vmem:[#allocation9 + $0xf0] sm:$0xff] }
 0x7a7   :  { %v5285_v9 = vpack.c.bf16 %v1858_v61, %v1855_v63  ;;  %v1887_v61 = vld [vmem:[#allocation9 + $0x168] sm:$0xff] }
 0x7a8   :  { %5965 = vtanh.f32 %v1656_v47  ;;  %v1875_v47 = vld [vmem:[#allocation9 + $0x108] sm:$0xff] }
 0x7b2   :  { %v5966_v12 = vpop.eup %5965 }
 0x7b3   :  { %v1660_v46 = vmul.f32 %v5966_v12, %v1659_v48  ;;  %v1882_v48 = vld [vmem:[#allocation9 + $0x140] sm:$0xff]  ;;  %v5299_v12 = vpack.c.bf16 %v1875_v47, %v1872_v43 }
 0x7b4   :  { %v5301_v36 = vpack.c.bf16 %v1882_v48, %v1879_v50  ;;  %v2189_v43 = vld [vmem:[#allocation10 + $0x140] sm:$0xff]  ;;  %v2188_v48 = vld [vmem:[#allocation10 + $0x138] sm:$0xff] }
 0x7b5   :  { %v6822_v16 = vadd.f32 %v1660_v46, %v1658_v27  ;;  %v1878_v27 = vld [vmem:[#allocation9 + $0x120] sm:$0xff]  ;;  %v1881_v46 = vld [vmem:[#allocation9 + $0x138] sm:$0xff] }
 0x7b6   :  { %v5303_v55 = vpack.c.bf16 %v1881_v46, %v1878_v27  ;;  %v2185_v47 = vld [vmem:[#allocation10 + $0x120] sm:$0xff]  ;;  %v2195_v27 = vld [vmem:[#allocation10 + $0x170] sm:$0xff] }
 0x7b7   :  { %1733 = vmatmul.mubr.f32.vlgmr.msra.gmra.mrb[14].mxu0 %v6822_v16  ;;  %4395 = vmatmul.mubr.f32.vlgmr.msra.gmra.mrb[38].mxu1 %v6822_v16 }
 0x7b8   :  { %5280 = vmatpush1.bf16.msra.mxu0 %v5279_v10  ;;  %5312 = vmatpush3.bf16.msra.mxu1 %v5309_v44  ;;  %v1870_v44 = vld [vmem:[#allocation9 + $0xe0] sm:$0xff] }
 0x7b9   :  { %4429 = vmatprep.mubr.f32.mxu1 %v6560_v21  ;;  %5282 = vmatprep.subr.bf16.mxu0 %v5281_v42  ;;  %v5293_v6 = vpack.c.bf16 %v1870_v44, %v1867_v39  ;;  %v1886_v10 = vld [vmem:[#allocation9 + $0x160] sm:$0xff]  ;;  %v1889_v42 = vld [vmem:[#allocation9 + $0x178] sm:$0xff]  ;;  %v2167_v39 = vld [vmem:[#allocation10 + $0x90] sm:$0xff] }
 0x7ba   :  { %5314 = vmatprep.subr.bf16.mxu1 %v5313_v49  ;;  %1971 = vmatprep.mubr.f32.mxu0 %v7353_v56  ;;  %v5337_v63 = vpack.c.bf16 %v1889_v42, %v1886_v10  ;;  %v2170_v44 = vld [vmem:[#allocation10 + $0xa8] sm:$0xff]  ;;  %v6898_v10 = vpack.c.bf16 %v2194_v24, %v2191_v54  ;;  %v2157_v42 = vld [vmem:[#allocation10 + $0x40] sm:$0xff] }
 0x7bb   :  { %v6869_v52 = vpack.c.bf16 %v2170_v44, %v2167_v39 }
 0x7bc   :  { %5284 = vmatpush1.bf16.msra.mxu0 %v5283_v8  ;;  %5316 = vmatpush3.bf16.msra.mxu1 %v5313_v49  ;;  %v1884_v49 = vld [vmem:[#allocation9 + $0x150] sm:$0xff] }
 0x7bd   :  { %5286 = vmatprep.subr.bf16.mxu0 %v5285_v9  ;;  %5318 = vmatprep.subr.bf16.mxu1 %v5317_v0  ;;  %v5307_v4 = vpack.c.bf16 %v1887_v61, %v1884_v49  ;;  %v2166_v49 = vld [vmem:[#allocation10 + $0x88] sm:$0xff]  ;;  %v2169_v61 = vld [vmem:[#allocation10 + $0xa0] sm:$0xff] }
 0x7c0   :  { %5288 = vmatpush1.bf16.msra.mxu0 %v5287_v31  ;;  %5320 = vmatpush3.bf16.msra.mxu1 %v5317_v0  ;;  %v2155_v0 = vld [vmem:[#allocation10 + $0x30] sm:$0xff]  ;;  %v2164_v31 = vld [vmem:[#allocation10 + $0x78] sm:$0xff] }
 0x7c1   :  { %5290 = vmatprep.subr.bf16.mxu0 %v5289_v13  ;;  %5322 = vmatprep.subr.bf16.mxu1 %v5321_v22  ;;  %v6857_v40 = vpack.c.bf16 %v2158_v18, %v2155_v0  ;;  %v6863_v13 = vpack.c.bf16 %v2164_v31, %v2161_v2  ;;  %v2184_v0 = vld [vmem:[#allocation10 + $0x118] sm:$0xff]  ;;  %v6921_v2 = vpack.c.bf16 %v2190_v14, %v2187_v11  ;;  %v2193_v31 = vld [vmem:[#allocation10 + $0x160] sm:$0xff] }
 0x7c4   :  { %5292 = vmatpush1.bf16.msra.mxu0 %v5291_v1  ;;  %5324 = vmatpush3.bf16.msra.mxu1 %v5321_v22  ;;  %v2168_v22 = vld [vmem:[#allocation10 + $0x98] sm:$0xff]  ;;  %v2177_v1 = vld [vmem:[#allocation10 + $0xe0] sm:$0xff] }
 0x7c5   :  { %5294 = vmatprep.subr.bf16.mxu0 %v5293_v6  ;;  %5326 = vmatprep.subr.bf16.mxu1 %v5325_v15  ;;  %v6867_v35 = vpack.c.bf16 %v2171_v26, %v2168_v22  ;;  %v6873_v6 = vpack.c.bf16 %v2177_v1, %v2174_v57  ;;  %v2196_v22 = vld [vmem:[#allocation10 + $0x178] sm:$0xff] }
 0x7c6   :  { %v6925_v26 = vpack.c.bf16 %v2196_v22, %v2193_v31 }
 0x7c8   :  { %5296 = vmatpush1.bf16.msra.mxu0 %v5295_v30  ;;  %5328 = vmatpush3.bf16.msra.mxu1 %v5325_v15  ;;  %v2173_v15 = vld [vmem:[#allocation10 + $0xc0] sm:$0xff]  ;;  %v2182_v30 = vld [vmem:[#allocation10 + $0x108] sm:$0xff] }
 0x7c9   :  { %5298 = vmatprep.subr.bf16.mxu0 %v5297_v33  ;;  %5330 = vmatprep.subr.bf16.mxu1 %v5329_v38  ;;  %v6875_v29 = vpack.c.bf16 %v2176_v20, %v2173_v15  ;;  %v6881_v33 = vpack.c.bf16 %v2182_v30, %v2179_v25 }
 0x7cc   :  { %5300 = vmatpush1.bf16.msra.mxu0 %v5299_v12  ;;  %5332 = vmatpush3.bf16.msra.mxu1 %v5329_v38  ;;  %v2186_v38 = vld [vmem:[#allocation10 + $0x128] sm:$0xff]  ;;  %v6887_v12 = vpack.c.bf16 %v2188_v48, %v2185_v47  ;;  %v6057_v47 = vld [vmem:[%s7334_s4] ss:$0 sm:$0xff] }
 0x7cd   :  { %5302 = vmatprep.subr.bf16.mxu0 %v5301_v36  ;;  %5334 = vmatprep.subr.bf16.mxu1 %v5333_v17  ;;  %v6885_v50 = vpack.c.bf16 %v2189_v43, %v2186_v38  ;;  %v6889_v36 = vpack.c.bf16 %v2154_v37, %v2151_v60 }
 0x7d0   :  { %5304 = vmatpush1.bf16.msra.mxu0 %v5303_v55  ;;  %5336 = vmatpush3.bf16.msra.mxu1 %v5333_v17  ;;  %v2192_v17 = vld [vmem:[#allocation10 + $0x158] sm:$0xff] }
 0x7d1   :  { %5306 = vmatprep.subr.bf16.mxu0 %v5305_v5  ;;  %5338 = vmatprep.subr.bf16.mxu1 %v5337_v63  ;;  %v6892_v46 = vpack.c.bf16 %v2195_v27, %v2192_v17  ;;  %v2160_v55 = vld [vmem:[#allocation10 + $0x58] sm:$0xff] }
 0x7d2   :  { %v6900_v5 = vpack.c.bf16 %v2160_v55, %v2157_v42 }
 0x7d4   :  { %5308 = vmatpush1.bf16.msra.mxu0 %v5307_v4  ;;  %5340 = vmatpush3.bf16.msra.mxu1 %v5337_v63  ;;  %v2163_v63 = vld [vmem:[#allocation10 + $0x70] sm:$0xff] }
 0x7d5   :  { %5373 = vmatprep.subr.bf16.mxu1 %v7352_v51  ;;  %v6906_v4 = vpack.c.bf16 %v2166_v49, %v2163_v63 }
 0x7d7   :  { %1972 = vmatmul.mubr.f32.vlgmr.msra.gmra.mrb[16].mxu0 %v6560_v21  ;;  %4430 = vmatmul.mubr.f32.vlgmr.msra.gmra.mrb[40].mxu1 %v6604_v28  ;;  %v2150_v21 = vld [vmem:[#allocation10 + $0x8] sm:$0xff] }
 0x7d8   :  { %4432 = vmatprep.mubr.f32.mxu1 %v6648_v58  ;;  %1977 = vmatprep.mubr.f32.mxu0 %v7353_v56 }
 0x7d9   :  { %5375 = vmatpush3.bf16.msra.mxu1 %v6889_v36 }
 0x7da   :  { %5376 = vmatprep.subr.bf16.mxu1 %v7352_v51 }
 0x7db   :  { %1978 = vmatmul.mubr.f32.gmra.mrb[18].mxu0 %v6604_v28  ;;  %4433 = vmatmul.mubr.f32.gmra.mrb[42].mxu1 %v6692_v32  ;;  %v2153_v28 = vld [vmem:[#allocation10 + $0x20] sm:$0xff] }
 0x7dc   :  { %4435 = vmatprep.mubr.f32.mxu1 %v6736_v53  ;;  %1983 = vmatprep.mubr.f32.mxu0 %v7353_v56 }
 0x7dd   :  { %5378 = vmatpush3.bf16.msra.mxu1 %v6900_v5 }
 0x7de   :  { %5379 = vmatprep.subr.bf16.mxu1 %v7352_v51 }
 0x7df   :  { %1984 = vmatmul.mubr.f32.gmra.mrb[20].mxu0 %v6648_v58  ;;  %4436 = vmatmul.mubr.f32.gmra.mrb[44].mxu1 %v6780_v23  ;;  %v6849_v58 = vpack.c.bf16 %v2153_v28, %v2150_v21  ;;  %v2172_v21 = vld [vmem:[#allocation10 + $0xb8] sm:$0xff] }
 0x7e0   :  { %4438 = vmatprep.mubr.f32.mxu1 %v6822_v16  ;;  %1989 = vmatprep.mubr.f32.mxu0 %v7353_v56  ;;  %v6909_v28 = vpack.c.bf16 %v2172_v21, %v2169_v61 }
 0x7e1   :  { %5342 = vmatprep.subr.bf16.mxu0 %v6849_v58  ;;  %5381 = vmatpush3.bf16.msra.mxu1 %v6906_v4 }
 0x7e2   :  { %5382 = vmatprep.subr.bf16.mxu1 %v7352_v51 }
 0x7e3   :  { %1990 = vmatmul.mubr.f32.gmra.mrb[22].mxu0 %v6692_v32  ;;  %v2152_v32 = vld [vmem:[#allocation10 + $0x18] sm:$0xff] }
 0x7e4   :  { %1995 = vmatprep.mubr.f32.mxu0 %v7353_v56  ;;  %v6851_v8 = vpack.c.bf16 %v2152_v32, %v2149_v7  ;;  %v2175_v7 = vld [vmem:[#allocation10 + $0xd0] sm:$0xff]  ;;  %v2178_v32 = vld [vmem:[#allocation10 + $0xe8] sm:$0xff] }
 0x7e5   :  { %5384 = vmatpush3.bf16.msra.mxu1 %v6909_v28 }
 0x7e6   :  { %5344 = vmatpush1.bf16.msra.mxu0 %v6851_v8  ;;  %5385 = vmatprep.subr.bf16.mxu1 %v7352_v51 }
 0x7e7   :  { %1996 = vmatmul.mubr.f32.gmra.mrb[24].mxu0 %v6736_v53  ;;  %v2156_v53 = vld [vmem:[#allocation10 + $0x38] sm:$0xff] }
 0x7e8   :  { %2001 = vmatprep.mubr.f32.mxu0 %v7353_v56 }
 0x7eb   :  { %2002 = vmatmul.mubr.f32.gmra.mrb[26].mxu0 %v6780_v23  ;;  %v2159_v23 = vld [vmem:[#allocation10 + $0x50] sm:$0xff] }
 0x7ec   :  { %2007 = vmatprep.mubr.f32.mxu0 %v7353_v56  ;;  %v6855_v9 = vpack.c.bf16 %v2159_v23, %v2156_v53  ;;  %v6913_v53 = vpack.c.bf16 %v2178_v32, %v2175_v7  ;;  %v2181_v23 = vld [vmem:[#allocation10 + $0x100] sm:$0xff] }
 0x7ed   :  { %v6917_v18 = vpack.c.bf16 %v2184_v0, %v2181_v23  ;;  %v7354_v23 = vld [vmem:[#allocation16_spill] sm:$0xff] }
 0x7ee   :  { %5346 = vmatprep.subr.bf16.mxu0 %v6855_v9  ;;  %5387 = vmatpush3.bf16.msra.mxu1 %v6913_v53  ;;  %v7355_v0 = vsub.s32 0, %v7354_v23  ;;  %v7356_v31 = vsub.s32 1, %v7354_v23 }
 0x7ef   :  { %2008 = vmatmul.mubr.f32.gmra.mrb[28].mxu0 %v6822_v16  ;;  %5388 = vmatprep.subr.bf16.mxu1 %v7352_v51 }
 0x7f0   :  { %2013 = vmatprep.mubr.f32.mxu0 %v7353_v56  ;;  %5348 = vmatpush1.bf16.msra.mxu0 %v6857_v40 }
 0x7f1   :  { %5350 = vmatprep.subr.bf16.mxu0 %v6861_v45 }
 0x7f2   :  { %5390 = vmatpush3.bf16.msra.mxu1 %v6917_v18 }
 0x7f3   :  { %5391 = vmatprep.subr.bf16.mxu1 %v7352_v51 }
 0x7f4   :  { %5352 = vmatpush1.bf16.msra.mxu0 %v6863_v13 }
 0x7f5   :  { %5354 = vmatprep.subr.bf16.mxu0 %v6867_v35 }
 0x7f6   :  { %5393 = vmatpush3.bf16.msra.mxu1 %v6921_v2 }
 0x7f7   :  { %5394 = vmatprep.subr.bf16.mxu1 %v7352_v51 }
 0x7f8   :  { %5356 = vmatpush1.bf16.msra.mxu0 %v6869_v52 }
 0x7f9   :  { %5358 = vmatprep.subr.bf16.mxu0 %v6873_v6 }
 0x7fa   :  { %5396 = vmatpush3.bf16.msra.mxu1 %v6925_v26 }
 0x7fb   :  { %5429 = vmatprep.subr.bf16.mxu1 %v7352_v51 }
 0x7fc   :  { %5360 = vmatpush1.bf16.msra.mxu0 %v6875_v29 }
 0x7fd   :  { %5362 = vmatprep.subr.bf16.mxu0 %v6879_v19 }
 0x800   :  { %5364 = vmatpush1.bf16.msra.mxu0 %v6881_v33 }
 0x801   :  { %5366 = vmatprep.subr.bf16.mxu0 %v6885_v50 }
 0x804   :  { %5368 = vmatpush1.bf16.msra.mxu0 %v6887_v12 }
 0x805   :  { %5370 = vmatprep.subr.bf16.mxu0 %v6892_v46 }
 0x808   :  { %5372 = vmatpush1.bf16.msra.mxu0 %v6898_v10 }
 0x809   :  { %5398 = vmatprep.subr.bf16.mxu0 %v6849_v58 }
 0x88a   :  { %v1734_v39 = vpop.f32.mrb[14].mxu0  ;;  %v1805_v44 = vpop.f32.mrb[38].mxu1 }
 0x88b   :  { %v1809_v57 = vadd.f32 %v1734_v39, %v6534_v62  ;;  %v1736_v1 = vpop.f32.mrb[15].mxu0  ;;  %v4396_v15 = vpop.f32.mrb[39].mxu1  ;;  %v1823_v48 = vadd.f32 %v6057_v47, %v1805_v44 }
 0x88c   :  { %v1816_v20 = vadd.f32 %v1736_v1, %v6538_v3 }
 0x88d   :  { %v3709_v34 = vmul.f32 -1.442695, %v1809_v57 }
 0x88e   :  { %v3710_v41 = vmul.f32 -1.442695, %v1816_v20 }
 0x88f   :  { %5967 = vpow2.f32 %v3709_v34 }
 0x890   :  { %5969 = vpow2.f32 %v3710_v41 }
 0x899   :  { %v5968_v25 = vpop.eup %5967 }
 0x89a   :  { %v1813_v30 = vadd.f32 1.0, %v5968_v25  ;;  %v5970_v38 = vpop.eup %5969 }
 0x89b   :  { %v1820_v43 = vadd.f32 1.0, %v5970_v38  ;;  %v7009_v38 = vld [vmem:[%s7338_s8] ss:$0 sm:$0xff] }
 0x89c   :  { %5971 = vrcp.f32 %v1813_v30 }
 0x89d   :  { %5973 = vrcp.f32 %v1820_v43  ;;  %v7357_v43 = vsub.s32 2, %v7354_v23 }
 0x8a6   :  { %v5972_v60 = vpop.eup %5971 }
 0x8a7   :  { %v1824_v62 = vmul.f32 %v5972_v60, %v1823_v48  ;;  %v5974_v24 = vpop.eup %5973 }
 0x8a8   :  { %v1828_v63 = vsub.f32 1.0, %v5974_v24  ;;  %v1827_v61 = vmul.f32 %v5974_v24, %v6822_v16  ;;  %v1890_v16 = vld [vmem:[%s7336_s6] sm:$0x7] }
 0x8a9   :  { %v1825_v37 = vadd.f32 %v1824_v62, %v6550_v59  ;;  %v6998_v11 = vrot.slane %v1890_v16, %v7355_v0  ;;  %v7002_v22 = vrot.slane %v1890_v16, %v7356_v31  ;;  %v7013_v47 = vrot.slane %v1890_v16, %v7357_v43 }
 0x8aa   :  { %v6936_v3 = vpop.f32.mrb[40].mxu1 }
 0x8ab   :  { %5975 = vtanh.f32 %v1825_v37  ;;  %v6938_v17 = vpop.f32.mrb[41].mxu1  ;;  %v2092_v43 = vadd.f32 %v6936_v3, %v7013_v47 }
 0x8ac   :  { %v2087_v37 = vadd.f32 %v6938_v17, %v7013_v47 }
 0x8ae   :  { %v6940_v27 = vpop.f32.mrb[42].mxu1 }
 0x8af   :  { %v6942_v54 = vpop.f32.mrb[43].mxu1 }
 0x8b2   :  { %v6944_v42 = vpop.f32.mrb[44].mxu1 }
 0x8b3   :  { %v6946_v55 = vpop.f32.mrb[45].mxu1 }
 0x8b5   :  { %v5976_v49 = vpop.eup %5975 }
 0x8b6   :  { %v1829_v21 = vmul.f32 %v5976_v49, %v1828_v63 }
 0x8b8   :  { %v1830_v59 = vadd.f32 %v1829_v21, %v1827_v61 }
 0x8ba   :  { %2014 = vmatmul.mubr.f32.gmra.mrb[30].mxu0 %v1830_v59  ;;  %4439 = vmatmul.mubr.f32.gmra.mrb[46].mxu1 %v1830_v59 }
 0x8bb   :  { %2267 = vmatprep.mubr.f32.mxu0 %v7353_v56  ;;  %4473 = vmatprep.mubr.msk.f32.mxu1 %vm6185_vm0, %v7353_v56 }
 0x8be   :  { %2268 = vmatmul.mubr.f32.vlgmr.msra.gmra.mrb[16].mxu0 %v7353_v56  ;;  %4474 = vmatmul.mubr.f32.vlgmr.msra.gmra.mrb[48].mxu1 %v7353_v56 }
 0x8bf   :  { %5400 = vmatpush1.bf16.msra.mxu0 %v6851_v8  ;;  %5431 = vmatpush3.bf16.msra.mxu1 %v6889_v36 }
 0x8c0   :  { %5402 = vmatprep.subr.bf16.mxu0 %v6855_v9  ;;  %5432 = vmatprep.subr.bf16.mxu1 %v7352_v51 }
 0x8c1   :  { %2440 = vmatprep.mubr.f32.mxu0 %v7353_v56  ;;  %4508 = vmatprep.mubr.msk.f32.mxu1 %vm6185_vm0, %v7353_v56 }
 0x8c3   :  { %5404 = vmatpush1.bf16.msra.mxu0 %v6857_v40  ;;  %5434 = vmatpush3.bf16.msra.mxu1 %v6900_v5 }
 0x8c4   :  { %5406 = vmatprep.subr.bf16.mxu0 %v6861_v45  ;;  %5435 = vmatprep.subr.bf16.mxu1 %v7352_v51 }
 0x8c7   :  { %5408 = vmatpush1.bf16.msra.mxu0 %v6863_v13  ;;  %5437 = vmatpush3.bf16.msra.mxu1 %v6906_v4 }
 0x8c8   :  { %5410 = vmatprep.subr.bf16.mxu0 %v6867_v35  ;;  %5438 = vmatprep.subr.bf16.mxu1 %v7352_v51 }
 0x8cb   :  { %5412 = vmatpush1.bf16.msra.mxu0 %v6869_v52  ;;  %5440 = vmatpush3.bf16.msra.mxu1 %v6909_v28 }
 0x8cc   :  { %5414 = vmatprep.subr.bf16.mxu0 %v6873_v6  ;;  %5441 = vmatprep.subr.bf16.mxu1 %v7352_v51 }
 0x8cf   :  { %5416 = vmatpush1.bf16.msra.mxu0 %v6875_v29  ;;  %5443 = vmatpush3.bf16.msra.mxu1 %v6913_v53 }
 0x8d0   :  { %5418 = vmatprep.subr.bf16.mxu0 %v6879_v19  ;;  %5444 = vmatprep.subr.bf16.mxu1 %v7352_v51 }
 0x8d3   :  { %5420 = vmatpush1.bf16.msra.mxu0 %v6881_v33  ;;  %5446 = vmatpush3.bf16.msra.mxu1 %v6917_v18 }
 0x8d4   :  { %5422 = vmatprep.subr.bf16.mxu0 %v6885_v50  ;;  %5447 = vmatprep.subr.bf16.mxu1 %v7352_v51 }
 0x8d7   :  { %5424 = vmatpush1.bf16.msra.mxu0 %v6887_v12  ;;  %5449 = vmatpush3.bf16.msra.mxu1 %v6921_v2 }
 0x8d8   :  { %5426 = vmatprep.subr.bf16.mxu0 %v6892_v46  ;;  %5450 = vmatprep.subr.bf16.mxu1 %v7352_v51 }
 0x8db   :  { %5428 = vmatpush1.bf16.msra.mxu0 %v6898_v10  ;;  %5452 = vmatpush3.bf16.msra.mxu1 %v6925_v26 }
 0x8dc   :  { %5454 = vmatprep.subr.bf16.mxu0 %v6849_v58  ;;  %5485 = vmatprep.subr.bf16.mxu1 %v7352_v51 }
 0x98d   :  { %v6992_v7 = vpop.f32.mrb[46].mxu1 }
 0x98e   :  { %v6994_v32 = vpop.f32.mrb[47].mxu1 }
 0x991   :  { %v2269_v14 = vpop.f32.mrb[16].mxu0  ;;  %v2340_v39 = vpop.f32.mrb[48].mxu1 }
 0x992   :  { %v5853_v44 = vadd.f32 %v2269_v14, %v6998_v11  ;;  %v2271_v57 = vpop.f32.mrb[17].mxu0  ;;  %v4475_v1 = vpop.f32.mrb[49].mxu1  ;;  %v2364_v60 = vadd.f32 %v7009_v38, %v2340_v39 }
 0x993   :  { %v5854_v20 = vadd.f32 %v2271_v57, %v7002_v22 }
 0x994   :  { %v3711_v15 = vmul.f32 -1.442695, %v5853_v44 }
 0x995   :  { %v3712_v34 = vmul.f32 -1.442695, %v5854_v20 }
 0x996   :  { %5977 = vpow2.f32 %v3711_v15 }
 0x997   :  { %5979 = vpow2.f32 %v3712_v34 }
 0x9a0   :  { %v5978_v41 = vpop.eup %5977 }
 0x9a1   :  { %v2348_v25 = vadd.f32 1.0, %v5978_v41  ;;  %v5980_v30 = vpop.eup %5979 }
 0x9a2   :  { %v2355_v48 = vadd.f32 1.0, %v5980_v30 }
 0x9a3   :  { %5981 = vrcp.f32 %v2348_v25 }
 0x9a4   :  { %5983 = vrcp.f32 %v2355_v48 }
 0x9ad   :  { %v5982_v62 = vpop.eup %5981 }
 0x9ae   :  { %v2365_v24 = vmul.f32 %v5982_v62, %v2364_v60  ;;  %v5984_v49 = vpop.eup %5983 }
 0x9af   :  { %v2369_v61 = vsub.f32 1.0, %v5984_v49  ;;  %v2368_v59 = vmul.f32 0.0, %v5984_v49 }
 0x9b0   :  { %v2366_v63 = vadd.f32 %v2365_v24, %v2087_v37 }
 0x9b2   :  { %5985 = vtanh.f32 %v2366_v63 }
 0x9bc   :  { %v5986_v21 = vpop.eup %5985 }
 0x9bd   :  { %v2370_v0 = vmul.f32 %v5986_v21, %v2369_v61 }
 0x9bf   :  { %v7018_v14 = vadd.f32 %v2370_v0, %v2368_v59 }
 0x9c1   :  { %2441 = vmatmul.mubr.f32.vlgmr.msra.gmra.mrb[18].mxu0 %v7018_v14  ;;  %4509 = vmatmul.mubr.f32.vlgmr.msra.gmra.mrb[50].mxu1 %v7018_v14 }
 0x9c2   :  { %5456 = vmatpush1.bf16.msra.mxu0 %v6851_v8  ;;  %5487 = vmatpush3.bf16.msra.mxu1 %v6889_v36 }
 0x9c3   :  { %5458 = vmatprep.subr.bf16.mxu0 %v6855_v9  ;;  %5488 = vmatprep.subr.bf16.mxu1 %v7352_v51 }
 0x9c4   :  { %2607 = vmatprep.mubr.f32.mxu0 %v7353_v56  ;;  %4543 = vmatprep.mubr.msk.f32.mxu1 %vm6185_vm0, %v7353_v56 }
 0x9c6   :  { %5460 = vmatpush1.bf16.msra.mxu0 %v6857_v40  ;;  %5490 = vmatpush3.bf16.msra.mxu1 %v6900_v5 }
 0x9c7   :  { %5462 = vmatprep.subr.bf16.mxu0 %v6861_v45  ;;  %5491 = vmatprep.subr.bf16.mxu1 %v7352_v51 }
 0x9ca   :  { %5464 = vmatpush1.bf16.msra.mxu0 %v6863_v13  ;;  %5493 = vmatpush3.bf16.msra.mxu1 %v6906_v4 }
 0x9cb   :  { %5466 = vmatprep.subr.bf16.mxu0 %v6867_v35  ;;  %5494 = vmatprep.subr.bf16.mxu1 %v7352_v51 }
 0x9ce   :  { %5468 = vmatpush1.bf16.msra.mxu0 %v6869_v52  ;;  %5496 = vmatpush3.bf16.msra.mxu1 %v6909_v28 }
 0x9cf   :  { %5470 = vmatprep.subr.bf16.mxu0 %v6873_v6  ;;  %5497 = vmatprep.subr.bf16.mxu1 %v7352_v51 }
 0x9d2   :  { %5472 = vmatpush1.bf16.msra.mxu0 %v6875_v29  ;;  %5499 = vmatpush3.bf16.msra.mxu1 %v6913_v53 }
 0x9d3   :  { %5474 = vmatprep.subr.bf16.mxu0 %v6879_v19  ;;  %5500 = vmatprep.subr.bf16.mxu1 %v7352_v51 }
 0x9d6   :  { %5476 = vmatpush1.bf16.msra.mxu0 %v6881_v33  ;;  %5502 = vmatpush3.bf16.msra.mxu1 %v6917_v18 }
 0x9d7   :  { %5478 = vmatprep.subr.bf16.mxu0 %v6885_v50  ;;  %5503 = vmatprep.subr.bf16.mxu1 %v7352_v51 }
 0x9da   :  { %5480 = vmatpush1.bf16.msra.mxu0 %v6887_v12  ;;  %5505 = vmatpush3.bf16.msra.mxu1 %v6921_v2 }
 0x9db   :  { %5482 = vmatprep.subr.bf16.mxu0 %v6892_v46  ;;  %5506 = vmatprep.subr.bf16.mxu1 %v7352_v51 }
 0x9de   :  { %5484 = vmatpush1.bf16.msra.mxu0 %v6898_v10  ;;  %5508 = vmatpush3.bf16.msra.mxu1 %v6925_v26 }
 0x9df   :  { %5510 = vmatprep.subr.bf16.mxu0 %v6849_v58  ;;  %5541 = vmatprep.subr.bf16.mxu1 %v7352_v51 }
 0xa94   :  { %v2442_v17 = vpop.f32.mrb[18].mxu0  ;;  %v2513_v16 = vpop.f32.mrb[50].mxu1 }
 0xa95   :  { %v5855_v23 = vadd.f32 %v2442_v17, %v6998_v11  ;;  %v2444_v31 = vpop.f32.mrb[19].mxu0  ;;  %v4510_v39 = vpop.f32.mrb[51].mxu1  ;;  %v2531_v25 = vadd.f32 %v7009_v38, %v2513_v16 }
 0xa96   :  { %v5856_v57 = vadd.f32 %v2444_v31, %v7002_v22 }
 0xa97   :  { %v3714_v44 = vmul.f32 -1.442695, %v5855_v23 }
 0xa98   :  { %v3715_v1 = vmul.f32 -1.442695, %v5856_v57 }
 0xa99   :  { %5987 = vpow2.f32 %v3714_v44 }
 0xa9a   :  { %5989 = vpow2.f32 %v3715_v1 }
 0xaa3   :  { %v5988_v15 = vpop.eup %5987 }
 0xaa4   :  { %v2521_v20 = vadd.f32 1.0, %v5988_v15  ;;  %v5990_v34 = vpop.eup %5989 }
 0xaa5   :  { %v2528_v41 = vadd.f32 1.0, %v5990_v34  ;;  %v2097_v34 = vadd.f32 %v6942_v54, %v7013_v47 }
 0xaa6   :  { %5991 = vrcp.f32 %v2521_v20 }
 0xaa7   :  { %5993 = vrcp.f32 %v2528_v41 }
 0xab0   :  { %v5992_v30 = vpop.eup %5991 }
 0xab1   :  { %v2532_v48 = vmul.f32 %v5992_v30, %v2531_v25  ;;  %v5994_v62 = vpop.eup %5993 }
 0xab2   :  { %v2536_v37 = vsub.f32 1.0, %v5994_v62  ;;  %v2535_v63 = vmul.f32 %v5994_v62, %v7018_v14 }
 0xab3   :  { %v2533_v60 = vadd.f32 %v2532_v48, %v2092_v43 }
 0xab5   :  { %5995 = vtanh.f32 %v2533_v60 }
 0xabf   :  { %v5996_v24 = vpop.eup %5995 }
 0xac0   :  { %v2537_v49 = vmul.f32 %v5996_v24, %v2536_v37 }
 0xac2   :  { %v7063_v61 = vadd.f32 %v2537_v49, %v2535_v63 }
 0xac4   :  { %2608 = vmatmul.mubr.f32.vlgmr.msra.gmra.mrb[20].mxu0 %v7063_v61  ;;  %4544 = vmatmul.mubr.f32.vlgmr.msra.gmra.mrb[52].mxu1 %v7063_v61 }
 0xac5   :  { %5512 = vmatpush1.bf16.msra.mxu0 %v6851_v8  ;;  %5543 = vmatpush3.bf16.msra.mxu1 %v6889_v36 }
 0xac6   :  { %5514 = vmatprep.subr.bf16.mxu0 %v6855_v9  ;;  %5544 = vmatprep.subr.bf16.mxu1 %v7352_v51 }
 0xac7   :  { %2774 = vmatprep.mubr.f32.mxu0 %v7353_v56  ;;  %4578 = vmatprep.mubr.msk.f32.mxu1 %vm6185_vm0, %v7353_v56 }
 0xac9   :  { %5516 = vmatpush1.bf16.msra.mxu0 %v6857_v40  ;;  %5546 = vmatpush3.bf16.msra.mxu1 %v6900_v5 }
 0xaca   :  { %5518 = vmatprep.subr.bf16.mxu0 %v6861_v45  ;;  %5547 = vmatprep.subr.bf16.mxu1 %v7352_v51 }
 0xacd   :  { %5520 = vmatpush1.bf16.msra.mxu0 %v6863_v13  ;;  %5549 = vmatpush3.bf16.msra.mxu1 %v6906_v4 }
 0xace   :  { %5522 = vmatprep.subr.bf16.mxu0 %v6867_v35  ;;  %5550 = vmatprep.subr.bf16.mxu1 %v7352_v51 }
 0xad1   :  { %5524 = vmatpush1.bf16.msra.mxu0 %v6869_v52  ;;  %5552 = vmatpush3.bf16.msra.mxu1 %v6909_v28 }
 0xad2   :  { %5526 = vmatprep.subr.bf16.mxu0 %v6873_v6  ;;  %5553 = vmatprep.subr.bf16.mxu1 %v7352_v51 }
 0xad5   :  { %5528 = vmatpush1.bf16.msra.mxu0 %v6875_v29  ;;  %5555 = vmatpush3.bf16.msra.mxu1 %v6913_v53 }
 0xad6   :  { %5530 = vmatprep.subr.bf16.mxu0 %v6879_v19  ;;  %5556 = vmatprep.subr.bf16.mxu1 %v7352_v51 }
 0xad9   :  { %5532 = vmatpush1.bf16.msra.mxu0 %v6881_v33  ;;  %5558 = vmatpush3.bf16.msra.mxu1 %v6917_v18 }
 0xada   :  { %5534 = vmatprep.subr.bf16.mxu0 %v6885_v50  ;;  %5559 = vmatprep.subr.bf16.mxu1 %v7352_v51 }
 0xadd   :  { %5536 = vmatpush1.bf16.msra.mxu0 %v6887_v12  ;;  %5561 = vmatpush3.bf16.msra.mxu1 %v6921_v2 }
 0xade   :  { %5538 = vmatprep.subr.bf16.mxu0 %v6892_v46  ;;  %5562 = vmatprep.subr.bf16.mxu1 %v7352_v51 }
 0xae1   :  { %5540 = vmatpush1.bf16.msra.mxu0 %v6898_v10  ;;  %5564 = vmatpush3.bf16.msra.mxu1 %v6925_v26 }
 0xae2   :  { %5566 = vmatprep.subr.bf16.mxu0 %v6849_v58  ;;  %5597 = vmatprep.subr.bf16.mxu1 %v7352_v51 }
 0xb97   :  { %v2609_v3 = vpop.f32.mrb[20].mxu0  ;;  %v2680_v21 = vpop.f32.mrb[52].mxu1 }
 0xb98   :  { %v5857_v59 = vadd.f32 %v2609_v3, %v6998_v11  ;;  %v2611_v0 = vpop.f32.mrb[21].mxu0  ;;  %v4545_v17 = vpop.f32.mrb[53].mxu1  ;;  %v2698_v15 = vadd.f32 %v7009_v38, %v2680_v21 }
 0xb99   :  { %v5858_v23 = vadd.f32 %v2611_v0, %v7002_v22 }
 0xb9a   :  { %v3716_v16 = vmul.f32 -1.442695, %v5857_v59 }
 0xb9b   :  { %v3717_v31 = vmul.f32 -1.442695, %v5858_v23 }
 0xb9c   :  { %5997 = vpow2.f32 %v3716_v16 }
 0xb9d   :  { %5999 = vpow2.f32 %v3717_v31 }
 0xba6   :  { %v5998_v39 = vpop.eup %5997 }
 0xba7   :  { %v2688_v44 = vadd.f32 1.0, %v5998_v39  ;;  %v6000_v57 = vpop.eup %5999 }
 0xba8   :  { %v2695_v1 = vadd.f32 1.0, %v6000_v57  ;;  %v2102_v57 = vadd.f32 %v6940_v27, %v7013_v47 }
 0xba9   :  { %6001 = vrcp.f32 %v2688_v44 }
 0xbaa   :  { %6003 = vrcp.f32 %v2695_v1 }
 0xbb3   :  { %v6002_v20 = vpop.eup %6001 }
 0xbb4   :  { %v2699_v41 = vmul.f32 %v6002_v20, %v2698_v15  ;;  %v6004_v30 = vpop.eup %6003 }
 0xbb5   :  { %v2703_v43 = vsub.f32 1.0, %v6004_v30  ;;  %v2702_v60 = vmul.f32 %v6004_v30, %v7063_v61 }
 0xbb6   :  { %v2700_v25 = vadd.f32 %v2699_v41, %v2097_v34 }
 0xbb8   :  { %6005 = vtanh.f32 %v2700_v25 }
 0xbc2   :  { %v6006_v48 = vpop.eup %6005 }
 0xbc3   :  { %v2704_v62 = vmul.f32 %v6006_v48, %v2703_v43 }
 0xbc5   :  { %v7108_v37 = vadd.f32 %v2704_v62, %v2702_v60 }
 0xbc7   :  { %2775 = vmatmul.mubr.f32.vlgmr.msra.gmra.mrb[22].mxu0 %v7108_v37  ;;  %4579 = vmatmul.mubr.f32.vlgmr.msra.gmra.mrb[54].mxu1 %v7108_v37 }
 0xbc8   :  { %5568 = vmatpush1.bf16.msra.mxu0 %v6851_v8  ;;  %5599 = vmatpush3.bf16.msra.mxu1 %v6889_v36 }
 0xbc9   :  { %5570 = vmatprep.subr.bf16.mxu0 %v6855_v9  ;;  %5600 = vmatprep.subr.bf16.mxu1 %v7352_v51 }
 0xbca   :  { %2941 = vmatprep.mubr.f32.mxu0 %v7353_v56  ;;  %4613 = vmatprep.mubr.msk.f32.mxu1 %vm6185_vm0, %v7353_v56 }
 0xbcc   :  { %5572 = vmatpush1.bf16.msra.mxu0 %v6857_v40  ;;  %5602 = vmatpush3.bf16.msra.mxu1 %v6900_v5 }
 0xbcd   :  { %5574 = vmatprep.subr.bf16.mxu0 %v6861_v45  ;;  %5603 = vmatprep.subr.bf16.mxu1 %v7352_v51 }
 0xbd0   :  { %5576 = vmatpush1.bf16.msra.mxu0 %v6863_v13  ;;  %5605 = vmatpush3.bf16.msra.mxu1 %v6906_v4 }
 0xbd1   :  { %5578 = vmatprep.subr.bf16.mxu0 %v6867_v35  ;;  %5606 = vmatprep.subr.bf16.mxu1 %v7352_v51 }
 0xbd4   :  { %5580 = vmatpush1.bf16.msra.mxu0 %v6869_v52  ;;  %5608 = vmatpush3.bf16.msra.mxu1 %v6909_v28 }
 0xbd5   :  { %5582 = vmatprep.subr.bf16.mxu0 %v6873_v6  ;;  %5609 = vmatprep.subr.bf16.mxu1 %v7352_v51 }
 0xbd8   :  { %5584 = vmatpush1.bf16.msra.mxu0 %v6875_v29  ;;  %5611 = vmatpush3.bf16.msra.mxu1 %v6913_v53 }
 0xbd9   :  { %5586 = vmatprep.subr.bf16.mxu0 %v6879_v19  ;;  %5612 = vmatprep.subr.bf16.mxu1 %v7352_v51 }
 0xbdc   :  { %5588 = vmatpush1.bf16.msra.mxu0 %v6881_v33  ;;  %5614 = vmatpush3.bf16.msra.mxu1 %v6917_v18 }
 0xbdd   :  { %5590 = vmatprep.subr.bf16.mxu0 %v6885_v50  ;;  %5615 = vmatprep.subr.bf16.mxu1 %v7352_v51 }
 0xbe0   :  { %5592 = vmatpush1.bf16.msra.mxu0 %v6887_v12  ;;  %5617 = vmatpush3.bf16.msra.mxu1 %v6921_v2 }
 0xbe1   :  { %5594 = vmatprep.subr.bf16.mxu0 %v6892_v46  ;;  %5618 = vmatprep.subr.bf16.mxu1 %v7352_v51 }
 0xbe4   :  { %5596 = vmatpush1.bf16.msra.mxu0 %v6898_v10  ;;  %5620 = vmatpush3.bf16.msra.mxu1 %v6925_v26 }
 0xbe5   :  { %5622 = vmatprep.subr.bf16.mxu0 %v6849_v58  ;;  %5653 = vmatprep.subr.bf16.mxu1 %v7352_v51 }
 0xc9a   :  { %v2776_v54 = vpop.f32.mrb[22].mxu0  ;;  %v2847_v24 = vpop.f32.mrb[54].mxu1 }
 0xc9b   :  { %v5859_v63 = vadd.f32 %v2776_v54, %v6998_v11  ;;  %v2778_v49 = vpop.f32.mrb[23].mxu0  ;;  %v4580_v3 = vpop.f32.mrb[55].mxu1  ;;  %v2865_v39 = vadd.f32 %v7009_v38, %v2847_v24 }
 0xc9c   :  { %v5860_v59 = vadd.f32 %v2778_v49, %v7002_v22 }
 0xc9d   :  { %v3718_v21 = vmul.f32 -1.442695, %v5859_v63 }
 0xc9e   :  { %v3719_v0 = vmul.f32 -1.442695, %v5860_v59 }
 0xc9f   :  { %6007 = vpow2.f32 %v3718_v21 }
 0xca0   :  { %6009 = vpow2.f32 %v3719_v0 }
 0xca9   :  { %v6008_v17 = vpop.eup %6007 }
 0xcaa   :  { %v2855_v16 = vadd.f32 1.0, %v6008_v17  ;;  %v6010_v23 = vpop.eup %6009 }
 0xcab   :  { %v2862_v31 = vadd.f32 1.0, %v6010_v23  ;;  %v2107_v23 = vadd.f32 %v6946_v55, %v7013_v47 }
 0xcac   :  { %6011 = vrcp.f32 %v2855_v16 }
 0xcad   :  { %6013 = vrcp.f32 %v2862_v31 }
 0xcb6   :  { %v6012_v44 = vpop.eup %6011 }
 0xcb7   :  { %v2866_v1 = vmul.f32 %v6012_v44, %v2865_v39  ;;  %v6014_v20 = vpop.eup %6013 }
 0xcb8   :  { %v2870_v34 = vsub.f32 1.0, %v6014_v20  ;;  %v2869_v25 = vmul.f32 %v6014_v20, %v7108_v37 }
 0xcb9   :  { %v2867_v15 = vadd.f32 %v2866_v1, %v2102_v57 }
 0xcbb   :  { %6015 = vtanh.f32 %v2867_v15 }
 0xcc5   :  { %v6016_v41 = vpop.eup %6015 }
 0xcc6   :  { %v2871_v30 = vmul.f32 %v6016_v41, %v2870_v34 }
 0xcc8   :  { %v7153_v43 = vadd.f32 %v2871_v30, %v2869_v25 }
 0xcca   :  { %2942 = vmatmul.mubr.f32.vlgmr.msra.gmra.mrb[24].mxu0 %v7153_v43  ;;  %4614 = vmatmul.mubr.f32.vlgmr.msra.gmra.mrb[56].mxu1 %v7153_v43 }
 0xccb   :  { %5624 = vmatpush1.bf16.msra.mxu0 %v6851_v8  ;;  %5655 = vmatpush3.bf16.msra.mxu1 %v6889_v36 }
 0xccc   :  { %5626 = vmatprep.subr.bf16.mxu0 %v6855_v9  ;;  %5656 = vmatprep.subr.bf16.mxu1 %v7352_v51 }
 0xccd   :  { %3108 = vmatprep.mubr.f32.mxu0 %v7353_v56  ;;  %4648 = vmatprep.mubr.msk.f32.mxu1 %vm6185_vm0, %v7353_v56 }
 0xccf   :  { %5628 = vmatpush1.bf16.msra.mxu0 %v6857_v40  ;;  %5658 = vmatpush3.bf16.msra.mxu1 %v6900_v5 }
 0xcd0   :  { %5630 = vmatprep.subr.bf16.mxu0 %v6861_v45  ;;  %5659 = vmatprep.subr.bf16.mxu1 %v7352_v51 }
 0xcd3   :  { %5632 = vmatpush1.bf16.msra.mxu0 %v6863_v13  ;;  %5661 = vmatpush3.bf16.msra.mxu1 %v6906_v4 }
 0xcd4   :  { %5634 = vmatprep.subr.bf16.mxu0 %v6867_v35  ;;  %5662 = vmatprep.subr.bf16.mxu1 %v7352_v51 }
 0xcd7   :  { %5636 = vmatpush1.bf16.msra.mxu0 %v6869_v52  ;;  %5664 = vmatpush3.bf16.msra.mxu1 %v6909_v28 }
 0xcd8   :  { %5638 = vmatprep.subr.bf16.mxu0 %v6873_v6  ;;  %5665 = vmatprep.subr.bf16.mxu1 %v7352_v51 }
 0xcdb   :  { %5640 = vmatpush1.bf16.msra.mxu0 %v6875_v29  ;;  %5667 = vmatpush3.bf16.msra.mxu1 %v6913_v53 }
 0xcdc   :  { %5642 = vmatprep.subr.bf16.mxu0 %v6879_v19  ;;  %5668 = vmatprep.subr.bf16.mxu1 %v7352_v51 }
 0xcdf   :  { %5644 = vmatpush1.bf16.msra.mxu0 %v6881_v33  ;;  %5670 = vmatpush3.bf16.msra.mxu1 %v6917_v18 }
 0xce0   :  { %5646 = vmatprep.subr.bf16.mxu0 %v6885_v50  ;;  %5671 = vmatprep.subr.bf16.mxu1 %v7352_v51 }
 0xce3   :  { %5648 = vmatpush1.bf16.msra.mxu0 %v6887_v12  ;;  %5673 = vmatpush3.bf16.msra.mxu1 %v6921_v2 }
 0xce4   :  { %5650 = vmatprep.subr.bf16.mxu0 %v6892_v46  ;;  %5674 = vmatprep.subr.bf16.mxu1 %v7352_v51 }
 0xce7   :  { %5652 = vmatpush1.bf16.msra.mxu0 %v6898_v10  ;;  %5676 = vmatpush3.bf16.msra.mxu1 %v6925_v26 }
 0xce8   :  { %5678 = vmatprep.subr.bf16.mxu0 %v6849_v58  ;;  %5709 = vmatprep.subr.bf16.mxu1 %v7352_v51 }
 0xd9d   :  { %v2943_v27 = vpop.f32.mrb[24].mxu0  ;;  %v3014_v48 = vpop.f32.mrb[56].mxu1 }
 0xd9e   :  { %v5861_v60 = vadd.f32 %v2943_v27, %v6998_v11  ;;  %v2945_v62 = vpop.f32.mrb[25].mxu0  ;;  %v4615_v54 = vpop.f32.mrb[57].mxu1  ;;  %v3032_v17 = vadd.f32 %v7009_v38, %v3014_v48 }
 0xd9f   :  { %v5862_v63 = vadd.f32 %v2945_v62, %v7002_v22 }
 0xda0   :  { %v3720_v24 = vmul.f32 -1.442695, %v5861_v60 }
 0xda1   :  { %v3721_v49 = vmul.f32 -1.442695, %v5862_v63 }
 0xda2   :  { %6017 = vpow2.f32 %v3720_v24 }
 0xda3   :  { %6019 = vpow2.f32 %v3721_v49 }
 0xdac   :  { %v6018_v3 = vpop.eup %6017 }
 0xdad   :  { %v3022_v21 = vadd.f32 1.0, %v6018_v3  ;;  %v6020_v59 = vpop.eup %6019 }
 0xdae   :  { %v3029_v0 = vadd.f32 1.0, %v6020_v59 }
 0xdaf   :  { %6021 = vrcp.f32 %v3022_v21  ;;  %v2112_v21 = vadd.f32 %v6944_v42, %v7013_v47 }
 0xdb0   :  { %6023 = vrcp.f32 %v3029_v0 }
 0xdb9   :  { %v6022_v16 = vpop.eup %6021 }
 0xdba   :  { %v3033_v31 = vmul.f32 %v6022_v16, %v3032_v17  ;;  %v6024_v44 = vpop.eup %6023 }
 0xdbb   :  { %v3037_v57 = vsub.f32 1.0, %v6024_v44  ;;  %v3036_v15 = vmul.f32 %v6024_v44, %v7153_v43 }
 0xdbc   :  { %v3034_v39 = vadd.f32 %v3033_v31, %v2107_v23 }
 0xdbe   :  { %6025 = vtanh.f32 %v3034_v39 }
 0xdc8   :  { %v6026_v1 = vpop.eup %6025 }
 0xdc9   :  { %v3038_v20 = vmul.f32 %v6026_v1, %v3037_v57 }
 0xdcb   :  { %v7198_v34 = vadd.f32 %v3038_v20, %v3036_v15  ;;  %v3555_v20 = vld [vmem:[#allocation12 + $0x20] sm:$0xff] }
 0xdcd   :  { %3109 = vmatmul.mubr.f32.vlgmr.msra.gmra.mrb[26].mxu0 %v7198_v34  ;;  %4649 = vmatmul.mubr.f32.vlgmr.msra.gmra.mrb[58].mxu1 %v7198_v34 }
 0xdce   :  { %5680 = vmatpush1.bf16.msra.mxu0 %v6851_v8  ;;  %5711 = vmatpush3.bf16.msra.mxu1 %v6889_v36 }
 0xdcf   :  { %5682 = vmatprep.subr.bf16.mxu0 %v6855_v9  ;;  %5712 = vmatprep.subr.bf16.mxu1 %v7352_v51 }
 0xdd0   :  { %3275 = vmatprep.mubr.f32.mxu0 %v7353_v56  ;;  %4683 = vmatprep.mubr.msk.f32.mxu1 %vm6185_vm0, %v7353_v56 }
 0xdd2   :  { %5684 = vmatpush1.bf16.msra.mxu0 %v6857_v40  ;;  %5714 = vmatpush3.bf16.msra.mxu1 %v6900_v5 }
 0xdd3   :  { %5686 = vmatprep.subr.bf16.mxu0 %v6861_v45  ;;  %5715 = vmatprep.subr.bf16.mxu1 %v7352_v51 }
 0xdd6   :  { %5688 = vmatpush1.bf16.msra.mxu0 %v6863_v13  ;;  %5717 = vmatpush3.bf16.msra.mxu1 %v6906_v4 }
 0xdd7   :  { %5690 = vmatprep.subr.bf16.mxu0 %v6867_v35  ;;  %5718 = vmatprep.subr.bf16.mxu1 %v7352_v51 }
 0xdda   :  { %5692 = vmatpush1.bf16.msra.mxu0 %v6869_v52  ;;  %5720 = vmatpush3.bf16.msra.mxu1 %v6909_v28 }
 0xddb   :  { %5694 = vmatprep.subr.bf16.mxu0 %v6873_v6  ;;  %5721 = vmatprep.subr.bf16.mxu1 %v7352_v51 }
 0xdde   :  { %5696 = vmatpush1.bf16.msra.mxu0 %v6875_v29  ;;  %5723 = vmatpush3.bf16.msra.mxu1 %v6913_v53 }
 0xddf   :  { %5698 = vmatprep.subr.bf16.mxu0 %v6879_v19  ;;  %5724 = vmatprep.subr.bf16.mxu1 %v7352_v51 }
 0xde2   :  { %5700 = vmatpush1.bf16.msra.mxu0 %v6881_v33  ;;  %5726 = vmatpush3.bf16.msra.mxu1 %v6917_v18 }
 0xde3   :  { %5702 = vmatprep.subr.bf16.mxu0 %v6885_v50  ;;  %5727 = vmatprep.subr.bf16.mxu1 %v7352_v51 }
 0xde6   :  { %5704 = vmatpush1.bf16.msra.mxu0 %v6887_v12  ;;  %5729 = vmatpush3.bf16.msra.mxu1 %v6921_v2 }
 0xde7   :  { %5706 = vmatprep.subr.bf16.mxu0 %v6892_v46  ;;  %5730 = vmatprep.subr.bf16.mxu1 %v7352_v51 }
 0xdea   :  { %5708 = vmatpush1.bf16.msra.mxu0 %v6898_v10  ;;  %5732 = vmatpush3.bf16.msra.mxu1 %v6925_v26 }
 0xdeb   :  { %5734 = vmatprep.subr.bf16.mxu0 %v6849_v58  ;;  %5765 = vmatprep.subr.bf16.mxu1 %v7352_v51 }
 0xea0   :  { %v3110_v55 = vpop.f32.mrb[26].mxu0  ;;  %v3181_v41 = vpop.f32.mrb[58].mxu1 }
 0xea1   :  { %v5863_v25 = vadd.f32 %v3110_v55, %v6998_v11  ;;  %v3112_v30 = vpop.f32.mrb[27].mxu0  ;;  %v4650_v27 = vpop.f32.mrb[59].mxu1  ;;  %v3199_v58 = vadd.f32 %v7009_v38, %v3181_v41  ;;  %v3556_v55 = vld [vmem:[#allocation12 + $0x28] sm:$0xff]  ;;  %v3557_v41 = vld [vmem:[#allocation12 + $0x30] sm:$0xff] }
 0xea2   :  { %v5864_v60 = vadd.f32 %v3112_v30, %v7002_v22  ;;  %v3559_v27 = vld [vmem:[#allocation12 + $0x40] sm:$0xff] }
 0xea3   :  { %v3722_v48 = vmul.f32 -1.442695, %v5863_v25  ;;  %v3558_v25 = vld [vmem:[#allocation12 + $0x38] sm:$0xff] }
 0xea4   :  { %v3723_v62 = vmul.f32 -1.442695, %v5864_v60  ;;  %v5801_v30 = vpack.c.bf16 %v3558_v25, %v3557_v41 }
 0xea5   :  { %6027 = vpow2.f32 %v3722_v48  ;;  %v3560_v48 = vld [vmem:[#allocation12 + $0x48] sm:$0xff] }
 0xea6   :  { %6029 = vpow2.f32 %v3723_v62  ;;  %v5805_v60 = vpack.c.bf16 %v3560_v48, %v3559_v27  ;;  %v3561_v62 = vld [vmem:[#allocation12 + $0x50] sm:$0xff] }
 0xeaf   :  { %v6028_v54 = vpop.eup %6027 }
 0xeb0   :  { %v3189_v24 = vadd.f32 1.0, %v6028_v54  ;;  %v6030_v63 = vpop.eup %6029  ;;  %v3562_v54 = vld [vmem:[#allocation12 + $0x58] sm:$0xff] }
 0xeb1   :  { %v3196_v49 = vadd.f32 1.0, %v6030_v63  ;;  %v3563_v63 = vld [vmem:[#allocation12 + $0x60] sm:$0xff] }
 0xeb2   :  { %6031 = vrcp.f32 %v3189_v24  ;;  %v5809_v24 = vpack.c.bf16 %v3562_v54, %v3561_v62 }
 0xeb3   :  { %6033 = vrcp.f32 %v3196_v49  ;;  %v3564_v49 = vld [vmem:[#allocation12 + $0x68] sm:$0xff] }
 0xebc   :  { %v6032_v3 = vpop.eup %6031 }
 0xebd   :  { %v3200_v59 = vmul.f32 %v6032_v3, %v3199_v58  ;;  %v6034_v17 = vpop.eup %6033  ;;  %v3565_v58 = vld [vmem:[#allocation12 + $0x70] sm:$0xff]  ;;  %v3566_v3 = vld [vmem:[#allocation12 + $0x78] sm:$0xff] }
 0xebe   :  { %v3204_v16 = vsub.f32 1.0, %v6034_v17  ;;  %v3203_v31 = vmul.f32 %v6034_v17, %v7198_v34 }
 0xebf   :  { %v3201_v0 = vadd.f32 %v3200_v59, %v2112_v21  ;;  %v5817_v21 = vpack.c.bf16 %v3566_v3, %v3565_v58 }
 0xec1   :  { %6035 = vtanh.f32 %v3201_v0 }
 0xecb   :  { %v6036_v23 = vpop.eup %6035 }
 0xecc   :  { %v3205_v39 = vmul.f32 %v6036_v23, %v3204_v16 }
 0xece   :  { %v7243_v44 = vadd.f32 %v3205_v39, %v3203_v31 }
 0xed0   :  { %3276 = vmatmul.mubr.f32.vlgmr.msra.gmra.mrb[28].mxu0 %v7243_v44  ;;  %4684 = vmatmul.mubr.f32.vlgmr.msra.gmra.mrb[60].mxu1 %v7243_v44 }
 0xed1   :  { %5736 = vmatpush1.bf16.msra.mxu0 %v6851_v8  ;;  %5767 = vmatpush3.bf16.msra.mxu1 %v6889_v36  ;;  %v3552_v8 = vld [vmem:[#allocation12 + $0x8] sm:$0xff] }
 0xed2   :  { %5738 = vmatprep.subr.bf16.mxu0 %v6855_v9  ;;  %5768 = vmatprep.subr.bf16.mxu1 %v7352_v51 }
 0xed3   :  { %3442 = vmatprep.mubr.f32.mxu0 %v7353_v56  ;;  %4718 = vmatprep.mubr.msk.f32.mxu1 %vm6185_vm0, %v7353_v56  ;;  %v3551_v56 = vld [vmem:[#allocation12] sm:$0xff] }
 0xed4   :  { %v5789_v9 = vpack.c.bf16 %v3552_v8, %v3551_v56 }
 0xed5   :  { %5740 = vmatpush1.bf16.msra.mxu0 %v6857_v40  ;;  %5770 = vmatpush3.bf16.msra.mxu1 %v6900_v5 }
 0xed6   :  { %5742 = vmatprep.subr.bf16.mxu0 %v6861_v45  ;;  %5771 = vmatprep.subr.bf16.mxu1 %v7352_v51 }
 0xed9   :  { %5744 = vmatpush1.bf16.msra.mxu0 %v6863_v13  ;;  %5773 = vmatpush3.bf16.msra.mxu1 %v6906_v4 }
 0xeda   :  { %5746 = vmatprep.subr.bf16.mxu0 %v6867_v35  ;;  %5774 = vmatprep.subr.bf16.mxu1 %v7352_v51 }
 0xedd   :  { %5748 = vmatpush1.bf16.msra.mxu0 %v6869_v52  ;;  %5776 = vmatpush3.bf16.msra.mxu1 %v6909_v28 }
 0xede   :  { %5750 = vmatprep.subr.bf16.mxu0 %v6873_v6  ;;  %5777 = vmatprep.subr.bf16.mxu1 %v7352_v51 }
 0xee1   :  { %5752 = vmatpush1.bf16.msra.mxu0 %v6875_v29  ;;  %5779 = vmatpush3.bf16.msra.mxu1 %v6913_v53 }
 0xee2   :  { %5754 = vmatprep.subr.bf16.mxu0 %v6879_v19  ;;  %5780 = vmatprep.subr.bf16.mxu1 %v7352_v51 }
 0xee5   :  { %5756 = vmatpush1.bf16.msra.mxu0 %v6881_v33  ;;  %5782 = vmatpush3.bf16.msra.mxu1 %v6917_v18 }
 0xee6   :  { %5758 = vmatprep.subr.bf16.mxu0 %v6885_v50  ;;  %5783 = vmatprep.subr.bf16.mxu1 %v7352_v51 }
 0xee9   :  { %5760 = vmatpush1.bf16.msra.mxu0 %v6887_v12  ;;  %5785 = vmatpush3.bf16.msra.mxu1 %v6921_v2  ;;  %v3553_v2 = vld [vmem:[#allocation12 + $0x10] sm:$0xff] }
 0xeea   :  { %5762 = vmatprep.subr.bf16.mxu0 %v6892_v46  ;;  %5786 = vmatprep.subr.bf16.mxu1 %v7352_v51 }
 0xeed   :  { %5764 = vmatpush1.bf16.msra.mxu0 %v6898_v10  ;;  %5788 = vmatpush3.bf16.msra.mxu1 %v6925_v26  ;;  %v2117_v10 = vadd.f32 %v6994_v32, %v7013_v47  ;;  %v3554_v26 = vld [vmem:[#allocation12 + $0x18] sm:$0xff]  ;;  %v5797_v32 = vpack.c.bf16 %v3556_v55, %v3555_v20 }
 0xeee   :  { %5790 = vmatprep.subr.bf16.mxu0 %v5789_v9  ;;  %v5793_v15 = vpack.c.bf16 %v3554_v26, %v3553_v2 }
 0xfa3   :  { %v3277_v40 = vpop.f32.mrb[28].mxu0  ;;  %v3348_v45 = vpop.f32.mrb[60].mxu1 }
 0xfa4   :  { %v5865_v13 = vadd.f32 %v3277_v40, %v6998_v11  ;;  %v3279_v35 = vpop.f32.mrb[29].mxu0  ;;  %v4685_v52 = vpop.f32.mrb[61].mxu1  ;;  %v3366_v36 = vadd.f32 %v7009_v38, %v3348_v45 }
 0xfa5   :  { %v5866_v29 = vadd.f32 %v3279_v35, %v7002_v22 }
 0xfa6   :  { %v3724_v6 = vmul.f32 -1.442695, %v5865_v13 }
 0xfa7   :  { %v3725_v19 = vmul.f32 -1.442695, %v5866_v29 }
 0xfa8   :  { %6037 = vpow2.f32 %v3724_v6 }
 0xfa9   :  { %6039 = vpow2.f32 %v3725_v19 }
 0xfb2   :  { %v6038_v51 = vpop.eup %6037 }
 0xfb3   :  { %v3356_v33 = vadd.f32 1.0, %v6038_v51  ;;  %v6040_v50 = vpop.eup %6039 }
 0xfb4   :  { %v3363_v12 = vadd.f32 1.0, %v6040_v50 }
 0xfb5   :  { %6041 = vrcp.f32 %v3356_v33 }
 0xfb6   :  { %6043 = vrcp.f32 %v3363_v12 }
 0xfbf   :  { %v6042_v46 = vpop.eup %6041 }
 0xfc0   :  { %v3367_v5 = vmul.f32 %v6042_v46, %v3366_v36  ;;  %v6044_v28 = vpop.eup %6043 }
 0xfc1   :  { %v3371_v53 = vsub.f32 1.0, %v6044_v28  ;;  %v3370_v42 = vmul.f32 %v6044_v28, %v7243_v44 }
 0xfc2   :  { %v3368_v4 = vadd.f32 %v3367_v5, %v2117_v10 }
 0xfc4   :  { %6045 = vtanh.f32 %v3368_v4 }
 0xfce   :  { %v6046_v18 = vpop.eup %6045 }
 0xfcf   :  { %v3372_v57 = vmul.f32 %v6046_v18, %v3371_v53 }
 0xfd1   :  { %v7286_v1 = vadd.f32 %v3372_v57, %v3370_v42 }
 0xfd3   :  { %3443 = vmatmul.mubr.f32.vlgmr.msra.gmra.mrb[30].mxu0 %v7286_v1  ;;  %4719 = vmatmul.mubr.f32.vlgmr.msra.gmra.mrb[62].mxu1 %v7286_v1 }
 0xfd4   :  { %5792 = vmatpush3.bf16.msra.mxu0 %v5789_v9  ;;  %4753 = vmatprep.mubr.f32.mxu0 %v7018_v14  ;;  %v5813_v14 = vpack.c.bf16 %v3564_v49, %v3563_v63  ;;  %v2122_v9 = vadd.f32 %v6992_v7, %v7013_v47 }
 0xfd5   :  { %5794 = vmatprep.subr.bf16.mxu0 %v5793_v15 }
 0xfd8   :  { %5796 = vmatpush3.bf16.msra.mxu0 %v5793_v15 }
 0xfd9   :  { %5798 = vmatprep.subr.bf16.mxu0 %v5797_v32 }
 0xfdc   :  { %5800 = vmatpush3.bf16.msra.mxu0 %v5797_v32 }
 0xfdd   :  { %5802 = vmatprep.subr.bf16.mxu0 %v5801_v30 }
 0xfe0   :  { %5804 = vmatpush3.bf16.msra.mxu0 %v5801_v30 }
 0xfe1   :  { %5806 = vmatprep.subr.bf16.mxu0 %v5805_v60 }
 0xfe4   :  { %5808 = vmatpush3.bf16.msra.mxu0 %v5805_v60 }
 0xfe5   :  { %5810 = vmatprep.subr.bf16.mxu0 %v5809_v24 }
 0xfe8   :  { %5812 = vmatpush3.bf16.msra.mxu0 %v5809_v24 }
 0xfe9   :  { %5814 = vmatprep.subr.bf16.mxu0 %v5813_v14 }
 0xfec   :  { %5816 = vmatpush3.bf16.msra.mxu0 %v5813_v14 }
 0xfed   :  { %5818 = vmatprep.subr.bf16.mxu0 %v5817_v21 }
 0xff0   :  { %5820 = vmatpush3.bf16.msra.mxu0 %v5817_v21 }
 0xff3   :  { %4754 = vmatmul.mubr.f32.vlgmr.msra.gmra.mrb[32].mxu0 %v7063_v61 }
 0xff4   :  { %4756 = vmatprep.mubr.f32.mxu0 %v7108_v37 }
 0xff7   :  { %4757 = vmatmul.mubr.f32.gmra.mrb[34].mxu0 %v7153_v43 }
 0xff8   :  { %4759 = vmatprep.mubr.f32.mxu0 %v7198_v34 }
 0xffb   :  { %4760 = vmatmul.mubr.f32.gmra.mrb[36].mxu0 %v7243_v44 }
 0xffc   :  { %4762 = vmatprep.mubr.f32.mxu0 %v7286_v1 }
0x10a6   :  { %v3444_v59 = vpop.f32.mrb[30].mxu0  ;;  %v3515_v0 = vpop.f32.mrb[62].mxu1 }
0x10a7   :  { %v5867_v17 = vadd.f32 %v3444_v59, %v6998_v11  ;;  %v3446_v16 = vpop.f32.mrb[31].mxu0  ;;  %v4720_v23 = vpop.f32.mrb[63].mxu1  ;;  %v3533_v44 = vadd.f32 %v7009_v38, %v3515_v0 }
0x10a8   :  { %v5868_v39 = vadd.f32 %v3446_v16, %v7002_v22  ;;  %v3728_v22 = vld [vmem:[%s7340_s10] ss:$0 sm:$0xff] }
0x10a9   :  { %v3726_v31 = vmul.f32 -1.442695, %v5867_v17 }
0x10aa   :  { %v3727_v61 = vmul.f32 -1.442695, %v5868_v39 }
0x10ab   :  { %6047 = vpow2.f32 %v3726_v31 }
0x10ac   :  { %6049 = vpow2.f32 %v3727_v61 }
0x10b5   :  { %v6048_v37 = vpop.eup %6047 }
0x10b6   :  { %v3523_v43 = vadd.f32 1.0, %v6048_v37  ;;  %v6050_v34 = vpop.eup %6049 }
0x10b7   :  { %v3530_v56 = vadd.f32 1.0, %v6050_v34 }
0x10b8   :  { %6051 = vrcp.f32 %v3523_v43 }
0x10b9   :  { %6053 = vrcp.f32 %v3530_v56 }
0x10c2   :  { %v6052_v8 = vpop.eup %6051 }
0x10c3   :  { %v3534_v11 = vmul.f32 %v6052_v8, %v3533_v44  ;;  %v6054_v29 = vpop.eup %6053 }
0x10c4   :  { %v3538_v12 = vsub.f32 1.0, %v6054_v29  ;;  %v3537_v46 = vmul.f32 %v6054_v29, %v7286_v1 }
0x10c5   :  { %v3535_v40 = vadd.f32 %v3534_v11, %v2122_v9 }
0x10c6   :  { %v4755_v45 = vpop.f32.mrb[32].mxu0 }
0x10c7   :  { %6055 = vtanh.f32 %v3535_v40  ;;  %v3646_v13 = vadd.f32 %v4755_v45, %v3728_v22  ;;  %v3640_v35 = vpop.f32.mrb[33].mxu0 }
0x10c8   :  { %v3641_v52 = vadd.f32 %v3728_v22, %v3640_v35 }
0x10c9   :  { %3680 = vst [vmem:[%s7341_s11 + $0x8] sm:$0xff] %v3646_v13 }
0x10ca   :  { %3679 = vst [vmem:[%s7341_s11] sm:$0xff] %v3641_v52  ;;  %v4758_v7 = vpop.f32.mrb[34].mxu0 }
0x10cb   :  { %v3656_v38 = vadd.f32 %v4758_v7, %v3728_v22  ;;  %v3650_v47 = vpop.f32.mrb[35].mxu0 }
0x10cc   :  { %v3651_v6 = vadd.f32 %v3728_v22, %v3650_v47 }
0x10cd   :  { %3682 = vst [vmem:[%s7341_s11 + $0x18] sm:$0xff] %v3656_v38 }
0x10ce   :  { %3681 = vst [vmem:[%s7341_s11 + $0x10] sm:$0xff] %v3651_v6  ;;  %v4761_v19 = vpop.f32.mrb[36].mxu0 }
0x10cf   :  { %v3666_v51 = vadd.f32 %v4761_v19, %v3728_v22  ;;  %v3660_v33 = vpop.f32.mrb[37].mxu0 }
0x10d0   :  { %v3661_v50 = vadd.f32 %v3728_v22, %v3660_v33 }
0x10d1   :  { %v6056_v36 = vpop.eup %6055  ;;  %3684 = vst [vmem:[%s7341_s11 + $0x28] sm:$0xff] %v3666_v51 }
0x10d2   :  { %3683 = vst [vmem:[%s7341_s11 + $0x20] sm:$0xff] %v3661_v50  ;;  %v3539_v10 = vmul.f32 %v6056_v36, %v3538_v12 }
0x10d4   :  { %v3540_v5 = vadd.f32 %v3539_v10, %v3537_v46 }
0x10d6   :  { %4763 = vmatmul.mubr.f32.gmra.mrb[38].mxu0 %v3540_v5 }
0x11a9   :  { %v4764_v4 = vpop.f32.mrb[38].mxu0 }
0x11aa   :  { %v3676_v28 = vadd.f32 %v4764_v4, %v3728_v22  ;;  %v3670_v53 = vpop.f32.mrb[39].mxu0 }
0x11ab   :  { %v3671_v18 = vadd.f32 %v3728_v22, %v3670_v53 }
0x11ac   :  { %3686 = vst [vmem:[%s7341_s11 + $0x38] sm:$0xff] %v3676_v28 }
0x11ad   :  { %3685 = vst [vmem:[%s7341_s11 + $0x30] sm:$0xff] %v3671_v18 }
0x11ae   :  { %3691 = vsyncpa [#allocation6], 1 }
0x11af   :  { %3692 = vsyncpa [#allocation8], 1 }
0x11b0   :  { %3693 = vsyncpa [#allocation11], 1 }

</bundles_post_ra>
